<compile_context>
chip_gen: v7x
topology: tpu7x:2x2x1
jax: 0.10.0
libtpu: 0.0.40
codegen_flags: <defaults>
</compile_context>

<pallas_src>
import functools
import math

import jax
import jax.numpy as jnp
from jax.experimental import pallas as pl
from jax.experimental.pallas import tpu as pltpu


# ----------------------------- small helpers -----------------------------

def _bf16_dot(a, w):
    """bf16 MXU matmul with f32 accumulation (no-op cast if already bf16)."""
    return jnp.dot(a.astype(jnp.bfloat16), w.astype(jnp.bfloat16),
                   preferred_element_type=jnp.float32)


def _layernorm(x, g, b, eps):
    mu = jnp.mean(x, axis=-1, keepdims=True)
    var = jnp.mean(jnp.square(x - mu), axis=-1, keepdims=True)
    return (x - mu) * jax.lax.rsqrt(var + eps) * g + b


@functools.lru_cache(maxsize=None)
def _vmem_capacity_bytes():
    try:
        info = pltpu.get_tpu_info()
        cap = getattr(info, "vmem_capacity_bytes", None)
        if cap:
            return int(cap)
    except Exception:
        pass
    try:
        kind = jax.devices()[0].device_kind.lower()
    except Exception:
        kind = ""
    return 64 * 2**20 if "v7" in kind else 128 * 2**20


@functools.lru_cache(maxsize=None)
def _vmem_limit_bytes():
    cap = _vmem_capacity_bytes()
    headroom = 8 * 2**20 if cap <= 64 * 2**20 else 16 * 2**20   # v7x vs v5e/v6e
    return int(cap - headroom)


@functools.lru_cache(maxsize=None)
def _compiler_params():
    return pltpu.CompilerParams(
        dimension_semantics=("parallel",),
        vmem_limit_bytes=_vmem_limit_bytes())


def _resident(shape):
    """Weight/bias block: constant index_map across the token grid, so keep a
    single VMEM copy (no double buffering)."""
    index_map = lambda *_: (0,) * len(shape)
    try:
        return pl.BlockSpec(shape, index_map, pipeline_mode=pl.Buffered(1))
    except Exception:                       # older JAX without pipeline_mode
        return pl.BlockSpec(shape, index_map)


def _pick_tile_patches(num_patches, seq_b, target_rows):
    """Largest divisor d of P with d*seq_b <= target_rows, preferring
    MXU-friendly row alignment (256/128/16/8) and >=2 grid steps (megacore)."""
    divisors = [d for d in range(1, num_patches + 1) if num_patches % d == 0]
    for min_steps in (2, 1):
        for align in (256, 128, 16, 8, 1):
            cands = [d for d in divisors
                     if d * seq_b <= target_rows
                     and (d * seq_b) % align == 0
                     and num_patches // d >= min_steps]
            if cands:
                return max(cands)
    return 1


# ----------------------------- Pallas kernels -----------------------------

def _embed_kernel(x_ref, w_ref, b_ref, pos_ref, o_ref):
    # patch embedding + bias + (pre-broadcast) positional encoding, f32 math,
    # bf16 activation slab out.
    y = _bf16_dot(x_ref[...], w_ref[...]) + b_ref[...] + pos_ref[...]
    o_ref[...] = y.astype(o_ref.dtype)


def _encoder_layer_kernel(x_ref, wqkv_ref, bqkv_ref, wo_ref, bo_ref,
                          ln1g_ref, ln1b_ref, w1_ref, b1_ref, w2_ref, b2_ref,
                          ln2g_ref, ln2b_ref, o_ref, attn_sc,
                          *, num_heads, seq_b, eps):
    src = x_ref[...]                                  # (TM, E) bf16
    tm, e = src.shape
    hd = e // num_heads
    tnb = tm // seq_b                                 # patches in this tile

    # ---- fused QKV projection (q-scale already folded into weights/bias) ----
    qkv = _bf16_dot(src, wqkv_ref[...]) + bqkv_ref[...]       # (TM, 3E) f32
    q3 = qkv[:, :e].reshape(tnb, seq_b, e)
    k3 = qkv[:, e:2 * e].reshape(tnb, seq_b, e)
    v3 = qkv[:, 2 * e:].reshape(tnb, seq_b, e)

    # ---- per-head attention; head outputs land in a bf16 VMEM scratch at
    #      static lane offsets (no f32 concat / lane relayout) ----
    for h in range(num_heads):                        # static unroll
        sl = slice(h * hd, (h + 1) * hd)
        qh = q3[:, :, sl].astype(jnp.bfloat16)
        kh = k3[:, :, sl].astype(jnp.bfloat16)
        vh = v3[:, :, sl].astype(jnp.bfloat16)
        # contracts last dims of both operands: no transpose of k needed
        s = jnp.einsum("nld,nmd->nlm", qh, kh,
                       preferred_element_type=jnp.float32)
        s = s - jnp.max(s, axis=-1, keepdims=True)
        p = jnp.exp(s)
        p = p * pl.reciprocal(jnp.sum(p, axis=-1, keepdims=True), approx=True)
        oh = jnp.einsum("nlm,nmd->nld", p.astype(jnp.bfloat16), vh,
                        preferred_element_type=jnp.float32)
        attn_sc[:, sl] = oh.reshape(tm, hd).astype(attn_sc.dtype)

    # ---- out-proj (one big matmul over the scratch) + residual + LN1 ----
    attn_out = _bf16_dot(attn_sc[...], wo_ref[...]) + bo_ref[...]
    h1 = _layernorm(src.astype(jnp.float32) + attn_out,
                    ln1g_ref[...], ln1b_ref[...], eps)

    # ---- MLP + residual + LN2 ----
    ff = jnp.maximum(_bf16_dot(h1, w1_ref[...]) + b1_ref[...], 0.0)
    ff = _bf16_dot(ff, w2_ref[...]) + b2_ref[...]
    # TODO(synk): dropout (p=0.1 in torch train mode) omitted -- eval-mode semantics.
    o_ref[...] = _layernorm(h1 + ff, ln2g_ref[...], ln2b_ref[...],
                            eps).astype(o_ref.dtype)


def _final_ln_kernel(x_ref, g_ref, b_ref, o_ref, *, eps):
    o_ref[...] = _layernorm(x_ref[...].astype(jnp.float32),
                            g_ref[...], b_ref[...], eps)


# ----------------------------- pallas_call wrappers -----------------------------

def patch_embed(x2d, w, b, pos2d, *, tile_m):
    M, Din = x2d.shape
    E = w.shape[1]
    return pl.pallas_call(
        _embed_kernel,
        out_shape=jax.ShapeDtypeStruct((M, E), jnp.bfloat16),
        grid=(M // tile_m,),
        in_specs=[
            pl.BlockSpec((tile_m, Din), lambda i: (i, 0)),
            _resident((Din, E)),
            _resident((1, E)),
            pl.BlockSpec((tile_m, E), lambda i: (i, 0)),
        ],
        out_specs=pl.BlockSpec((tile_m, E), lambda i: (i, 0)),
        compiler_params=_compiler_params(),
    )(x2d, w, b, pos2d)


def encoder_layer(h2d, layer, *, num_heads, seq_b, tile_m, eps=1e-5):
    M, E = h2d.shape
    F = layer["lin1_w"].shape[1]
    return pl.pallas_call(
        functools.partial(_encoder_layer_kernel, num_heads=num_heads,
                          seq_b=seq_b, eps=eps),
        out_shape=jax.ShapeDtypeStruct((M, E), jnp.bfloat16),
        grid=(M // tile_m,),
        in_specs=[
            pl.BlockSpec((tile_m, E), lambda i: (i, 0)),   # activations (tiled)
            _resident((E, 3 * E)), _resident((1, 3 * E)),  # in_proj (q pre-scaled)
            _resident((E, E)), _resident((1, E)),          # out_proj
            _resident((1, E)), _resident((1, E)),          # ln1
            _resident((E, F)), _resident((1, F)),          # lin1
            _resident((F, E)), _resident((1, E)),          # lin2
            _resident((1, E)), _resident((1, E)),          # ln2
        ],
        out_specs=pl.BlockSpec((tile_m, E), lambda i: (i, 0)),
        scratch_shapes=[pltpu.VMEM((tile_m, E), jnp.bfloat16)],
        compiler_params=_compiler_params(),
    )(h2d,
      layer["in_proj_w"], layer["in_proj_b"],
      layer["out_proj_w"], layer["out_proj_b"],
      layer["ln1_g"], layer["ln1_b"],
      layer["lin1_w"], layer["lin1_b"],
      layer["lin2_w"], layer["lin2_b"],
      layer["ln2_g"], layer["ln2_b"])


def final_layer_norm(x2d, g, b, *, tile_m, eps=1e-5):
    M, E = x2d.shape
    return pl.pallas_call(
        functools.partial(_final_ln_kernel, eps=eps),
        out_shape=jax.ShapeDtypeStruct((M, E), jnp.float32),
        grid=(M // tile_m,),
        in_specs=[
            pl.BlockSpec((tile_m, E), lambda i: (i, 0)),
            _resident((1, E)),
            _resident((1, E)),
        ],
        out_specs=pl.BlockSpec((tile_m, E), lambda i: (i, 0)),
        compiler_params=_compiler_params(),
    )(x2d, g, b)


# ----------------------------- parameters -----------------------------

def init_params(key, input_dim, num_patches, embed_dim, num_heads, mlp_dim, num_layers):
    """f32 'torch-like' master parameters."""
    del num_heads
    scale = 0.02
    keys = jax.random.split(key, 4 + num_layers)
    params = {
        "patch_w": scale * jax.random.normal(keys[0], (input_dim, embed_dim), jnp.float32),
        "patch_b": scale * jax.random.normal(keys[1], (embed_dim,), jnp.float32),
        "pos": jax.random.normal(keys[2], (1, num_patches, embed_dim), jnp.float32),
        "final_ln_g": jnp.ones((embed_dim,), jnp.float32),
        "final_ln_b": jnp.zeros((embed_dim,), jnp.float32),
    }
    layers = []
    for l in range(num_layers):
        lk = jax.random.split(keys[4 + l], 8)
        layers.append(dict(
            in_proj_w=scale * jax.random.normal(lk[0], (embed_dim, 3 * embed_dim), jnp.float32),
            in_proj_b=scale * jax.random.normal(lk[1], (3 * embed_dim,), jnp.float32),
            out_proj_w=scale * jax.random.normal(lk[2], (embed_dim, embed_dim), jnp.float32),
            out_proj_b=scale * jax.random.normal(lk[3], (embed_dim,), jnp.float32),
            lin1_w=scale * jax.random.normal(lk[4], (embed_dim, mlp_dim), jnp.float32),
            lin1_b=scale * jax.random.normal(lk[5], (mlp_dim,), jnp.float32),
            lin2_w=scale * jax.random.normal(lk[6], (mlp_dim, embed_dim), jnp.float32),
            lin2_b=scale * jax.random.normal(lk[7], (embed_dim,), jnp.float32),
            ln1_g=jnp.ones((embed_dim,), jnp.float32),
            ln1_b=jnp.zeros((embed_dim,), jnp.float32),
            ln2_g=jnp.ones((embed_dim,), jnp.float32),
            ln2_b=jnp.zeros((embed_dim,), jnp.float32),
        ))
    params["layers"] = layers
    return params


def prepare_params(params, num_heads):
    """One-time prep: bf16 weights, q-scale folded into in_proj, (1,X) biases."""
    E = params["patch_w"].shape[1]
    hd = E // num_heads
    q_scale = 1.0 / math.sqrt(hd)
    wdt = jnp.bfloat16

    def row(v):
        return jnp.asarray(v, jnp.float32).reshape(1, -1)

    prepared = {
        "patch_w": params["patch_w"].astype(wdt),
        "patch_b": row(params["patch_b"]),
        "pos": params["pos"].astype(jnp.float32),
        "final_ln_g": row(params["final_ln_g"]),
        "final_ln_b": row(params["final_ln_b"]),
    }
    qscale_vec = jnp.concatenate([jnp.full((E,), q_scale, jnp.float32),
                                  jnp.ones((2 * E,), jnp.float32)])
    layers = []
    for layer in params["layers"]:
        layers.append(dict(
            in_proj_w=(layer["in_proj_w"] * qscale_vec[None, :]).astype(wdt),
            in_proj_b=row(layer["in_proj_b"] * qscale_vec),
            out_proj_w=layer["out_proj_w"].astype(wdt),
            out_proj_b=row(layer["out_proj_b"]),
            ln1_g=row(layer["ln1_g"]), ln1_b=row(layer["ln1_b"]),
            lin1_w=layer["lin1_w"].astype(wdt), lin1_b=row(layer["lin1_b"]),
            lin2_w=layer["lin2_w"].astype(wdt), lin2_b=row(layer["lin2_b"]),
            ln2_g=row(layer["ln2_g"]), ln2_b=row(layer["ln2_b"]),
        ))
    prepared["layers"] = layers
    return prepared


# ----------------------------- forward (Pallas) -----------------------------

def vit_forward(prepared, x, *, num_heads, tile_rows=None):
    B, P, Din = x.shape
    E = prepared["patch_w"].shape[1]
    if tile_rows is None:
        # v7x (64 MiB VMEM, 2 TCs each holding its own weight copy): smaller tiles.
        tile_rows = 256 if _vmem_capacity_bytes() <= 80 * 2**20 else 512
    tnb = _pick_tile_patches(P, B, tile_rows)
    tm = tnb * B

    # one-time layout change: rows ordered (patch, batch) so each patch's B
    # attention rows are contiguous inside every token tile.
    x2d = jnp.transpose(x, (1, 0, 2)).reshape(P * B, Din)
    pos2d = jnp.broadcast_to(prepared["pos"].reshape(P, 1, E),
                             (P, B, E)).reshape(P * B, E)

    h = patch_embed(x2d, prepared["patch_w"], prepared["patch_b"], pos2d,
                    tile_m=tm)
    for layer in prepared["layers"]:
        h = encoder_layer(h, layer, num_heads=num_heads, seq_b=B, tile_m=tm)
    out = final_layer_norm(h, prepared["final_ln_g"], prepared["final_ln_b"],
                           tile_m=tm)
    return out.reshape(P, B, E).transpose(1, 0, 2)        # back to (B, P, E)


# --------------------- pure-JAX reference (same numerics) ---------------------

def vit_reference(prepared, x, num_heads):
    """Mirrors torch semantics with the kernel's dtype policy (bf16 matmuls,
    bf16 inter-layer slab, f32 LayerNorm/softmax stats)."""
    B, P, Din = x.shape
    E = prepared["patch_w"].shape[1]
    hd = E // num_heads

    def ln(y, g, b, eps=1e-5):
        mu = y.mean(-1, keepdims=True)
        var = ((y - mu) ** 2).mean(-1, keepdims=True)
        return (y - mu) / jnp.sqrt(var + eps) * g + b

    h = _bf16_dot(x.reshape(B * P, Din), prepared["patch_w"]) + prepared["patch_b"]
    h = (h.reshape(B, P, E) + prepared["pos"]).astype(jnp.bfloat16)
    for layer in prepared["layers"]:
        src = h.reshape(B * P, E).astype(jnp.float32)
        qkv = _bf16_dot(h.reshape(B * P, E), layer["in_proj_w"]) + layer["in_proj_b"]
        q, k, v = jnp.split(qkv, 3, axis=-1)          # q already scaled (folded)

        def to_heads(t):                               # (B*P,E) -> (P,H,B,hd)
            return t.reshape(B, P, num_heads, hd).transpose(1, 2, 0, 3).astype(jnp.bfloat16)

        qh, kh, vh = to_heads(q), to_heads(k), to_heads(v)
        s = jnp.einsum("phld,phmd->phlm", qh, kh, preferred_element_type=jnp.float32)
        p = jax.nn.softmax(s, axis=-1)
        a = jnp.einsum("phlm,phmd->phld", p.astype(jnp.bfloat16), vh,
                       preferred_element_type=jnp.float32)
        a = a.transpose(2, 0, 1, 3).reshape(B * P, E).astype(jnp.bfloat16)
        a = _bf16_dot(a, layer["out_proj_w"]) + layer["out_proj_b"]
        h1 = ln(src + a, layer["ln1_g"], layer["ln1_b"])
        ff = jnp.maximum(_bf16_dot(h1, layer["lin1_w"]) + layer["lin1_b"], 0.0)
        ff = _bf16_dot(ff, layer["lin2_w"]) + layer["lin2_b"]
        h = ln(h1 + ff, layer["ln2_g"], layer["ln2_b"]).astype(jnp.bfloat16).reshape(B, P, E)
    out = ln(h.reshape(B * P, E).astype(jnp.float32),
             prepared["final_ln_g"], prepared["final_ln_b"])
    return out.reshape(B, P, E)


# ----------------------------- main -----------------------------

if __name__ == "__main__":
    # small shapes consistent with the module's forward
    B, P, D_IN, E, H, MLP, NLAYERS = 2, 16, 16, 32, 4, 64, 2

    x = jax.random.normal(jax.random.PRNGKey(0), (B, P, D_IN), jnp.float32)
    params = init_params(jax.random.PRNGKey(42), D_IN, P, E, H, MLP, NLAYERS)
    prepared = prepare_params(params, num_heads=H)

    # tile_rows=16 -> 16-row (bf16-friendly) tiles and a 2-step token grid even
    # at these tiny shapes, exercising the pipelined M loop with VMEM-resident,
    # single-buffered per-layer weights.
    fwd = jax.jit(functools.partial(vit_forward, num_heads=H, tile_rows=16))
    out = jax.block_until_ready(fwd(prepared, x))

    ref = vit_reference(prepared, x, H)
    assert out.shape == (B, P, E)
    err = float(jnp.max(jnp.abs(out - ref)))
    assert jnp.allclose(out, ref, atol=1e-2, rtol=1e-2), err

    print("KERNEL_OK")
</pallas_src>

<mosaic_0001>
module attributes {stable_mosaic.version = 11 : i64} {
  func.func @_embed_kernel(%arg0: i32, %arg1: memref<16x16xf32, #tpu.memory_space<vmem>>, %arg2: memref<16x32xbf16, #tpu.memory_space<vmem>>, %arg3: memref<1x32xf32, #tpu.memory_space<vmem>>, %arg4: memref<16x32xf32, #tpu.memory_space<vmem>>, %arg5: memref<16x32xbf16, #tpu.memory_space<vmem>>) attributes {dimension_semantics = [#tpu.dimension_semantics<parallel>], iteration_bounds = array<i64: 2>, scalar_prefetch = 0 : i64, scratch_operands = 0 : i64, tpu.core_type = #tpu.core_type<tc>, window_params = [{transform_indices = @transform_0, window_bounds = array<i64: 16, 16>}, {pipeline_mode = #tpu.pipeline_mode<synchronous>, transform_indices = @transform_1, window_bounds = array<i64: 16, 32>}, {pipeline_mode = #tpu.pipeline_mode<synchronous>, transform_indices = @transform_2, window_bounds = array<i64: 1, 32>}, {transform_indices = @transform_3, window_bounds = array<i64: 16, 32>}, {transform_indices = @transform_4, window_bounds = array<i64: 16, 32>}]} {
    %c0 = arith.constant 0 : index
    %c0_0 = arith.constant 0 : index
    %0 = vector.load %arg1[%c0, %c0_0] : memref<16x16xf32, #tpu.memory_space<vmem>>, vector<16x16xf32>
    %c0_1 = arith.constant 0 : index
    %c0_2 = arith.constant 0 : index
    %1 = vector.load %arg2[%c0_1, %c0_2] : memref<16x32xbf16, #tpu.memory_space<vmem>>, vector<16x32xbf16>
    %2 = arith.truncf %0 : vector<16x16xf32> to vector<16x16xbf16>
    %cst = arith.constant dense<0.000000e+00> : vector<16x32xf32>
    %3 = tpu.matmul %2, %1, %cst {dimension_numbers = #tpu.dot_dimension_numbers<[1], [0], [0], [1], [0, 0, 1, 1], [], []>} : vector<16x16xbf16>, vector<16x32xbf16>, vector<16x32xf32> -> vector<16x32xf32>
    %c0_3 = arith.constant 0 : index
    %c0_4 = arith.constant 0 : index
    %4 = vector.load %arg3[%c0_3, %c0_4] : memref<1x32xf32, #tpu.memory_space<vmem>>, vector<1x32xf32>
    %5 = vector.broadcast %4 : vector<1x32xf32> to vector<16x32xf32>
    %6 = arith.addf %3, %5 : vector<16x32xf32>
    %c0_5 = arith.constant 0 : index
    %c0_6 = arith.constant 0 : index
    %7 = vector.load %arg4[%c0_5, %c0_6] : memref<16x32xf32, #tpu.memory_space<vmem>>, vector<16x32xf32>
    %8 = arith.addf %6, %7 : vector<16x32xf32>
    %9 = arith.truncf %8 : vector<16x32xf32> to vector<16x32xbf16>
    %c0_7 = arith.constant 0 : index
    %c0_8 = arith.constant 0 : index
    %10 = vector.load %arg5[%c0_7, %c0_8] : memref<16x32xbf16, #tpu.memory_space<vmem>>, vector<16x32xbf16>
    tpu.vector_store %arg5[%c0_7, %c0_8], %9 {strides = array<i32>} : memref<16x32xbf16, #tpu.memory_space<vmem>>, vector<16x32xbf16>,
    return
  }
  func.func @transform_0(%arg0: i32) -> (i32, i32) {
    %c0_i32 = arith.constant 0 : i32
    %c0_i32_0 = arith.constant 0 : i32
    return %arg0, %c0_i32 : i32, i32
  }
  func.func @transform_1(%arg0: i32) -> (i32, i32) {
    %c0_i32 = arith.constant 0 : i32
    %c0_i32_0 = arith.constant 0 : i32
    %c0_i32_1 = arith.constant 0 : i32
    return %c0_i32, %c0_i32_0 : i32, i32
  }
  func.func @transform_2(%arg0: i32) -> (i32, i32) {
    %c0_i32 = arith.constant 0 : i32
    %c0_i32_0 = arith.constant 0 : i32
    %c0_i32_1 = arith.constant 0 : i32
    return %c0_i32, %c0_i32_0 : i32, i32
  }
  func.func @transform_3(%arg0: i32) -> (i32, i32) {
    %c0_i32 = arith.constant 0 : i32
    %c0_i32_0 = arith.constant 0 : i32
    return %arg0, %c0_i32 : i32, i32
  }
  func.func @transform_4(%arg0: i32) -> (i32, i32) {
    %c0_i32 = arith.constant 0 : i32
    %c0_i32_0 = arith.constant 0 : i32
    return %arg0, %c0_i32 : i32, i32
  }
}

module attributes {stable_mosaic.version = 11 : i64} {
  func.func @_final_ln_kernel(%arg0: i32, %arg1: memref<16x32xbf16, #tpu.memory_space<vmem>>, %arg2: memref<1x32xf32, #tpu.memory_space<vmem>>, %arg3: memref<1x32xf32, #tpu.memory_space<vmem>>, %arg4: memref<16x32xf32, #tpu.memory_space<vmem>>) attributes {dimension_semantics = [#tpu.dimension_semantics<parallel>], iteration_bounds = array<i64: 2>, scalar_prefetch = 0 : i64, scratch_operands = 0 : i64, tpu.core_type = #tpu.core_type<tc>, window_params = [{transform_indices = @transform_0, window_bounds = array<i64: 16, 32>}, {pipeline_mode = #tpu.pipeline_mode<synchronous>, transform_indices = @transform_1, window_bounds = array<i64: 1, 32>}, {pipeline_mode = #tpu.pipeline_mode<synchronous>, transform_indices = @transform_2, window_bounds = array<i64: 1, 32>}, {transform_indices = @transform_3, window_bounds = array<i64: 16, 32>}]} {
    %c0 = arith.constant 0 : index
    %c0_0 = arith.constant 0 : index
    %0 = vector.load %arg1[%c0, %c0_0] : memref<16x32xbf16, #tpu.memory_space<vmem>>, vector<16x32xbf16>
    %1 = arith.extf %0 : vector<16x32xbf16> to vector<16x32xf32>
    %c0_1 = arith.constant 0 : index
    %c0_2 = arith.constant 0 : index
    %2 = vector.load %arg2[%c0_1, %c0_2] : memref<1x32xf32, #tpu.memory_space<vmem>>, vector<1x32xf32>
    %c0_3 = arith.constant 0 : index
    %c0_4 = arith.constant 0 : index
    %3 = vector.load %arg3[%c0_3, %c0_4] : memref<1x32xf32, #tpu.memory_space<vmem>>, vector<1x32xf32>
    %cst = arith.constant dense<0.000000e+00> : vector<16xf32>
    %4 = vector.multi_reduction <add>, %1, %cst [1] : vector<16x32xf32> to vector<16xf32>
    %5 = vector.shape_cast %4 : vector<16xf32> to vector<16x1xf32>
    %cst_5 = arith.constant 3.200000e+01 : f32
    %6 = vector.broadcast %cst_5 : f32 to vector<16x1xf32>
    %7 = arith.divf %5, %6 : vector<16x1xf32>
    %8 = vector.broadcast %7 : vector<16x1xf32> to vector<16x32xf32>
    %9 = arith.subf %1, %8 : vector<16x32xf32>
    %10 = arith.mulf %9, %9 : vector<16x32xf32>
    %cst_6 = arith.constant dense<0.000000e+00> : vector<16xf32>
    %11 = vector.multi_reduction <add>, %10, %cst_6 [1] : vector<16x32xf32> to vector<16xf32>
    %12 = vector.shape_cast %11 : vector<16xf32> to vector<16x1xf32>
    %cst_7 = arith.constant 3.200000e+01 : f32
    %13 = vector.broadcast %cst_7 : f32 to vector<16x1xf32>
    %14 = arith.divf %12, %13 : vector<16x1xf32>
    %15 = vector.broadcast %7 : vector<16x1xf32> to vector<16x32xf32>
    %16 = arith.subf %1, %15 : vector<16x32xf32>
    %cst_8 = arith.constant 9.99999974E-6 : f32
    %17 = vector.broadcast %cst_8 : f32 to vector<16x1xf32>
    %18 = arith.addf %14, %17 : vector<16x1xf32>
    %19 = math.rsqrt %18 : vector<16x1xf32>
    %20 = vector.broadcast %19 : vector<16x1xf32> to vector<16x32xf32>
    %21 = arith.mulf %16, %20 : vector<16x32xf32>
    %22 = vector.broadcast %2 : vector<1x32xf32> to vector<16x32xf32>
    %23 = arith.mulf %21, %22 : vector<16x32xf32>
    %24 = vector.broadcast %3 : vector<1x32xf32> to vector<16x32xf32>
    %25 = arith.addf %23, %24 : vector<16x32xf32>
    %c0_9 = arith.constant 0 : index
    %c0_10 = arith.constant 0 : index
    %26 = vector.load %arg4[%c0_9, %c0_10] : memref<16x32xf32, #tpu.memory_space<vmem>>, vector<16x32xf32>
    tpu.vector_store %arg4[%c0_9, %c0_10], %25 {strides = array<i32>} : memref<16x32xf32, #tpu.memory_space<vmem>>, vector<16x32xf32>,
    return
  }
  func.func @transform_0(%arg0: i32) -> (i32, i32) {
    %c0_i32 = arith.constant 0 : i32
    %c0_i32_0 = arith.constant 0 : i32
    return %arg0, %c0_i32 : i32, i32
  }
  func.func @transform_1(%arg0: i32) -> (i32, i32) {
    %c0_i32 = arith.constant 0 : i32
    %c0_i32_0 = arith.constant 0 : i32
    %c0_i32_1 = arith.constant 0 : i32
    return %c0_i32, %c0_i32_0 : i32, i32
  }
  func.func @transform_2(%arg0: i32) -> (i32, i32) {
    %c0_i32 = arith.constant 0 : i32
    %c0_i32_0 = arith.constant 0 : i32
    %c0_i32_1 = arith.constant 0 : i32
    return %c0_i32, %c0_i32_0 : i32, i32
  }
  func.func @transform_3(%arg0: i32) -> (i32, i32) {
    %c0_i32 = arith.constant 0 : i32
    %c0_i32_0 = arith.constant 0 : i32
    return %arg0, %c0_i32 : i32, i32
  }
}

module attributes {stable_mosaic.version = 11 : i64} {
  func.func @_encoder_layer_kernel(%arg0: i32, %arg1: memref<16x32xbf16, #tpu.memory_space<vmem>>, %arg2: memref<32x96xbf16, #tpu.memory_space<vmem>>, %arg3: memref<1x96xf32, #tpu.memory_space<vmem>>, %arg4: memref<32x32xbf16, #tpu.memory_space<vmem>>, %arg5: memref<1x32xf32, #tpu.memory_space<vmem>>, %arg6: memref<1x32xf32, #tpu.memory_space<vmem>>, %arg7: memref<1x32xf32, #tpu.memory_space<vmem>>, %arg8: memref<32x64xbf16, #tpu.memory_space<vmem>>, %arg9: memref<1x64xf32, #tpu.memory_space<vmem>>, %arg10: memref<64x32xbf16, #tpu.memory_space<vmem>>, %arg11: memref<1x32xf32, #tpu.memory_space<vmem>>, %arg12: memref<1x32xf32, #tpu.memory_space<vmem>>, %arg13: memref<1x32xf32, #tpu.memory_space<vmem>>, %arg14: memref<16x32xbf16, #tpu.memory_space<vmem>>, %arg15: memref<16x32xbf16, #tpu.memory_space<vmem>>) attributes {dimension_semantics = [#tpu.dimension_semantics<parallel>], iteration_bounds = array<i64: 2>, scalar_prefetch = 0 : i64, scratch_operands = 1 : i64, tpu.core_type = #tpu.core_type<tc>, window_params = [{transform_indices = @transform_0, window_bounds = array<i64: 16, 32>}, {pipeline_mode = #tpu.pipeline_mode<synchronous>, transform_indices = @transform_1, window_bounds = array<i64: 32, 96>}, {pipeline_mode = #tpu.pipeline_mode<synchronous>, transform_indices = @transform_2, window_bounds = array<i64: 1, 96>}, {pipeline_mode = #tpu.pipeline_mode<synchronous>, transform_indices = @transform_3, window_bounds = array<i64: 32, 32>}, {pipeline_mode = #tpu.pipeline_mode<synchronous>, transform_indices = @transform_4, window_bounds = array<i64: 1, 32>}, {pipeline_mode = #tpu.pipeline_mode<synchronous>, transform_indices = @transform_5, window_bounds = array<i64: 1, 32>}, {pipeline_mode = #tpu.pipeline_mode<synchronous>, transform_indices = @transform_6, window_bounds = array<i64: 1, 32>}, {pipeline_mode = #tpu.pipeline_mode<synchronous>, transform_indices = @transform_7, window_bounds = array<i64: 32, 64>}, {pipeline_mode = #tpu.pipeline_mode<synchronous>, transform_indices = @transform_8, window_bounds = array<i64: 1, 64>}, {pipeline_mode = #tpu.pipeline_mode<synchronous>, transform_indices = @transform_9, window_bounds = array<i64: 64, 32>}, {pipeline_mode = #tpu.pipeline_mode<synchronous>, transform_indices = @transform_10, window_bounds = array<i64: 1, 32>}, {pipeline_mode = #tpu.pipeline_mode<synchronous>, transform_indices = @transform_11, window_bounds = array<i64: 1, 32>}, {pipeline_mode = #tpu.pipeline_mode<synchronous>, transform_indices = @transform_12, window_bounds = array<i64: 1, 32>}, {transform_indices = @transform_13, window_bounds = array<i64: 16, 32>}]} {
    %c0 = arith.constant 0 : index
    %c0_0 = arith.constant 0 : index
    %0 = vector.load %arg1[%c0, %c0_0] : memref<16x32xbf16, #tpu.memory_space<vmem>>, vector<16x32xbf16>
    %c0_1 = arith.constant 0 : index
    %c0_2 = arith.constant 0 : index
    %1 = vector.load %arg2[%c0_1, %c0_2] : memref<32x96xbf16, #tpu.memory_space<vmem>>, vector<32x96xbf16>
    %cst = arith.constant dense<0.000000e+00> : vector<16x96xf32>
    %2 = tpu.matmul %0, %1, %cst {dimension_numbers = #tpu.dot_dimension_numbers<[1], [0], [0], [1], [0, 0, 1, 1], [], []>} : vector<16x32xbf16>, vector<32x96xbf16>, vector<16x96xf32> -> vector<16x96xf32>
    %c0_3 = arith.constant 0 : index
    %c0_4 = arith.constant 0 : index
    %3 = vector.load %arg3[%c0_3, %c0_4] : memref<1x96xf32, #tpu.memory_space<vmem>>, vector<1x96xf32>
    %4 = vector.broadcast %3 : vector<1x96xf32> to vector<16x96xf32>
    %5 = arith.addf %2, %4 : vector<16x96xf32>
    %6 = vector.extract_strided_slice %5 {offsets = [0, 0], sizes = [16, 32], strides = [1, 1]} : vector<16x96xf32> to vector<16x32xf32>
    %7 = vector.shape_cast %6 : vector<16x32xf32> to vector<8x2x32xf32>
    %8 = vector.extract_strided_slice %5 {offsets = [0, 32], sizes = [16, 32], strides = [1, 1]} : vector<16x96xf32> to vector<16x32xf32>
    %9 = vector.shape_cast %8 : vector<16x32xf32> to vector<8x2x32xf32>
    %10 = vector.extract_strided_slice %5 {offsets = [0, 64], sizes = [16, 32], strides = [1, 1]} : vector<16x96xf32> to vector<16x32xf32>
    %11 = vector.shape_cast %10 : vector<16x32xf32> to vector<8x2x32xf32>
    %12 = vector.extract_strided_slice %7 {offsets = [0, 0, 0], sizes = [8, 2, 8], strides = [1, 1, 1]} : vector<8x2x32xf32> to vector<8x2x8xf32>
    %13 = arith.truncf %12 : vector<8x2x8xf32> to vector<8x2x8xbf16>
    %14 = vector.extract_strided_slice %9 {offsets = [0, 0, 0], sizes = [8, 2, 8], strides = [1, 1, 1]} : vector<8x2x32xf32> to vector<8x2x8xf32>
    %15 = arith.truncf %14 : vector<8x2x8xf32> to vector<8x2x8xbf16>
    %16 = vector.extract_strided_slice %11 {offsets = [0, 0, 0], sizes = [8, 2, 8], strides = [1, 1, 1]} : vector<8x2x32xf32> to vector<8x2x8xf32>
    %17 = arith.truncf %16 : vector<8x2x8xf32> to vector<8x2x8xbf16>
    "tpu.trace_start"() <{level = 10 : i32, message = "nld,nmd->nlm"}> : () -> ()
    %cst_5 = arith.constant dense<0.000000e+00> : vector<8x2x2xf32>
    %18 = tpu.matmul %13, %15, %cst_5 {dimension_numbers = #tpu.dot_dimension_numbers<[2], [2], [1], [1], [0, 0, 0, 1, 1, 1], [0], [0]>} : vector<8x2x8xbf16>, vector<8x2x8xbf16>, vector<8x2x2xf32> -> vector<8x2x2xf32>
    "tpu.trace_stop"() : () -> ()
    %cst_6 = arith.constant dense<0xFF800000> : vector<8x2xf32>
    %19 = vector.multi_reduction <maximumf>, %18, %cst_6 [2] : vector<8x2x2xf32> to vector<8x2xf32>
    %20 = vector.shape_cast %19 : vector<8x2xf32> to vector<8x2x1xf32>
    %21 = vector.broadcast %20 : vector<8x2x1xf32> to vector<8x2x2xf32>
    %22 = arith.subf %18, %21 : vector<8x2x2xf32>
    %23 = math.exp %22 : vector<8x2x2xf32>
    %cst_7 = arith.constant dense<0.000000e+00> : vector<8x2xf32>
    %24 = vector.multi_reduction <add>, %23, %cst_7 [2] : vector<8x2x2xf32> to vector<8x2xf32>
    %25 = vector.shape_cast %24 : vector<8x2xf32> to vector<8x2x1xf32>
    %26 = tpu.reciprocal %25 {approx = true} : vector<8x2x1xf32> -> vector<8x2x1xf32>
    %27 = vector.broadcast %26 : vector<8x2x1xf32> to vector<8x2x2xf32>
    %28 = arith.mulf %23, %27 : vector<8x2x2xf32>
    %29 = arith.truncf %28 : vector<8x2x2xf32> to vector<8x2x2xbf16>
    "tpu.trace_start"() <{level = 10 : i32, message = "nlm,nmd->nld"}> : () -> ()
    %cst_8 = arith.constant dense<0.000000e+00> : vector<8x2x8xf32>
    %30 = tpu.matmul %29, %17, %cst_8 {dimension_numbers = #tpu.dot_dimension_numbers<[2], [1], [1], [2], [0, 0, 0, 1, 1, 2], [0], [0]>} : vector<8x2x2xbf16>, vector<8x2x8xbf16>, vector<8x2x8xf32> -> vector<8x2x8xf32>
    "tpu.trace_stop"() : () -> ()
    %31 = vector.shape_cast %30 : vector<8x2x8xf32> to vector<16x8xf32>
    %32 = arith.truncf %31 : vector<16x8xf32> to vector<16x8xbf16>
    %c0_9 = arith.constant 0 : index
    %c0_10 = arith.constant 0 : index
    %33 = vector.load %arg15[%c0_9, %c0_10] : memref<16x32xbf16, #tpu.memory_space<vmem>>, vector<16x8xbf16>
    tpu.vector_store %arg15[%c0_9, %c0_10], %32 {strides = array<i32>} : memref<16x32xbf16, #tpu.memory_space<vmem>>, vector<16x8xbf16>,
    %34 = vector.extract_strided_slice %7 {offsets = [0, 0, 8], sizes = [8, 2, 8], strides = [1, 1, 1]} : vector<8x2x32xf32> to vector<8x2x8xf32>
    %35 = arith.truncf %34 : vector<8x2x8xf32> to vector<8x2x8xbf16>
    %36 = vector.extract_strided_slice %9 {offsets = [0, 0, 8], sizes = [8, 2, 8], strides = [1, 1, 1]} : vector<8x2x32xf32> to vector<8x2x8xf32>
    %37 = arith.truncf %36 : vector<8x2x8xf32> to vector<8x2x8xbf16>
    %38 = vector.extract_strided_slice %11 {offsets = [0, 0, 8], sizes = [8, 2, 8], strides = [1, 1, 1]} : vector<8x2x32xf32> to vector<8x2x8xf32>
    %39 = arith.truncf %38 : vector<8x2x8xf32> to vector<8x2x8xbf16>
    "tpu.trace_start"() <{level = 10 : i32, message = "nld,nmd->nlm"}> : () -> ()
    %cst_11 = arith.constant dense<0.000000e+00> : vector<8x2x2xf32>
    %40 = tpu.matmul %35, %37, %cst_11 {dimension_numbers = #tpu.dot_dimension_numbers<[2], [2], [1], [1], [0, 0, 0, 1, 1, 1], [0], [0]>} : vector<8x2x8xbf16>, vector<8x2x8xbf16>, vector<8x2x2xf32> -> vector<8x2x2xf32>
    "tpu.trace_stop"() : () -> ()
    %cst_12 = arith.constant dense<0xFF800000> : vector<8x2xf32>
    %41 = vector.multi_reduction <maximumf>, %40, %cst_12 [2] : vector<8x2x2xf32> to vector<8x2xf32>
    %42 = vector.shape_cast %41 : vector<8x2xf32> to vector<8x2x1xf32>
    %43 = vector.broadcast %42 : vector<8x2x1xf32> to vector<8x2x2xf32>
    %44 = arith.subf %40, %43 : vector<8x2x2xf32>
    %45 = math.exp %44 : vector<8x2x2xf32>
    %cst_13 = arith.constant dense<0.000000e+00> : vector<8x2xf32>
    %46 = vector.multi_reduction <add>, %45, %cst_13 [2] : vector<8x2x2xf32> to vector<8x2xf32>
    %47 = vector.shape_cast %46 : vector<8x2xf32> to vector<8x2x1xf32>
    %48 = tpu.reciprocal %47 {approx = true} : vector<8x2x1xf32> -> vector<8x2x1xf32>
    %49 = vector.broadcast %48 : vector<8x2x1xf32> to vector<8x2x2xf32>
    %50 = arith.mulf %45, %49 : vector<8x2x2xf32>
    %51 = arith.truncf %50 : vector<8x2x2xf32> to vector<8x2x2xbf16>
    "tpu.trace_start"() <{level = 10 : i32, message = "nlm,nmd->nld"}> : () -> ()
    %cst_14 = arith.constant dense<0.000000e+00> : vector<8x2x8xf32>
    %52 = tpu.matmul %51, %39, %cst_14 {dimension_numbers = #tpu.dot_dimension_numbers<[2], [1], [1], [2], [0, 0, 0, 1, 1, 2], [0], [0]>} : vector<8x2x2xbf16>, vector<8x2x8xbf16>, vector<8x2x8xf32> -> vector<8x2x8xf32>
    "tpu.trace_stop"() : () -> ()
    %53 = vector.shape_cast %52 : vector<8x2x8xf32> to vector<16x8xf32>
    %54 = arith.truncf %53 : vector<16x8xf32> to vector<16x8xbf16>
    %c0_15 = arith.constant 0 : index
    %c8 = arith.constant 8 : index
    %55 = vector.load %arg15[%c0_15, %c8] : memref<16x32xbf16, #tpu.memory_space<vmem>>, vector<16x8xbf16>
    tpu.vector_store %arg15[%c0_15, %c8], %54 {strides = array<i32>} : memref<16x32xbf16, #tpu.memory_space<vmem>>, vector<16x8xbf16>,
    %56 = vector.extract_strided_slice %7 {offsets = [0, 0, 16], sizes = [8, 2, 8], strides = [1, 1, 1]} : vector<8x2x32xf32> to vector<8x2x8xf32>
    %57 = arith.truncf %56 : vector<8x2x8xf32> to vector<8x2x8xbf16>
    %58 = vector.extract_strided_slice %9 {offsets = [0, 0, 16], sizes = [8, 2, 8], strides = [1, 1, 1]} : vector<8x2x32xf32> to vector<8x2x8xf32>
    %59 = arith.truncf %58 : vector<8x2x8xf32> to vector<8x2x8xbf16>
    %60 = vector.extract_strided_slice %11 {offsets = [0, 0, 16], sizes = [8, 2, 8], strides = [1, 1, 1]} : vector<8x2x32xf32> to vector<8x2x8xf32>
    %61 = arith.truncf %60 : vector<8x2x8xf32> to vector<8x2x8xbf16>
    "tpu.trace_start"() <{level = 10 : i32, message = "nld,nmd->nlm"}> : () -> ()
    %cst_16 = arith.constant dense<0.000000e+00> : vector<8x2x2xf32>
    %62 = tpu.matmul %57, %59, %cst_16 {dimension_numbers = #tpu.dot_dimension_numbers<[2], [2], [1], [1], [0, 0, 0, 1, 1, 1], [0], [0]>} : vector<8x2x8xbf16>, vector<8x2x8xbf16>, vector<8x2x2xf32> -> vector<8x2x2xf32>
    "tpu.trace_stop"() : () -> ()
    %cst_17 = arith.constant dense<0xFF800000> : vector<8x2xf32>
    %63 = vector.multi_reduction <maximumf>, %62, %cst_17 [2] : vector<8x2x2xf32> to vector<8x2xf32>
    %64 = vector.shape_cast %63 : vector<8x2xf32> to vector<8x2x1xf32>
    %65 = vector.broadcast %64 : vector<8x2x1xf32> to vector<8x2x2xf32>
    %66 = arith.subf %62, %65 : vector<8x2x2xf32>
    %67 = math.exp %66 : vector<8x2x2xf32>
    %cst_18 = arith.constant dense<0.000000e+00> : vector<8x2xf32>
    %68 = vector.multi_reduction <add>, %67, %cst_18 [2] : vector<8x2x2xf32> to vector<8x2xf32>
    %69 = vector.shape_cast %68 : vector<8x2xf32> to vector<8x2x1xf32>
    %70 = tpu.reciprocal %69 {approx = true} : vector<8x2x1xf32> -> vector<8x2x1xf32>
    %71 = vector.broadcast %70 : vector<8x2x1xf32> to vector<8x2x2xf32>
    %72 = arith.mulf %67, %71 : vector<8x2x2xf32>
    %73 = arith.truncf %72 : vector<8x2x2xf32> to vector<8x2x2xbf16>
    "tpu.trace_start"() <{level = 10 : i32, message = "nlm,nmd->nld"}> : () -> ()
    %cst_19 = arith.constant dense<0.000000e+00> : vector<8x2x8xf32>
    %74 = tpu.matmul %73, %61, %cst_19 {dimension_numbers = #tpu.dot_dimension_numbers<[2], [1], [1], [2], [0, 0, 0, 1, 1, 2], [0], [0]>} : vector<8x2x2xbf16>, vector<8x2x8xbf16>, vector<8x2x8xf32> -> vector<8x2x8xf32>
    "tpu.trace_stop"() : () -> ()
    %75 = vector.shape_cast %74 : vector<8x2x8xf32> to vector<16x8xf32>
    %76 = arith.truncf %75 : vector<16x8xf32> to vector<16x8xbf16>
    %c0_20 = arith.constant 0 : index
    %c16 = arith.constant 16 : index
    %77 = vector.load %arg15[%c0_20, %c16] : memref<16x32xbf16, #tpu.memory_space<vmem>>, vector<16x8xbf16>
    tpu.vector_store %arg15[%c0_20, %c16], %76 {strides = array<i32>} : memref<16x32xbf16, #tpu.memory_space<vmem>>, vector<16x8xbf16>,
    %78 = vector.extract_strided_slice %7 {offsets = [0, 0, 24], sizes = [8, 2, 8], strides = [1, 1, 1]} : vector<8x2x32xf32> to vector<8x2x8xf32>
    %79 = arith.truncf %78 : vector<8x2x8xf32> to vector<8x2x8xbf16>
    %80 = vector.extract_strided_slice %9 {offsets = [0, 0, 24], sizes = [8, 2, 8], strides = [1, 1, 1]} : vector<8x2x32xf32> to vector<8x2x8xf32>
    %81 = arith.truncf %80 : vector<8x2x8xf32> to vector<8x2x8xbf16>
    %82 = vector.extract_strided_slice %11 {offsets = [0, 0, 24], sizes = [8, 2, 8], strides = [1, 1, 1]} : vector<8x2x32xf32> to vector<8x2x8xf32>
    %83 = arith.truncf %82 : vector<8x2x8xf32> to vector<8x2x8xbf16>
    "tpu.trace_start"() <{level = 10 : i32, message = "nld,nmd->nlm"}> : () -> ()
    %cst_21 = arith.constant dense<0.000000e+00> : vector<8x2x2xf32>
    %84 = tpu.matmul %79, %81, %cst_21 {dimension_numbers = #tpu.dot_dimension_numbers<[2], [2], [1], [1], [0, 0, 0, 1, 1, 1], [0], [0]>} : vector<8x2x8xbf16>, vector<8x2x8xbf16>, vector<8x2x2xf32> -> vector<8x2x2xf32>
    "tpu.trace_stop"() : () -> ()
    %cst_22 = arith.constant dense<0xFF800000> : vector<8x2xf32>
    %85 = vector.multi_reduction <maximumf>, %84, %cst_22 [2] : vector<8x2x2xf32> to vector<8x2xf32>
    %86 = vector.shape_cast %85 : vector<8x2xf32> to vector<8x2x1xf32>
    %87 = vector.broadcast %86 : vector<8x2x1xf32> to vector<8x2x2xf32>
    %88 = arith.subf %84, %87 : vector<8x2x2xf32>
    %89 = math.exp %88 : vector<8x2x2xf32>
    %cst_23 = arith.constant dense<0.000000e+00> : vector<8x2xf32>
    %90 = vector.multi_reduction <add>, %89, %cst_23 [2] : vector<8x2x2xf32> to vector<8x2xf32>
    %91 = vector.shape_cast %90 : vector<8x2xf32> to vector<8x2x1xf32>
    %92 = tpu.reciprocal %91 {approx = true} : vector<8x2x1xf32> -> vector<8x2x1xf32>
    %93 = vector.broadcast %92 : vector<8x2x1xf32> to vector<8x2x2xf32>
    %94 = arith.mulf %89, %93 : vector<8x2x2xf32>
    %95 = arith.truncf %94 : vector<8x2x2xf32> to vector<8x2x2xbf16>
    "tpu.trace_start"() <{level = 10 : i32, message = "nlm,nmd->nld"}> : () -> ()
    %cst_24 = arith.constant dense<0.000000e+00> : vector<8x2x8xf32>
    %96 = tpu.matmul %95, %83, %cst_24 {dimension_numbers = #tpu.dot_dimension_numbers<[2], [1], [1], [2], [0, 0, 0, 1, 1, 2], [0], [0]>} : vector<8x2x2xbf16>, vector<8x2x8xbf16>, vector<8x2x8xf32> -> vector<8x2x8xf32>
    "tpu.trace_stop"() : () -> ()
    %97 = vector.shape_cast %96 : vector<8x2x8xf32> to vector<16x8xf32>
    %98 = arith.truncf %97 : vector<16x8xf32> to vector<16x8xbf16>
    %c0_25 = arith.constant 0 : index
    %c24 = arith.constant 24 : index
    %99 = vector.load %arg15[%c0_25, %c24] : memref<16x32xbf16, #tpu.memory_space<vmem>>, vector<16x8xbf16>
    tpu.vector_store %arg15[%c0_25, %c24], %98 {strides = array<i32>} : memref<16x32xbf16, #tpu.memory_space<vmem>>, vector<16x8xbf16>,
    %c0_26 = arith.constant 0 : index
    %c0_27 = arith.constant 0 : index
    %100 = vector.load %arg15[%c0_26, %c0_27] : memref<16x32xbf16, #tpu.memory_space<vmem>>, vector<16x32xbf16>
    %c0_28 = arith.constant 0 : index
    %c0_29 = arith.constant 0 : index
    %101 = vector.load %arg4[%c0_28, %c0_29] : memref<32x32xbf16, #tpu.memory_space<vmem>>, vector<32x32xbf16>
    %cst_30 = arith.constant dense<0.000000e+00> : vector<16x32xf32>
    %102 = tpu.matmul %100, %101, %cst_30 {dimension_numbers = #tpu.dot_dimension_numbers<[1], [0], [0], [1], [0, 0, 1, 1], [], []>} : vector<16x32xbf16>, vector<32x32xbf16>, vector<16x32xf32> -> vector<16x32xf32>
    %c0_31 = arith.constant 0 : index
    %c0_32 = arith.constant 0 : index
    %103 = vector.load %arg5[%c0_31, %c0_32] : memref<1x32xf32, #tpu.memory_space<vmem>>, vector<1x32xf32>
    %104 = vector.broadcast %103 : vector<1x32xf32> to vector<16x32xf32>
    %105 = arith.addf %102, %104 : vector<16x32xf32>
    %106 = arith.extf %0 : vector<16x32xbf16> to vector<16x32xf32>
    %107 = arith.addf %106, %105 : vector<16x32xf32>
    %c0_33 = arith.constant 0 : index
    %c0_34 = arith.constant 0 : index
    %108 = vector.load %arg6[%c0_33, %c0_34] : memref<1x32xf32, #tpu.memory_space<vmem>>, vector<1x32xf32>
    %c0_35 = arith.constant 0 : index
    %c0_36 = arith.constant 0 : index
    %109 = vector.load %arg7[%c0_35, %c0_36] : memref<1x32xf32, #tpu.memory_space<vmem>>, vector<1x32xf32>
    %cst_37 = arith.constant dense<0.000000e+00> : vector<16xf32>
    %110 = vector.multi_reduction <add>, %107, %cst_37 [1] : vector<16x32xf32> to vector<16xf32>
    %111 = vector.shape_cast %110 : vector<16xf32> to vector<16x1xf32>
    %cst_38 = arith.constant 3.200000e+01 : f32
    %112 = vector.broadcast %cst_38 : f32 to vector<16x1xf32>
    %113 = arith.divf %111, %112 : vector<16x1xf32>
    %114 = vector.broadcast %113 : vector<16x1xf32> to vector<16x32xf32>
    %115 = arith.subf %107, %114 : vector<16x32xf32>
    %116 = arith.mulf %115, %115 : vector<16x32xf32>
    %cst_39 = arith.constant dense<0.000000e+00> : vector<16xf32>
    %117 = vector.multi_reduction <add>, %116, %cst_39 [1] : vector<16x32xf32> to vector<16xf32>
    %118 = vector.shape_cast %117 : vector<16xf32> to vector<16x1xf32>
    %cst_40 = arith.constant 3.200000e+01 : f32
    %119 = vector.broadcast %cst_40 : f32 to vector<16x1xf32>
    %120 = arith.divf %118, %119 : vector<16x1xf32>
    %121 = vector.broadcast %113 : vector<16x1xf32> to vector<16x32xf32>
    %122 = arith.subf %107, %121 : vector<16x32xf32>
    %cst_41 = arith.constant 9.99999974E-6 : f32
    %123 = vector.broadcast %cst_41 : f32 to vector<16x1xf32>
    %124 = arith.addf %120, %123 : vector<16x1xf32>
    %125 = math.rsqrt %124 : vector<16x1xf32>
    %126 = vector.broadcast %125 : vector<16x1xf32> to vector<16x32xf32>
    %127 = arith.mulf %122, %126 : vector<16x32xf32>
    %128 = vector.broadcast %108 : vector<1x32xf32> to vector<16x32xf32>
    %129 = arith.mulf %127, %128 : vector<16x32xf32>
    %130 = vector.broadcast %109 : vector<1x32xf32> to vector<16x32xf32>
    %131 = arith.addf %129, %130 : vector<16x32xf32>
    %c0_42 = arith.constant 0 : index
    %c0_43 = arith.constant 0 : index
    %132 = vector.load %arg8[%c0_42, %c0_43] : memref<32x64xbf16, #tpu.memory_space<vmem>>, vector<32x64xbf16>
    %133 = arith.truncf %131 : vector<16x32xf32> to vector<16x32xbf16>
    %cst_44 = arith.constant dense<0.000000e+00> : vector<16x64xf32>
    %134 = tpu.matmul %133, %132, %cst_44 {dimension_numbers = #tpu.dot_dimension_numbers<[1], [0], [0], [1], [0, 0, 1, 1], [], []>} : vector<16x32xbf16>, vector<32x64xbf16>, vector<16x64xf32> -> vector<16x64xf32>
    %c0_45 = arith.constant 0 : index
    %c0_46 = arith.constant 0 : index
    %135 = vector.load %arg9[%c0_45, %c0_46] : memref<1x64xf32, #tpu.memory_space<vmem>>, vector<1x64xf32>
    %136 = vector.broadcast %135 : vector<1x64xf32> to vector<16x64xf32>
    %137 = arith.addf %134, %136 : vector<16x64xf32>
    %cst_47 = arith.constant 0.000000e+00 : f32
    %138 = vector.broadcast %cst_47 : f32 to vector<16x64xf32>
    %139 = arith.maximumf %137, %138 : vector<16x64xf32>
    %c0_48 = arith.constant 0 : index
    %c0_49 = arith.constant 0 : index
    %140 = vector.load %arg10[%c0_48, %c0_49] : memref<64x32xbf16, #tpu.memory_space<vmem>>, vector<64x32xbf16>
    %141 = arith.truncf %139 : vector<16x64xf32> to vector<16x64xbf16>
    %cst_50 = arith.constant dense<0.000000e+00> : vector<16x32xf32>
    %142 = tpu.matmul %141, %140, %cst_50 {dimension_numbers = #tpu.dot_dimension_numbers<[1], [0], [0], [1], [0, 0, 1, 1], [], []>} : vector<16x64xbf16>, vector<64x32xbf16>, vector<16x32xf32> -> vector<16x32xf32>
    %c0_51 = arith.constant 0 : index
    %c0_52 = arith.constant 0 : index
    %143 = vector.load %arg11[%c0_51, %c0_52] : memref<1x32xf32, #tpu.memory_space<vmem>>, vector<1x32xf32>
    %144 = vector.broadcast %143 : vector<1x32xf32> to vector<16x32xf32>
    %145 = arith.addf %142, %144 : vector<16x32xf32>
    %146 = arith.addf %131, %145 : vector<16x32xf32>
    %c0_53 = arith.constant 0 : index
    %c0_54 = arith.constant 0 : index
    %147 = vector.load %arg12[%c0_53, %c0_54] : memref<1x32xf32, #tpu.memory_space<vmem>>, vector<1x32xf32>
    %c0_55 = arith.constant 0 : index
    %c0_56 = arith.constant 0 : index
    %148 = vector.load %arg13[%c0_55, %c0_56] : memref<1x32xf32, #tpu.memory_space<vmem>>, vector<1x32xf32>
    %cst_57 = arith.constant dense<0.000000e+00> : vector<16xf32>
    %149 = vector.multi_reduction <add>, %146, %cst_57 [1] : vector<16x32xf32> to vector<16xf32>
    %150 = vector.shape_cast %149 : vector<16xf32> to vector<16x1xf32>
    %cst_58 = arith.constant 3.200000e+01 : f32
    %151 = vector.broadcast %cst_58 : f32 to vector<16x1xf32>
    %152 = arith.divf %150, %151 : vector<16x1xf32>
    %153 = vector.broadcast %152 : vector<16x1xf32> to vector<16x32xf32>
    %154 = arith.subf %146, %153 : vector<16x32xf32>
    %155 = arith.mulf %154, %154 : vector<16x32xf32>
    %cst_59 = arith.constant dense<0.000000e+00> : vector<16xf32>
    %156 = vector.multi_reduction <add>, %155, %cst_59 [1] : vector<16x32xf32> to vector<16xf32>
    %157 = vector.shape_cast %156 : vector<16xf32> to vector<16x1xf32>
    %cst_60 = arith.constant 3.200000e+01 : f32
    %158 = vector.broadcast %cst_60 : f32 to vector<16x1xf32>
    %159 = arith.divf %157, %158 : vector<16x1xf32>
    %160 = vector.broadcast %152 : vector<16x1xf32> to vector<16x32xf32>
    %161 = arith.subf %146, %160 : vector<16x32xf32>
    %cst_61 = arith.constant 9.99999974E-6 : f32
    %162 = vector.broadcast %cst_61 : f32 to vector<16x1xf32>
    %163 = arith.addf %159, %162 : vector<16x1xf32>
    %164 = math.rsqrt %163 : vector<16x1xf32>
    %165 = vector.broadcast %164 : vector<16x1xf32> to vector<16x32xf32>
    %166 = arith.mulf %161, %165 : vector<16x32xf32>
    %167 = vector.broadcast %147 : vector<1x32xf32> to vector<16x32xf32>
    %168 = arith.mulf %166, %167 : vector<16x32xf32>
    %169 = vector.broadcast %148 : vector<1x32xf32> to vector<16x32xf32>
    %170 = arith.addf %168, %169 : vector<16x32xf32>
    %171 = arith.truncf %170 : vector<16x32xf32> to vector<16x32xbf16>
    %c0_62 = arith.constant 0 : index
    %c0_63 = arith.constant 0 : index
    %172 = vector.load %arg14[%c0_62, %c0_63] : memref<16x32xbf16, #tpu.memory_space<vmem>>, vector<16x32xbf16>
    tpu.vector_store %arg14[%c0_62, %c0_63], %171 {strides = array<i32>} : memref<16x32xbf16, #tpu.memory_space<vmem>>, vector<16x32xbf16>,
    return
  }
  func.func @transform_0(%arg0: i32) -> (i32, i32) {
    %c0_i32 = arith.constant 0 : i32
    %c0_i32_0 = arith.constant 0 : i32
    return %arg0, %c0_i32 : i32, i32
  }
  func.func @transform_1(%arg0: i32) -> (i32, i32) {
    %c0_i32 = arith.constant 0 : i32
    %c0_i32_0 = arith.constant 0 : i32
    %c0_i32_1 = arith.constant 0 : i32
    return %c0_i32, %c0_i32_0 : i32, i32
  }
  func.func @transform_2(%arg0: i32) -> (i32, i32) {
    %c0_i32 = arith.constant 0 : i32
    %c0_i32_0 = arith.constant 0 : i32
    %c0_i32_1 = arith.constant 0 : i32
    return %c0_i32, %c0_i32_0 : i32, i32
  }
  func.func @transform_3(%arg0: i32) -> (i32, i32) {
    %c0_i32 = arith.constant 0 : i32
    %c0_i32_0 = arith.constant 0 : i32
    %c0_i32_1 = arith.constant 0 : i32
    return %c0_i32, %c0_i32_0 : i32, i32
  }
  func.func @transform_4(%arg0: i32) -> (i32, i32) {
    %c0_i32 = arith.constant 0 : i32
    %c0_i32_0 = arith.constant 0 : i32
    %c0_i32_1 = arith.constant 0 : i32
    return %c0_i32, %c0_i32_0 : i32, i32
  }
  func.func @transform_5(%arg0: i32) -> (i32, i32) {
    %c0_i32 = arith.constant 0 : i32
    %c0_i32_0 = arith.constant 0 : i32
    %c0_i32_1 = arith.constant 0 : i32
    return %c0_i32, %c0_i32_0 : i32, i32
  }
  func.func @transform_6(%arg0: i32) -> (i32, i32) {
    %c0_i32 = arith.constant 0 : i32
    %c0_i32_0 = arith.constant 0 : i32
    %c0_i32_1 = arith.constant 0 : i32
    return %c0_i32, %c0_i32_0 : i32, i32
  }
  func.func @transform_7(%arg0: i32) -> (i32, i32) {
    %c0_i32 = arith.constant 0 : i32
    %c0_i32_0 = arith.constant 0 : i32
    %c0_i32_1 = arith.constant 0 : i32
    return %c0_i32, %c0_i32_0 : i32, i32
  }
  func.func @transform_8(%arg0: i32) -> (i32, i32) {
    %c0_i32 = arith.constant 0 : i32
    %c0_i32_0 = arith.constant 0 : i32
    %c0_i32_1 = arith.constant 0 : i32
    return %c0_i32, %c0_i32_0 : i32, i32
  }
  func.func @transform_9(%arg0: i32) -> (i32, i32) {
    %c0_i32 = arith.constant 0 : i32
    %c0_i32_0 = arith.constant 0 : i32
    %c0_i32_1 = arith.constant 0 : i32
    return %c0_i32, %c0_i32_0 : i32, i32
  }
  func.func @transform_10(%arg0: i32) -> (i32, i32) {
    %c0_i32 = arith.constant 0 : i32
    %c0_i32_0 = arith.constant 0 : i32
    %c0_i32_1 = arith.constant 0 : i32
    return %c0_i32, %c0_i32_0 : i32, i32
  }
  func.func @transform_11(%arg0: i32) -> (i32, i32) {
    %c0_i32 = arith.constant 0 : i32
    %c0_i32_0 = arith.constant 0 : i32
    %c0_i32_1 = arith.constant 0 : i32
    return %c0_i32, %c0_i32_0 : i32, i32
  }
  func.func @transform_12(%arg0: i32) -> (i32, i32) {
    %c0_i32 = arith.constant 0 : i32
    %c0_i32_0 = arith.constant 0 : i32
    %c0_i32_1 = arith.constant 0 : i32
    return %c0_i32, %c0_i32_0 : i32, i32
  }
  func.func @transform_13(%arg0: i32) -> (i32, i32) {
    %c0_i32 = arith.constant 0 : i32
    %c0_i32_0 = arith.constant 0 : i32
    return %arg0, %c0_i32 : i32, i32
  }
}

</mosaic_0001>

<bundles_post_ra>
// kernel: vit_forward.4
= control target key start
LH: loop header
LB: loop body
LE: loop exit
PB: predicated region body
PF: predicated region fallthrough
CT: control target
= control target key end

     0   :  { %s1136_s0 = inlined_call_operand.hbm [shape: f32[32,16], index: 0, kind: input, shape index: {}]   ;;  %s1137_s1 = inlined_call_operand.hbm [shape: bf16[16,32], index: 1, kind: input, shape index: {}]   ;;  %s1138_s2 = inlined_call_operand.hbm [shape: f32[1,32], index: 2, kind: input, shape index: {}]   ;;  %s1139_s3 = inlined_call_operand.hbm [shape: f32[32,32], index: 3, kind: input, shape index: {}]   ;;  %s1140_s4 = inlined_call_operand.hbm [shape: bf16[32,32], index: 4, kind: output, shape index: {}]  }
   0x1   :  { %1144 = sst [smem:[#allocation15_spill]] %s1136_s0 }
   0x2   :  { %9 = vsyncpa [#allocation3], 0 }
   0x3   :  { %11 = vsyncpa [#allocation3 + $0x1], 0 }
   0x4   :  { %12 = vsyncpa [#allocation6], 0 }
   0x5   :  { %13 = vsyncpa [#allocation9], 0 }
   0x6   :  { %15 = vsyncpa [#allocation9 + $0x1], 0 }
   0x7   :  { %16 = vsyncpa [#allocation4], 0 }
   0x8   :  { %18 = vsyncpa [#allocation4 + $0x1], 0  ;;  %s845_s15 = smov 0   ;;  %s847_s16 = smov 0  }
   0x9   :  { %s849_s17 = smov 0   ;;  %s851_s18 = smov 0  }
   0xa LB: > { %s866_s19 = sadd.s32 4294967295, %s805_s18   ;;  %s494_s20 = sadd.s32 4294967294, %s805_s18   ;;  %s805_s18 = sphi %s851_s18, %s1162_s18   ;;  %s801_s17 = sphi %s849_s17, %s1161_s17   ;;  %s797_s16 = sphi %s847_s16, %s1160_s16   ;;  %s793_s15 = sphi %s845_s15, %s1159_s15  }
   0xb   : > { %p44_p0 = scmp.ne.s32.totalorder %s797_s16, %s793_s15  ;;  %p1141_p1 = scmp.eq.s32.totalorder %s866_s19, 0 }
   0xc   : > { %p142_p3 = scmp.eq.s32.totalorder %s494_s20, 1  ;;  %p495_p5 = scmp.ge.s32.totalorder %s805_s18, 1 }
   0xd   : > { %p875_p4 = por %p1141_p1, %p44_p0  ;;  %p149_p7 = scmp.lt.s32.totalorder %s805_s18, 3 }
   0xe   : > { %p880_p6 = por %p142_p3, %p44_p0  ;;  %s807_s24 = smov [#allocation5]  }
   0xf   : > { %s1145_s21 = scalar_select %p875_p4, 1, 0 }
  0x10   : > { %s1146_s22 = scalar_select %p880_p6, 1, 0 }
  0x11   : > { %p885_p8 = pnand %p495_p5, %p149_p7  ;;  %s161_s25 = sshll.u32 %s807_s24, 4  ;;  %s889_s25 = int_to_ptr.vmem [resolvable:$true] %s161_s25 }
  0x12   : > { %s808_s27 = smov [#allocation7]   ;;  %s615_s5 = scalar_lea.hbm %s1137_s1, 128 }
  0x13   : > { %p548_p9 = pneg %p885_p8  ;;  %s175_s28 = sshll.u32 %s808_s27, 4  ;;  %s900_s28 = int_to_ptr.vmem [resolvable:$true] %s175_s28 }
  0x14   : > { %p616_p12 = scmp.ne.s32.totalorder %s1137_s1, %s615_s5  ;;  %p622_p5 = scmp.lt.u32.totalorder %s615_s5, %s1137_s1 }
  0x15   : > { %p896_p11 = pnand %p548_p9, %p1141_p1 }
  0x17   : > { %p617_p13 = pneg %p896_p11 }
  0x19   : > { %p618_p0 = pnand %p617_p13, %p616_p12 }
  0x1b   : > { %p619_p3 = pneg %p618_p0 }
  0x1d   : > { %p624_p7 = pnand %p622_p5, %p619_p3 }
  0x1f   : > { %627 = shalt.err (!%p624_p7)
}
  0x20   : > { %s628_s10 = scalar_lea.vmem %s889_s25, 128  ;;  %p636_p2 = scmp.lt.s32.totalorder %s889_s25, %s889_s25 }
  0x21   : > { %p629_p9 = scmp.ne.s32.totalorder %s889_s25, %s628_s10  ;;  %p637_p12 = scmp.lt.s32.totalorder %s628_s10, %s628_s10 }
  0x23   : > { %p631_p10 = pnand %p629_p9, %p617_p13  ;;  %p638_p0 = por %p637_p12, %p636_p2 }
  0x25   : > { %p632_p1 = pneg %p631_p10 }
  0x27   : > { %p639_p6 = pnand %p638_p0, %p632_p1 }
  0x29   : > { %642 = shalt.err (!%p639_p6)
}
  0x2a   : > { %s809_s11 = smov 64   ;;  %s810_s12 = smov 4  }
  0x2b   : > { %551 = dma.hbm_to_vmem [thread:$0]  (!%p896_p11), %s1137_s1, 128, %s889_s25, [#allocation6], %s809_s11, %s809_s11, %s810_s12  }
  0x2c   : > { %s643_s27 = scalar_lea.hbm %s1138_s2, 16 }
  0x2d   : > { %p644_p2 = scmp.ne.s32.totalorder %s1138_s2, %s643_s27  ;;  %p650_p10 = scmp.lt.u32.totalorder %s643_s27, %s1138_s2 }
  0x2f   : > { %p646_p1 = pnand %p644_p2, %p617_p13 }
  0x31   : > { %p647_p6 = pneg %p646_p1 }
  0x33   : > { %p652_p3 = pnand %p650_p10, %p647_p6 }
  0x35   : > { %655 = shalt.err (!%p652_p3)
}
  0x36   : > { %s656_s25 = scalar_lea.vmem %s900_s28, 16  ;;  %s663_s7 = scalar_lea.vmem %s900_s28, 32 }
  0x37   : > { %p657_p5 = scmp.ne.s32.totalorder %s900_s28, %s656_s25  ;;  %p664_p12 = scmp.lt.s32.totalorder %s900_s28, %s900_s28 }
  0x38   : > { %p665_p0 = scmp.lt.s32.totalorder %s663_s7, %s656_s25 }
  0x39   : > { %p659_p7 = pnand %p657_p5, %p617_p13 }
  0x3a   : > { %p666_p2 = por %p665_p0, %p664_p12 }
  0x3b   : > { %p660_p9 = pneg %p659_p7 }
  0x3d   : > { %p667_p1 = pnand %p666_p2, %p660_p9 }
  0x3f   : > { %670 = shalt.err (!%p667_p1)
}
  0x40   : > { %554 = dma.hbm_to_vmem [thread:$0]  (!%p896_p11), %s1138_s2, 16, %s900_s28, [#allocation6]  }
  0x41   : > { %s956_s10 = sadd.s32 1, %s805_s18   ;;  %s31_s26 = sadd.s32 1, %s801_s17 }
  0x42   : > { %s28_s11 = ssub.s32 %s805_s18, %s956_s10  ;;  %p38_p13 = scmp.ne.s32.totalorder %s801_s17, %s797_s16 }
  0x43   : > { %p29_p6 = scmp.eq.s32.totalorder %s28_s11, 0  ;;  %p39_p10 = scmp.eq.s32.totalorder %s805_s18, 0 }
  0x44   : > { %p1149_p3 = scmp.eq.s32.totalorder %s866_s19, 1  ;;  %p568_p7 = scmp.lt.s32.totalorder %s805_s18, 2 }
  0x45   : > { %s972_s13 = scalar_select %p29_p6, %s801_s17, %s31_s26  }
  0x46   : > { %p966_p5 = por %p1149_p3, %p38_p13  ;;  %p40_p9 = por %p39_p10, %p38_p13 }
  0x47   : > { %s975_s14 = sand.u32 1, %s801_s17   ;;  %s521_s20 = sshll.u32 %s805_s18, 8 }
  0x48   : > { %s1150_s12 = scalar_select %p966_p5, 1, 0 }
  0x49   : > { %s499_s28 = sshll.u32 %s975_s14, 4  ;;  %s1151_s0 = sld [smem:[#allocation15_spill]] }
  0x4a   : > { %s190_s30 = scalar_lea.vmem [#allocation2], %s499_s28  ;;  %p990_p11 = pnand %p568_p7, %p40_p9 }
  0x4b   : > { %s197_s5 = sshll.u32 %s190_s30, 4  ;;  %s187_s25 = scalar_lea.sflag [#allocation3], %s975_s14  ;;  %s988_s5 = int_to_ptr.vmem [resolvable:$true] %s197_s5 }
  0x4c   : > { %p673_p0 = pneg %p990_p11 }
  0x4f   : > { %s984_s29 = scalar_lea.hbm %s1151_s0, %s521_s20  ;;  %s676_s26 = scalar_lea.hbm %s1151_s0, 512 }
  0x50   : > { %s671_s7 = scalar_lea.hbm %s984_s29, 256  ;;  %p677_p13 = scmp.lt.u32.totalorder %s984_s29, %s1151_s0 }
  0x51   : > { %p672_p12 = scmp.ne.s32.totalorder %s984_s29, %s671_s7  ;;  %p678_p6 = scmp.lt.u32.totalorder %s676_s26, %s671_s7 }
  0x52   : > { %p680_p3 = scmp.lt.u32.totalorder %s671_s7, %s984_s29 }
  0x53   : > { %p674_p2 = pnand %p673_p0, %p672_p12  ;;  %p679_p10 = por %p678_p6, %p677_p13 }
  0x55   : > { %p675_p1 = pneg %p674_p2  ;;  %p681_p7 = por %p680_p3, %p679_p10 }
  0x57   : > { %p682_p9 = pnand %p681_p7, %p675_p1 }
  0x59   : > { %685 = shalt.err (!%p682_p9)
}
  0x5a   : > { %s686_s27 = scalar_lea.vmem %s988_s5, 256  ;;  %s811_s30 = smov [#allocation2]  }
  0x5b   : > { %p687_p12 = scmp.ne.s32.totalorder %s988_s5, %s686_s27  ;;  %s691_s8 = sshll.u32 %s811_s30, 4  ;;  %s692_s8 = int_to_ptr.vmem [resolvable:$false] %s691_s8 }
  0x5c   : > { %s693_s9 = scalar_lea.vmem %s692_s8, 512  ;;  %p694_p4 = scmp.lt.s32.totalorder %s988_s5, %s692_s8 }
  0x5d   : > { %p689_p2 = pnand %p687_p12, %p673_p0  ;;  %p695_p13 = scmp.lt.s32.totalorder %s693_s9, %s686_s27 }
  0x5f   : > { %p690_p5 = pneg %p689_p2  ;;  %p696_p6 = por %p695_p13, %p694_p4 }
  0x61   : > { %p697_p10 = pnand %p696_p6, %p690_p5 }
  0x63   : > { %700 = shalt.err (!%p697_p10)
}
  0x64   : > { %s812_s7 = smov 128   ;;  %s813_s26 = smov 8  }
  0x65   : > { %558 = dma.hbm_to_vmem [thread:$0]  (!%p990_p11), %s984_s29, 256, %s988_s5, %s187_s25, %s812_s7, %s812_s7, %s813_s26  }
  0x66   : > { %s1030_s27 = scalar_lea.hbm %s1139_s3, %s521_s20  ;;  %s211_s30 = scalar_lea.vmem [#allocation8], %s499_s28 }
  0x67   : > { %s218_s8 = sshll.u32 %s211_s30, 4  ;;  %s208_s9 = scalar_lea.sflag [#allocation9], %s975_s14  ;;  %s1034_s8 = int_to_ptr.vmem [resolvable:$true] %s218_s8 }
  0x68   : > { %s701_s0 = scalar_lea.hbm %s1030_s27, 256  ;;  %s706_s20 = scalar_lea.hbm %s1139_s3, 512 }
  0x69   : > { %p702_p4 = scmp.ne.s32.totalorder %s1030_s27, %s701_s0  ;;  %p707_p3 = scmp.lt.u32.totalorder %s1030_s27, %s1139_s3 }
  0x6a   : > { %p708_p7 = scmp.lt.u32.totalorder %s706_s20, %s701_s0  ;;  %p710_p12 = scmp.lt.u32.totalorder %s701_s0, %s1030_s27 }
  0x6b   : > { %p704_p5 = pnand %p702_p4, %p673_p0 }
  0x6c   : > { %p709_p9 = por %p708_p7, %p707_p3 }
  0x6d   : > { %p705_p1 = pneg %p704_p5 }
  0x6e   : > { %p711_p2 = por %p710_p12, %p709_p9 }
  0x70   : > { %p712_p13 = pnand %p711_p2, %p705_p1 }
  0x72   : > { %715 = shalt.err (!%p712_p13)
}
  0x73   : > { %s716_s28 = scalar_lea.vmem %s1034_s8, 256  ;;  %s814_s24 = smov [#allocation8]  }
  0x74   : > { %p717_p6 = scmp.ne.s32.totalorder %s1034_s8, %s716_s28  ;;  %s721_s30 = sshll.u32 %s814_s24, 4  ;;  %s722_s30 = int_to_ptr.vmem [resolvable:$false] %s721_s30 }
  0x75   : > { %s723_s29 = scalar_lea.vmem %s722_s30, 512  ;;  %p724_p5 = scmp.lt.s32.totalorder %s1034_s8, %s722_s30 }
  0x76   : > { %p719_p10 = pnand %p717_p6, %p673_p0  ;;  %p725_p3 = scmp.lt.s32.totalorder %s723_s29, %s716_s28 }
  0x78   : > { %p720_p4 = pneg %p719_p10  ;;  %p726_p7 = por %p725_p3, %p724_p5 }
  0x7a   : > { %p727_p9 = pnand %p726_p7, %p720_p4 }
  0x7c   : > { %730 = shalt.err (!%p727_p9)
}
  0x7d   : > { %561 = dma.hbm_to_vmem [thread:$0]  (!%p990_p11), %s1030_s27, 256, %s1034_s8, %s208_s9, %s812_s7, %s812_s7, %s813_s26  }
  0x7e   : > { %230 = sbr.rel (%p885_p8) target bundleno = 380 (0x17c), region = 36  ;;  %s1068_s0 = sand.u32 (!%p885_p8), 1, %s797_s16  }
  0x7f   : > { %s506_s5 = sshll.u32 (!%p885_p8), %s1068_s0, 4  ;;  %s233_s20 = scalar_lea.sflag (!%p885_p8), [#allocation3], %s1068_s0 }
  0x80   : > { %s236_s6 = scalar_lea.vmem (!%p885_p8), [#allocation2], %s506_s5  ;;  %p1153_p0 = scmp.ne.s32.totalorder (!%p885_p8), %s1145_s21, 0 }
  0x85   : > { %776 = dma.done.wait (%p1153_p0), %s233_s20, 256  }
  0x86   : > { %778 = vsyncadd (%p1153_p0), %s233_s20, 4294967040  ;;  %p1154_p1 = scmp.eq.s32.totalorder %s866_s19, 0 }
  0x88   : > { %780 = dma.done.wait (%p1154_p1), [#allocation6], 144   ;;  %p1155_p11 = pmov %p1154_p1 }
  0x89   : > { %s250_s23 = scalar_lea.sflag [#allocation9], %s1068_s0  ;;  %s253_s14 = scalar_lea.vmem [#allocation8], %s506_s5 }
  0x8a   : > { %782 = vsyncadd (%p1155_p11), [#allocation6], 4294967152 }
  0x8b   : > { %784 = dma.done.wait (%p1153_p0), %s250_s23, 256  }
  0x8c   : > { %786 = vsyncadd (%p1153_p0), %s250_s23, 4294967040  ;;  %v815_v0 = vmov 0.0   ;;  %vm816_vm0 = vmmov 0   ;;  %v614_v1 = vld [vmem:[#allocation5] sm:$0xff]   ;;  %v288_v3 = vld [vmem:[%s236_s6 + $0x8] sm:$0xff]  ;;  %vm305_vm1 = vcmask 130048  }
  0x8d   : > { %528 = vmatprep.subr.bf16.mxu0 %v815_v0  ;;  %530 = vmatprep.mubr.msk.bf16.mxu0 %vm816_vm0, %v815_v0  ;;  %v287_v2 = vld [vmem:[%s236_s6] sm:$0xff]  ;;  %s510_s7 = sshll.u32 %s1068_s0, 3  ;;  %v511_v5 = vld [vmem:[#allocation7] ss:$0 sm:$0xff]  ;;  %v350_v7 = vld [vmem:[%s253_s14] sm:$0xff]  ;;  %s525_s21 = sshll.u32 %s866_s19, 7 }
  0x8e   : > { %529 = vmatpush3.bf16.msra.mxu0 %v614_v1  ;;  %v291_v4 = vpack.c.bf16 %v288_v3, %v287_v2  ;;  %v351_v11 = vld [vmem:[%s253_s14 + $0x8] sm:$0xff]  ;;  %s282_s26 = scalar_lea.vmem [#allocation10], %s510_s7  ;;  %vm362_vm2 = vcmask 257024   ;;  %s1090_s25 = scalar_lea.hbm %s1140_s4, %s525_s21 }
  0x8f   : > { %s379_s27 = sshll.u32 %s282_s26, 4  ;;  %s366_s11 = scalar_lea.sflag [#allocation4], %s1068_s0  ;;  %s1092_s27 = int_to_ptr.vmem [resolvable:$true] %s379_s27 }
  0x90   : > { %s731_s19 = scalar_lea.vmem %s1092_s27, 128  ;;  %p1156_p12 = scmp.ne.s32.totalorder %s1150_s12, 0 }
  0x91   : > { %531 = vmatmul.mubr.msk.bf16.vlgmr.msra.gmra.mrb[0].mxu0 %vm305_vm1, %v291_v4  ;;  %p732_p8 = scmp.ne.s32.totalorder %s1092_s27, %s731_s19  ;;  %s817_s28 = smov [#allocation10]  }
  0x92   : > { %s735_s24 = sshll.u32 %s817_s28, 4  ;;  %s736_s24 = int_to_ptr.vmem [resolvable:$false] %s735_s24 }
  0x93   : > { %p733_p2 = pnand %p732_p8, %p1156_p12  ;;  %s737_s30 = scalar_lea.vmem %s736_s24, 256 }
  0x94   : > { %p738_p6 = scmp.lt.s32.totalorder %s1092_s27, %s736_s24  ;;  %p739_p10 = scmp.lt.s32.totalorder %s737_s30, %s731_s19 }
  0x95   : > { %p734_p13 = pneg %p733_p2 }
  0x96   : > { %p740_p4 = por %p739_p10, %p738_p6 }
  0x98   : > { %p741_p5 = pnand %p740_p4, %p734_p13 }
 0x164   : > { %v343_v6 = vpop.f32.mrb[0].mxu0 }
 0x165   : > { %v344_v8 = vadd.f32 %v511_v5, %v343_v6  ;;  %v532_v9 = vpop.f32.mrb[1].mxu0 }
 0x166   : > { %v346_v10 = vpop.f32.mrb[2].mxu0 }
 0x167   : > { %v352_v12 = vadd.f32 %v350_v7, %v344_v8  ;;  %v347_v13 = vadd.f32 %v511_v5, %v346_v10  ;;  %v533_v14 = vpop.f32.mrb[3].mxu0 }
 0x169   : > { %v523_v15 = vpack.c.bf16 %v352_v12, %v352_v12  ;;  %v353_v16 = vadd.f32 %v351_v11, %v347_v13 }
 0x16b   : > { %363 = vst.msk [vmem:[%s282_s26] sm:$0xf] %vm362_vm2, %v523_v15  ;;  %v524_v17 = vpack.c.bf16 %v353_v16, %v353_v16 }
 0x16d   : > { %364 = vst.msk [vmem:[%s282_s26 + $0x4] sm:$0xf] %vm362_vm2, %v524_v17 }
 0x16e   : > { %744 = shalt.err (!%p741_p5)
}
 0x16f   : > { %s745_s29 = scalar_lea.hbm %s1090_s25, 128  ;;  %s749_s6 = scalar_lea.hbm %s1140_s4, 256 }
 0x170   : > { %p746_p3 = scmp.ne.s32.totalorder %s1090_s25, %s745_s29  ;;  %p750_p0 = scmp.lt.u32.totalorder %s1090_s25, %s1140_s4 }
 0x171   : > { %p751_p1 = scmp.lt.u32.totalorder %s749_s6, %s745_s29  ;;  %p753_p8 = scmp.lt.u32.totalorder %s745_s29, %s1090_s25 }
 0x172   : > { %p747_p7 = pnand %p746_p3, %p1156_p12 }
 0x173   : > { %p752_p11 = por %p751_p1, %p750_p0 }
 0x174   : > { %p748_p9 = pneg %p747_p7 }
 0x175   : > { %p754_p2 = por %p753_p8, %p752_p11 }
 0x177   : > { %p755_p13 = pnand %p754_p2, %p748_p9 }
 0x179   : > { %758 = shalt.err (!%p755_p13)
}
 0x17a   : > { %s818_s7 = smov 64   ;;  %s819_s21 = smov 4  }
 0x17b   : > { %546 = dma.vmem_to_hbm [thread:$0]  (%p1156_p12), %s1092_s27, 128, %s1090_s25, %s366_s11, %s818_s7, %s818_s7, %s819_s21  }
 0x17c PF: > { %s394_s26 = sand.u32 1, %s793_s15   ;;  %p1157_p6 = scmp.ne.s32.totalorder %s1146_s22, 0 }
 0x17d   : > { %p1158_p10 = scmp.ge.s32.totalorder %s805_s18, 2  ;;  %s395_s8 = scalar_lea.sflag [#allocation4], %s394_s26 }
 0x17f   : > { %p563_p4 = pnand %p1158_p10, %p1157_p6 }
 0x181   : > { %788 = dma.done.wait (!%p563_p4), %s395_s8, 128  }
 0x182   : > { %790 = vsyncadd (!%p563_p4), %s395_s8, 4294967168  ;;  %p21_p5 = scmp.ge.s32.totalorder %s956_s10, 4   ;;  %s1159_s15 = smov %s797_s16 }
 0x183   : > { %s1160_s16 = smov %s801_s17  ;;  %s1161_s17 = smov %s972_s13 }
 0x184   : > { %s1162_s18 = smov %s956_s10  ;;  %23 = sbr.rel (!%p21_p5) target bundleno = 10 (0xa), region = 102 }
 0x18b   :  { %400 = vsyncpa [#allocation3], 1 }
 0x18c   :  { %402 = vsyncpa [#allocation3 + $0x1], 1 }
 0x18d   :  { %403 = vsyncpa [#allocation6], 1 }
 0x18e   :  { %404 = vsyncpa [#allocation9], 1 }
 0x18f   :  { %406 = vsyncpa [#allocation9 + $0x1], 1 }
 0x190   :  { %407 = vsyncpa [#allocation4], 1 }
 0x191   :  { %409 = vsyncpa [#allocation4 + $0x1], 1 }

// kernel: vit_forward.7
= control target key start
LH: loop header
LB: loop body
LE: loop exit
PB: predicated region body
PF: predicated region fallthrough
CT: control target
= control target key end

     0   :  { %8 = vsyncpa [#allocation3], 0  ;;  %s900_s0 = inlined_call_operand.hbm [shape: bf16[32,32], index: 0, kind: input, shape index: {}]   ;;  %s901_s1 = inlined_call_operand.hbm [shape: f32[1,32], index: 1, kind: input, shape index: {}]   ;;  %s902_s2 = inlined_call_operand.hbm [shape: f32[1,32], index: 2, kind: input, shape index: {}]   ;;  %s903_s3 = inlined_call_operand.hbm [shape: f32[32,32], index: 3, kind: output, shape index: {}]  }
   0x1   :  { %10 = vsyncpa [#allocation3 + $0x1], 0 }
   0x2   :  { %11 = vsyncpa [#allocation6], 0 }
   0x3   :  { %12 = vsyncpa [#allocation4], 0 }
   0x4   :  { %14 = vsyncpa [#allocation4 + $0x1], 0  ;;  %s661_s12 = smov 0   ;;  %s663_s13 = smov 0  }
   0x5   :  { %s665_s14 = smov 0   ;;  %s667_s15 = smov 0  }
   0x6 LB: > { %s682_s16 = sadd.s32 4294967295, %s631_s15   ;;  %s374_s17 = sadd.s32 4294967294, %s631_s15   ;;  %s631_s15 = sphi %s667_s15, %s928_s15   ;;  %s627_s14 = sphi %s665_s14, %s927_s14   ;;  %s623_s13 = sphi %s663_s13, %s926_s13   ;;  %s619_s12 = sphi %s661_s12, %s925_s12  }
   0x7   : > { %s686_s18 = sadd.s32 1, %s631_s15   ;;  %s27_s19 = sadd.s32 1, %s627_s14 }
   0x8   : > { %s24_s20 = ssub.s32 %s631_s15, %s686_s18  ;;  %p34_p0 = scmp.ne.s32.totalorder %s627_s14, %s623_s13 }
   0x9   : > { %p25_p1 = scmp.eq.s32.totalorder %s24_s20, 0  ;;  %p35_p2 = scmp.eq.s32.totalorder %s631_s15, 0 }
   0xa   : > { %p40_p3 = scmp.ne.s32.totalorder %s623_s13, %s619_s12  ;;  %p904_p4 = scmp.eq.s32.totalorder %s682_s16, 0 }
   0xb   : > { %s698_s21 = scalar_select %p25_p1, %s627_s14, %s27_s19  }
   0xc   : > { %p700_p5 = por %p35_p2, %p34_p0  ;;  %p706_p6 = por %p904_p4, %p40_p3 }
   0xd   : > { %p106_p7 = scmp.eq.s32.totalorder %s682_s16, 1  ;;  %p112_p8 = scmp.eq.s32.totalorder %s374_s17, 1 }
   0xe   : > { %s910_s23 = scalar_select %p706_p6, 1, 0 }
   0xf   : > { %p375_p9 = scmp.ge.s32.totalorder %s631_s15, 1  ;;  %p119_p10 = scmp.lt.s32.totalorder %s631_s15, 3 }
  0x10   : > { %p713_p11 = por %p106_p7, %p34_p0  ;;  %p717_p12 = por %p112_p8, %p40_p3 }
  0x11   : > { %p721_p13 = pnand %p375_p9, %p119_p10  ;;  %s633_s27 = smov [#allocation5]  }
  0x12   : > { %s911_s24 = scalar_select %p713_p11, 1, 0 }
  0x13   : > { %s912_s25 = scalar_select %p717_p12, 1, 0 }
  0x14   : > { %s913_s26 = scalar_select %p721_p13, 1, 0 }
  0x15   : > { %p412_p2 = pneg %p721_p13  ;;  %s132_s28 = sshll.u32 %s633_s27, 4  ;;  %s133_s28 = int_to_ptr.vmem [resolvable:$true] %s132_s28 }
  0x16   : > { %p429_p4 = scmp.lt.s32.totalorder %s631_s15, 2  ;;  %p914_p0 = scmp.eq.s32.totalorder %s682_s16, 0 }
  0x17   : > { %s634_s4 = smov [#allocation7]   ;;  %s475_s8 = scalar_lea.hbm %s901_s1, 16 }
  0x18   : > { %p731_p7 = pnand %p412_p2, %p914_p0  ;;  %p737_p3 = pnand %p429_p4, %p700_p5 }
  0x19   : > { %s143_s5 = sshll.u32 %s634_s4, 4  ;;  %p476_p8 = scmp.ne.s32.totalorder %s901_s1, %s475_s8  ;;  %s741_s5 = int_to_ptr.vmem [resolvable:$true] %s143_s5 }
  0x1a   : > { %s916_s30 = scalar_select %p737_p3, 1, 0 }
  0x1b   : > { %p477_p9 = pneg %p731_p7  ;;  %p482_p10 = scmp.lt.u32.totalorder %s475_s8, %s901_s1 }
  0x1d   : > { %p478_p4 = pnand %p477_p9, %p476_p8 }
  0x1f   : > { %p479_p5 = pneg %p478_p4 }
  0x21   : > { %p484_p2 = pnand %p482_p10, %p479_p5 }
  0x23   : > { %487 = shalt.err (!%p484_p2)
}
  0x24   : > { %s488_s19 = scalar_lea.vmem %s133_s28, 16  ;;  %s495_s20 = scalar_lea.vmem %s133_s28, 32 }
  0x25   : > { %p489_p0 = scmp.ne.s32.totalorder %s133_s28, %s488_s19  ;;  %p496_p11 = scmp.lt.s32.totalorder %s133_s28, %s133_s28 }
  0x26   : > { %p497_p6 = scmp.lt.s32.totalorder %s495_s20, %s488_s19 }
  0x27   : > { %p491_p1 = pnand %p489_p0, %p477_p9 }
  0x28   : > { %p498_p13 = por %p497_p6, %p496_p11 }
  0x29   : > { %p492_p12 = pneg %p491_p1 }
  0x2b   : > { %p499_p3 = pnand %p498_p13, %p492_p12 }
  0x2d   : > { %502 = shalt.err (!%p499_p3)
}
  0x2e   : > { %415 = dma.hbm_to_vmem [thread:$0]  (!%p731_p7), %s901_s1, 16, %s133_s28, [#allocation6]  }
  0x2f   : > { %s154_s4 = sand.u32 1, %s627_s14   ;;  %s503_s8 = scalar_lea.hbm %s902_s2, 16 }
  0x30   : > { %p504_p1 = scmp.ne.s32.totalorder %s902_s2, %s503_s8  ;;  %p510_p12 = scmp.lt.u32.totalorder %s503_s8, %s902_s2 }
  0x32   : > { %p506_p6 = pnand %p504_p1, %p477_p9 }
  0x34   : > { %p507_p11 = pneg %p506_p6 }
  0x36   : > { %p512_p13 = pnand %p510_p12, %p507_p11 }
  0x38   : > { %515 = shalt.err (!%p512_p13)
}
  0x39   : > { %s516_s28 = scalar_lea.vmem %s741_s5, 16  ;;  %s523_s19 = scalar_lea.vmem %s741_s5, 32 }
  0x3a   : > { %p517_p3 = scmp.ne.s32.totalorder %s741_s5, %s516_s28  ;;  %p524_p5 = scmp.lt.s32.totalorder %s741_s5, %s741_s5 }
  0x3b   : > { %p525_p10 = scmp.lt.s32.totalorder %s523_s19, %s516_s28 }
  0x3c   : > { %p519_p8 = pnand %p517_p3, %p477_p9 }
  0x3d   : > { %p526_p2 = por %p525_p10, %p524_p5 }
  0x3e   : > { %p520_p4 = pneg %p519_p8 }
  0x40   : > { %p527_p0 = pnand %p526_p2, %p520_p4 }
  0x42   : > { %530 = shalt.err (!%p527_p0)
}
  0x43   : > { %418 = dma.hbm_to_vmem [thread:$0]  (!%p731_p7), %s902_s2, 16, %s741_s5, [#allocation6]  }
  0x44   : > { %s379_s27 = sshll.u32 %s154_s4, 3  ;;  %s394_s6 = sshll.u32 %s631_s15, 7 }
  0x45   : > { %s796_s9 = scalar_lea.hbm %s900_s0, %s394_s6  ;;  %s158_s29 = scalar_lea.vmem [#allocation2], %s379_s27 }
  0x46   : > { %s165_s10 = sshll.u32 %s158_s29, 4  ;;  %s800_s11 = scalar_lea.sflag [#allocation3], %s154_s4  ;;  %s798_s10 = int_to_ptr.vmem [resolvable:$true] %s165_s10 }
  0x47   : > { %s531_s17 = scalar_lea.hbm %s796_s9, 128  ;;  %p917_p7 = scmp.ne.s32.totalorder %s916_s30, 0 }
  0x48   : > { %p532_p9 = scmp.ne.s32.totalorder %s796_s9, %s531_s17  ;;  %s536_s19 = scalar_lea.hbm %s900_s0, 256 }
  0x49   : > { %p533_p1 = pneg %p917_p7  ;;  %p537_p12 = scmp.lt.u32.totalorder %s796_s9, %s900_s0 }
  0x4a   : > { %p538_p13 = scmp.lt.u32.totalorder %s536_s19, %s531_s17  ;;  %p540_p8 = scmp.lt.u32.totalorder %s531_s17, %s796_s9 }
  0x4b   : > { %p534_p6 = pnand %p533_p1, %p532_p9 }
  0x4c   : > { %p539_p3 = por %p538_p13, %p537_p12 }
  0x4d   : > { %p535_p11 = pneg %p534_p6 }
  0x4e   : > { %p541_p4 = por %p540_p8, %p539_p3 }
  0x50   : > { %p542_p5 = pnand %p541_p4, %p535_p11 }
  0x52   : > { %545 = shalt.err (!%p542_p5)
}
  0x53   : > { %s546_s4 = scalar_lea.vmem %s798_s10, 128  ;;  %s635_s27 = smov [#allocation2]  }
  0x54   : > { %p547_p10 = scmp.ne.s32.totalorder %s798_s10, %s546_s4  ;;  %s551_s6 = sshll.u32 %s635_s27, 4  ;;  %s552_s6 = int_to_ptr.vmem [resolvable:$false] %s551_s6 }
  0x55   : > { %s553_s7 = scalar_lea.vmem %s552_s6, 256  ;;  %p554_p9 = scmp.lt.s32.totalorder %s798_s10, %s552_s6 }
  0x56   : > { %p549_p2 = pnand %p547_p10, %p533_p1  ;;  %p555_p6 = scmp.lt.s32.totalorder %s553_s7, %s546_s4 }
  0x58   : > { %p550_p0 = pneg %p549_p2  ;;  %p556_p12 = por %p555_p6, %p554_p9 }
  0x5a   : > { %p557_p13 = pnand %p556_p12, %p550_p0 }
  0x5c   : > { %560 = shalt.err (!%p557_p13)
}
  0x5d   : > { %s636_s8 = smov 64   ;;  %s637_s29 = smov 4  }
  0x5e   : > { %422 = dma.hbm_to_vmem [thread:$0]  (!%p917_p7), %s796_s9, 128, %s798_s10, %s800_s11, %s636_s8, %s636_s8, %s637_s29  }
  0x5f   : > { %p918_p1 = scmp.ne.s32.totalorder %s913_s26, 0 }
  0x60   : > { %s831_s17 = sand.u32 (!%p918_p1), 1, %s623_s13   ;;  %p919_p11 = scmp.ne.s32.totalorder (!%p918_p1), %s910_s23, 0 }
  0x61   : > { %177 = sbr.rel (%p918_p1) target bundleno = 443 (0x1bb), region = 32  ;;  %s383_s5 = sshll.u32 (!%p918_p1), %s831_s17, 3 }
  0x62   : > { %s180_s28 = scalar_lea.sflag (!%p918_p1), [#allocation3], %s831_s17  ;;  %s183_s19 = scalar_lea.vmem (!%p918_p1), [#allocation2], %s383_s5 }
  0x68   : > { %606 = dma.done.wait (%p919_p11), %s180_s28, 128  }
  0x69   : > { %608 = vsyncadd (%p919_p11), %s180_s28, 4294967168  ;;  %p920_p3 = scmp.eq.s32.totalorder %s682_s16, 0 }
  0x6b   : > { %610 = dma.done.wait (%p920_p3), [#allocation6], 32   ;;  %p921_p7 = pmov %p920_p3 }
  0x6c   : > { %v397_v0 = vld [vmem:[%s183_s19] sm:$0xff]   ;;  %vm222_vm0 = vcmask 261120   ;;  %v387_v22 = vld [vmem:[#allocation5] ss:$0 sm:$0xff]  ;;  %s386_s23 = sshll.u32 %s831_s17, 4  ;;  %s395_s26 = sshll.u32 %s682_s16, 8 }
  0x6d   : > { %612 = vsyncadd (%p921_p7), [#allocation6], 4294967264  ;;  %v398_v1 = vunpack.c.l.bf16 %v397_v0  ;;  %v399_v2 = vunpack.c.h.bf16 %v397_v0  ;;  %v388_v24 = vld [vmem:[#allocation7] ss:$0 sm:$0xff]  ;;  %s213_s30 = scalar_lea.vmem [#allocation8], %s386_s23  ;;  %s853_s20 = scalar_lea.hbm %s903_s3, %s395_s26 }
  0x6e   : > { %s282_s9 = sshll.u32 %s213_s30, 4  ;;  %s269_s22 = scalar_lea.sflag [#allocation4], %s831_s17  ;;  %s855_s9 = int_to_ptr.vmem [resolvable:$true] %s282_s9 }
  0x6f   : > { %v223_v3 = vsel %vm222_vm0, %v398_v1, 0.0  ;;  %v226_v4 = vsel %vm222_vm0, %v399_v2, 0.0  ;;  %s561_s16 = scalar_lea.vmem %s855_s9, 256  ;;  %p922_p4 = scmp.ne.s32.totalorder %s911_s24, 0 }
  0x70   : > { %224 = vadd.xlane.f32.xlu0 %v223_v3  ;;  %p562_p8 = scmp.ne.s32.totalorder %s855_s9, %s561_s16  ;;  %s638_s4 = smov [#allocation8]  }
  0x71   : > { %s565_s27 = sshll.u32 %s638_s4, 4  ;;  %s566_s27 = int_to_ptr.vmem [resolvable:$false] %s565_s27 }
  0x72   : > { %p563_p5 = pnand %p562_p8, %p922_p4  ;;  %s567_s6 = scalar_lea.vmem %s566_s27, 512 }
  0x73   : > { %p568_p2 = scmp.lt.s32.totalorder %s855_s9, %s566_s27  ;;  %p569_p0 = scmp.lt.s32.totalorder %s567_s6, %s561_s16 }
  0x74   : > { %227 = vadd.xlane.f32.xlu0 %v226_v4  ;;  %p564_p10 = pneg %p563_p5 }
  0x75   : > { %p570_p9 = por %p569_p0, %p568_p2 }
  0x77   : > { %p571_p6 = pnand %p570_p9, %p564_p10 }
  0xfd   : > { %v225_v5 = vpop.xlane.xlu0 %224 }
  0xfe   : > { %v230_v6 = vmul.f32 0.03125, %v225_v5 }
 0x100   : > { %v232_v7 = vsub.f32 %v398_v1, %v230_v6 }
 0x101   : > { %v228_v8 = vpop.xlane.xlu0 %227 }
 0x102   : > { %v231_v9 = vmul.f32 0.03125, %v228_v8  ;;  %v234_v10 = vmul.f32 %v232_v7, %v232_v7 }
 0x104   : > { %v233_v11 = vsub.f32 %v399_v2, %v231_v9  ;;  %v236_v12 = vsel %vm222_vm0, %v234_v10, 0.0 }
 0x105   : > { %237 = vadd.xlane.f32.xlu1 %v236_v12 }
 0x106   : > { %v235_v13 = vmul.f32 %v233_v11, %v233_v11 }
 0x108   : > { %v239_v14 = vsel %vm222_vm0, %v235_v13, 0.0 }
 0x109   : > { %240 = vadd.xlane.f32.xlu1 %v239_v14 }
 0x192   : > { %v238_v15 = vpop.xlane.xlu1 %237 }
 0x193   : > { %v242_v16 = vmul.f32 0.03125, %v238_v15 }
 0x195   : > { %v244_v17 = vadd.f32 1e-05, %v242_v16 }
 0x196   : > { %v241_v18 = vpop.xlane.xlu1 %240 }
 0x197   : > { %471 = vrsqrt.f32 %v244_v17  ;;  %v243_v19 = vmul.f32 0.03125, %v241_v18 }
 0x199   : > { %v245_v20 = vadd.f32 1e-05, %v243_v19 }
 0x19b   : > { %473 = vrsqrt.f32 %v245_v20 }
 0x1a1   : > { %v472_v21 = vpop.eup %471 }
 0x1a2   : > { %v248_v23 = vmul.f32 %v472_v21, %v232_v7 }
 0x1a4   : > { %v256_v25 = vmul.f32 %v387_v22, %v248_v23 }
 0x1a5   : > { %v474_v26 = vpop.eup %473 }
 0x1a6   : > { %v264_v27 = vadd.f32 %v388_v24, %v256_v25  ;;  %v249_v28 = vmul.f32 %v474_v26, %v233_v11 }
 0x1a8   : > { %v257_v29 = vmul.f32 %v387_v22, %v249_v28  ;;  %266 = vst.msk [vmem:[%s213_s30] sm:$0xff] %vm222_vm0, %v264_v27 }
 0x1aa   : > { %v265_v30 = vadd.f32 %v388_v24, %v257_v29 }
 0x1ac   : > { %267 = vst.msk [vmem:[%s213_s30 + $0x8] sm:$0xff] %vm222_vm0, %v265_v30 }
 0x1ad   : > { %574 = shalt.err (!%p571_p6)
}
 0x1ae   : > { %s575_s7 = scalar_lea.hbm %s853_s20, 256  ;;  %s579_s5 = scalar_lea.hbm %s903_s3, 512 }
 0x1af   : > { %p576_p12 = scmp.ne.s32.totalorder %s853_s20, %s575_s7  ;;  %p580_p11 = scmp.lt.u32.totalorder %s853_s20, %s903_s3 }
 0x1b0   : > { %p581_p3 = scmp.lt.u32.totalorder %s579_s5, %s575_s7  ;;  %p583_p8 = scmp.lt.u32.totalorder %s575_s7, %s853_s20 }
 0x1b1   : > { %p577_p13 = pnand %p576_p12, %p922_p4 }
 0x1b2   : > { %p582_p7 = por %p581_p3, %p580_p11 }
 0x1b3   : > { %p578_p1 = pneg %p577_p13 }
 0x1b4   : > { %p584_p5 = por %p583_p8, %p582_p7 }
 0x1b6   : > { %p585_p10 = pnand %p584_p5, %p578_p1 }
 0x1b8   : > { %588 = shalt.err (!%p585_p10)
}
 0x1b9   : > { %s639_s23 = smov 128   ;;  %s640_s26 = smov 8  }
 0x1ba   : > { %410 = dma.vmem_to_hbm [thread:$0]  (%p922_p4), %s855_s9, 256, %s853_s20, %s269_s22, %s639_s23, %s639_s23, %s640_s26  }
 0x1bb PF: > { %s297_s30 = sand.u32 1, %s619_s12   ;;  %p923_p2 = scmp.ne.s32.totalorder %s912_s25, 0 }
 0x1bc   : > { %p924_p0 = scmp.ge.s32.totalorder %s631_s15, 2  ;;  %s298_s10 = scalar_lea.sflag [#allocation4], %s297_s30 }
 0x1be   : > { %p424_p9 = pnand %p924_p0, %p923_p2 }
 0x1c0   : > { %614 = dma.done.wait (!%p424_p9), %s298_s10, 256  }
 0x1c1   : > { %616 = vsyncadd (!%p424_p9), %s298_s10, 4294967040  ;;  %p17_p6 = scmp.ge.s32.totalorder %s686_s18, 4   ;;  %s925_s12 = smov %s623_s13 }
 0x1c2   : > { %s926_s13 = smov %s627_s14  ;;  %s927_s14 = smov %s698_s21 }
 0x1c3   : > { %s928_s15 = smov %s686_s18  ;;  %19 = sbr.rel (!%p17_p6) target bundleno = 6 (0x6), region = 85 }
 0x1ca   :  { %303 = vsyncpa [#allocation3], 1 }
 0x1cb   :  { %305 = vsyncpa [#allocation3 + $0x1], 1 }
 0x1cc   :  { %306 = vsyncpa [#allocation6], 1 }
 0x1cd   :  { %307 = vsyncpa [#allocation4], 1 }
 0x1ce   :  { %309 = vsyncpa [#allocation4 + $0x1], 1 }

// kernel: vit_forward.5
= control target key start
LH: loop header
LB: loop body
LE: loop exit
PB: predicated region body
PF: predicated region fallthrough
CT: control target
= control target key end

     0   :  { %s7806_s0 = inlined_call_operand.hbm [shape: bf16[32,32], index: 0, kind: input, shape index: {}]   ;;  %s7807_s1 = inlined_call_operand.hbm [shape: bf16[32,96], index: 1, kind: input, shape index: {}]   ;;  %s7808_s2 = inlined_call_operand.hbm [shape: f32[1,96], index: 2, kind: input, shape index: {}]   ;;  %s7809_s3 = inlined_call_operand.hbm [shape: bf16[32,32], index: 3, kind: input, shape index: {}]   ;;  %s7810_s4 = inlined_call_operand.hbm [shape: f32[1,32], index: 4, kind: input, shape index: {}]   ;;  %s7811_s5 = inlined_call_operand.hbm [shape: f32[1,32], index: 5, kind: input, shape index: {}]   ;;  %s7812_s6 = inlined_call_operand.hbm [shape: f32[1,32], index: 6, kind: input, shape index: {}]   ;;  %s7813_s7 = inlined_call_operand.hbm [shape: bf16[32,64], index: 7, kind: input, shape index: {}]   ;;  %s7814_s8 = inlined_call_operand.hbm [shape: f32[1,64], index: 8, kind: input, shape index: {}]   ;;  %s7815_s9 = inlined_call_operand.hbm [shape: bf16[64,32], index: 9, kind: input, shape index: {}]   ;;  %s7816_s10 = inlined_call_operand.hbm [shape: f32[1,32], index: 10, kind: input, shape index: {}]   ;;  %s7817_s11 = inlined_call_operand.hbm [shape: f32[1,32], index: 11, kind: input, shape index: {}]   ;;  %s7818_s12 = inlined_call_operand.hbm [shape: f32[1,32], index: 12, kind: input, shape index: {}]   ;;  %s7819_s13 = inlined_call_operand.hbm [shape: bf16[32,32], index: 13, kind: output, shape index: {}]  }
   0x1   :  { %7832 = sst [smem:[#allocation36_spill]] %s7806_s0 }
   0x2   :  { %7833 = sst [smem:[#allocation37_spill]] %s7807_s1 }
   0x3   :  { %7834 = sst [smem:[#allocation38_spill]] %s7808_s2 }
   0x4   :  { %7835 = sst [smem:[#allocation39_spill]] %s7819_s13 }
   0x5   :  { %18 = vsyncpa [#allocation4], 0 }
   0x6   :  { %20 = vsyncpa [#allocation4 + $0x1], 0 }
   0x7   :  { %21 = vsyncpa [#allocation7], 0 }
   0x8   :  { %22 = vsyncpa [#allocation10], 0 }
   0x9   :  { %23 = vsyncpa [#allocation13], 0 }
   0xa   :  { %24 = vsyncpa [#allocation16], 0 }
   0xb   :  { %25 = vsyncpa [#allocation19], 0 }
   0xc   :  { %26 = vsyncpa [#allocation22], 0 }
   0xd   :  { %27 = vsyncpa [#allocation5], 0 }
   0xe   :  { %29 = vsyncpa [#allocation5 + $0x1], 0  ;;  %s6583_s25 = smov 0   ;;  %s6585_s26 = smov 0  }
   0xf   :  { %s6587_s27 = smov 0   ;;  %s6589_s28 = smov 0  }
  0x10 LB: > { %7836 = sst [smem:[#allocation33_spill]] %s6465_s25  ;;  %s6479_s29 = smov [#allocation6]   ;;  %s6477_s28 = sphi %s6589_s28, %s7879_s28   ;;  %s6473_s27 = sphi %s6587_s27, %s7878_s27   ;;  %s6469_s26 = sphi %s6585_s26, %s7877_s26   ;;  %s6465_s25 = sphi %s6583_s25, %s7876_s25  }
  0x11   : > { %s356_s30 = sshll.u32 %s6479_s29, 4  ;;  %s6604_s14 = sadd.s32 4294967295, %s6477_s28   ;;  %s6609_s30 = int_to_ptr.vmem [resolvable:$true] %s356_s30 }
  0x12   : > { %7837 = sst [smem:[#allocation34_spill]] %s6604_s14  ;;  %p4993_p0 = scmp.ge.s32.totalorder %s6477_s28, 1 }
  0x13   : > { %p7828_p1 = scmp.eq.s32.totalorder %s6604_s14, 0  ;;  %p344_p2 = scmp.lt.s32.totalorder %s6477_s28, 3 }
  0x14   : > { %s6480_s16 = smov [#allocation9]   ;;  %s6481_s19 = smov [#allocation12]  }
  0x15   : > { %p6611_p3 = pnand %p4993_p0, %p344_p2  ;;  %s380_s17 = sshll.u32 %s6480_s16, 4  ;;  %s6624_s17 = int_to_ptr.vmem [resolvable:$true] %s380_s17 }
  0x16   : > { %s405_s20 = sshll.u32 %s6481_s19, 4  ;;  %s7841_s1 = sld [smem:[#allocation37_spill]]  ;;  %s6626_s20 = int_to_ptr.vmem [resolvable:$true] %s405_s20 }
  0x17   : > { %s7838_s15 = scalar_select %p6611_p3, 1, 0 }
  0x18   : > { %p5737_p5 = pneg %p6611_p3 }
  0x19   : > { %7839 = sst [smem:[#allocation35_spill]] %s7838_s15 }
  0x1a   : > { %p6620_p6 = pnand %p5737_p5, %p7828_p1 }
  0x1c   : > { %s6021_s23 = scalar_lea.hbm %s7841_s1, 256  ;;  %p6636_p8 = pneg %p6620_p6 }
  0x1d   : > { %p6022_p7 = scmp.ne.s32.totalorder %s7841_s1, %s6021_s23  ;;  %p6028_p11 = scmp.lt.u32.totalorder %s6021_s23, %s7841_s1 }
  0x1f   : > { %p6024_p9 = pnand %p6636_p8, %p6022_p7 }
  0x21   : > { %p6025_p10 = pneg %p6024_p9 }
  0x23   : > { %p6030_p12 = pnand %p6028_p11, %p6025_p10 }
  0x25   : > { %6033 = shalt.err (!%p6030_p12)
}
  0x26   : > { %s6034_s21 = scalar_lea.vmem %s6609_s30, 256  ;;  %p6042_p5 = scmp.lt.s32.totalorder %s6609_s30, %s6609_s30 }
  0x27   : > { %p6035_p13 = scmp.ne.s32.totalorder %s6609_s30, %s6034_s21  ;;  %p6043_p4 = scmp.lt.s32.totalorder %s6034_s21, %s6034_s21 }
  0x29   : > { %p6037_p0 = pnand %p6035_p13, %p6636_p8  ;;  %p6044_p7 = por %p6043_p4, %p6042_p5 }
  0x2b   : > { %p6038_p2 = pneg %p6037_p0 }
  0x2d   : > { %p6045_p9 = pnand %p6044_p7, %p6038_p2 }
  0x2f   : > { %6048 = shalt.err (!%p6045_p9)
}
  0x30   : > { %s7826_s22 = smov 64   ;;  %s7830_s13 = smov 4  }
  0x31   : > { %5740 = dma.hbm_to_vmem [thread:$0]  (!%p6620_p6), %s7841_s1, 256, %s6609_s30, [#allocation7], %s7826_s22, %s7826_s22, %s7830_s13  }
  0x32   : > { %s6049_s21 = scalar_lea.hbm %s7809_s3, 256 }
  0x33   : > { %p6050_p4 = scmp.ne.s32.totalorder %s7809_s3, %s6049_s21  ;;  %p6056_p12 = scmp.lt.u32.totalorder %s6049_s21, %s7809_s3 }
  0x35   : > { %p6052_p10 = pnand %p6050_p4, %p6636_p8 }
  0x37   : > { %p6053_p11 = pneg %p6052_p10 }
  0x39   : > { %p6058_p13 = pnand %p6056_p12, %p6053_p11 }
  0x3b   : > { %6061 = shalt.err (!%p6058_p13)
}
  0x3c   : > { %s6062_s30 = scalar_lea.vmem %s6624_s17, 256  ;;  %p6070_p7 = scmp.lt.s32.totalorder %s6624_s17, %s6624_s17 }
  0x3d   : > { %p6063_p0 = scmp.ne.s32.totalorder %s6624_s17, %s6062_s30  ;;  %p6071_p9 = scmp.lt.s32.totalorder %s6062_s30, %s6062_s30 }
  0x3f   : > { %p6065_p2 = pnand %p6063_p0, %p6636_p8  ;;  %p6072_p4 = por %p6071_p9, %p6070_p7 }
  0x41   : > { %p6066_p5 = pneg %p6065_p2 }
  0x43   : > { %p6073_p10 = pnand %p6072_p4, %p6066_p5 }
  0x45   : > { %6076 = shalt.err (!%p6073_p10)
}
  0x46   : > { %5746 = dma.hbm_to_vmem [thread:$0]  (!%p6620_p6), %s7809_s3, 256, %s6624_s17, [#allocation10], %s7826_s22, %s7826_s22, %s7830_s13  }
  0x47   : > { %s6077_s23 = scalar_lea.hbm %s7811_s5, 16 }
  0x48   : > { %p6078_p11 = scmp.ne.s32.totalorder %s7811_s5, %s6077_s23  ;;  %p6084_p0 = scmp.lt.u32.totalorder %s6077_s23, %s7811_s5 }
  0x4a   : > { %p6080_p12 = pnand %p6078_p11, %p6636_p8 }
  0x4c   : > { %p6081_p13 = pneg %p6080_p12 }
  0x4e   : > { %p6086_p2 = pnand %p6084_p0, %p6081_p13 }
  0x50   : > { %6089 = shalt.err (!%p6086_p2)
}
  0x51   : > { %s6090_s17 = scalar_lea.vmem %s6626_s20, 16  ;;  %s6097_s30 = scalar_lea.vmem %s6626_s20, 32 }
  0x52   : > { %p6091_p5 = scmp.ne.s32.totalorder %s6626_s20, %s6090_s17  ;;  %p6098_p4 = scmp.lt.s32.totalorder %s6626_s20, %s6626_s20 }
  0x53   : > { %p6099_p10 = scmp.lt.s32.totalorder %s6097_s30, %s6090_s17 }
  0x54   : > { %p6093_p7 = pnand %p6091_p5, %p6636_p8 }
  0x55   : > { %p6100_p11 = por %p6099_p10, %p6098_p4 }
  0x56   : > { %p6094_p9 = pneg %p6093_p7 }
  0x58   : > { %p6101_p12 = pnand %p6100_p11, %p6094_p9 }
  0x5a   : > { %6104 = shalt.err (!%p6101_p12)
}
  0x5b   : > { %5752 = dma.hbm_to_vmem [thread:$0]  (!%p6620_p6), %s7811_s5, 16, %s6626_s20, [#allocation13]  }
  0x5c   : > { %s6484_s14 = smov [#allocation15]   ;;  %s6485_s23 = smov [#allocation18]  }
  0x5d   : > { %s426_s15 = sshll.u32 %s6484_s14, 4  ;;  %s450_s24 = sshll.u32 %s6485_s23, 4  ;;  %s427_s15 = int_to_ptr.vmem [resolvable:$true] %s426_s15  ;;  %s451_s24 = int_to_ptr.vmem [resolvable:$true] %s450_s24 }
  0x5e   : > { %s6105_s21 = scalar_lea.hbm %s7813_s7, 256 }
  0x5f   : > { %p6106_p13 = scmp.ne.s32.totalorder %s7813_s7, %s6105_s21  ;;  %p6112_p5 = scmp.lt.u32.totalorder %s6105_s21, %s7813_s7 }
  0x61   : > { %p6108_p0 = pnand %p6106_p13, %p6636_p8 }
  0x63   : > { %p6109_p2 = pneg %p6108_p0 }
  0x65   : > { %p6114_p7 = pnand %p6112_p5, %p6109_p2 }
  0x67   : > { %6117 = shalt.err (!%p6114_p7)
}
  0x68   : > { %s6118_s20 = scalar_lea.vmem %s427_s15, 256  ;;  %p6126_p11 = scmp.lt.s32.totalorder %s427_s15, %s427_s15 }
  0x69   : > { %p6119_p9 = scmp.ne.s32.totalorder %s427_s15, %s6118_s20  ;;  %p6127_p12 = scmp.lt.s32.totalorder %s6118_s20, %s6118_s20 }
  0x6b   : > { %p6121_p4 = pnand %p6119_p9, %p6636_p8  ;;  %p6128_p1 = por %p6127_p12, %p6126_p11 }
  0x6d   : > { %p6122_p10 = pneg %p6121_p4 }
  0x6f   : > { %p6129_p3 = pnand %p6128_p1, %p6122_p10 }
  0x71   : > { %6132 = shalt.err (!%p6129_p3)
}
  0x72   : > { %s7843_s25 = smov 64   ;;  %s6133_s19 = scalar_lea.hbm %s7815_s9, 512 }
  0x73   : > { %5758 = dma.hbm_to_vmem [thread:$0]  (!%p6620_p6), %s7813_s7, 256, %s427_s15, [#allocation16], %s7843_s25, %s7843_s25, %s7830_s13  }
  0x74   : > { %p6134_p1 = scmp.ne.s32.totalorder %s7815_s9, %s6133_s19  ;;  %p6140_p0 = scmp.lt.u32.totalorder %s6133_s19, %s7815_s9 }
  0x76   : > { %p6136_p3 = pnand %p6134_p1, %p6636_p8 }
  0x78   : > { %p6137_p13 = pneg %p6136_p3 }
  0x7a   : > { %p6142_p2 = pnand %p6140_p0, %p6137_p13 }
  0x7c   : > { %6145 = shalt.err (!%p6142_p2)
}
  0x7d   : > { %s6146_s20 = scalar_lea.vmem %s451_s24, 512  ;;  %p6154_p4 = scmp.lt.s32.totalorder %s451_s24, %s451_s24 }
  0x7e   : > { %p6147_p5 = scmp.ne.s32.totalorder %s451_s24, %s6146_s20  ;;  %p6155_p10 = scmp.lt.s32.totalorder %s6146_s20, %s6146_s20 }
  0x80   : > { %p6149_p7 = pnand %p6147_p5, %p6636_p8  ;;  %p6156_p11 = por %p6155_p10, %p6154_p4 }
  0x82   : > { %p6150_p9 = pneg %p6149_p7 }
  0x84   : > { %p6157_p12 = pnand %p6156_p11, %p6150_p9 }
  0x86   : > { %6160 = shalt.err (!%p6157_p12)
}
  0x87   : > { %5764 = dma.hbm_to_vmem [thread:$0]  (!%p6620_p6), %s7815_s9, 512, %s451_s24, [#allocation19], %s7843_s25, %s7843_s25, %s7830_s13  }
  0x88   : > { %s6486_s14 = smov [#allocation21]   ;;  %s6487_s29 = smov [#allocation8]  }
  0x89   : > { %s475_s23 = sshll.u32 %s6486_s14, 4  ;;  %s370_s19 = sshll.u32 %s6487_s29, 4  ;;  %s476_s23 = int_to_ptr.vmem [resolvable:$true] %s475_s23  ;;  %s371_s19 = int_to_ptr.vmem [resolvable:$true] %s370_s19 }
  0x8a   : > { %s6161_s30 = scalar_lea.hbm %s7817_s11, 16 }
  0x8b   : > { %p6162_p1 = scmp.ne.s32.totalorder %s7817_s11, %s6161_s30  ;;  %p6168_p0 = scmp.lt.u32.totalorder %s6161_s30, %s7817_s11 }
  0x8d   : > { %p6164_p3 = pnand %p6162_p1, %p6636_p8 }
  0x8f   : > { %p6165_p13 = pneg %p6164_p3 }
  0x91   : > { %p6170_p2 = pnand %p6168_p0, %p6165_p13 }
  0x93   : > { %6173 = shalt.err (!%p6170_p2)
}
  0x94   : > { %s6174_s24 = scalar_lea.vmem %s476_s23, 16  ;;  %s6181_s22 = scalar_lea.vmem %s476_s23, 32 }
  0x95   : > { %p6175_p5 = scmp.ne.s32.totalorder %s476_s23, %s6174_s24  ;;  %p6182_p4 = scmp.lt.s32.totalorder %s476_s23, %s476_s23 }
  0x96   : > { %p6183_p10 = scmp.lt.s32.totalorder %s6181_s22, %s6174_s24 }
  0x97   : > { %p6177_p7 = pnand %p6175_p5, %p6636_p8 }
  0x98   : > { %p6184_p11 = por %p6183_p10, %p6182_p4 }
  0x99   : > { %p6178_p9 = pneg %p6177_p7 }
  0x9b   : > { %p6185_p12 = pnand %p6184_p11, %p6178_p9 }
  0x9d   : > { %6188 = shalt.err (!%p6185_p12)
}
  0x9e   : > { %5770 = dma.hbm_to_vmem [thread:$0]  (!%p6620_p6), %s7817_s11, 16, %s476_s23, [#allocation22]  }
  0x9f   : > { %s7844_s2 = sld [smem:[#allocation38_spill]] }
  0xa5   : > { %s6189_s17 = scalar_lea.hbm %s7844_s2, 16 }
  0xa6   : > { %p6190_p1 = scmp.ne.s32.totalorder %s7844_s2, %s6189_s17  ;;  %p6196_p0 = scmp.lt.u32.totalorder %s6189_s17, %s7844_s2 }
  0xa8   : > { %p6192_p3 = pnand %p6190_p1, %p6636_p8 }
  0xaa   : > { %p6193_p13 = pneg %p6192_p3 }
  0xac   : > { %p6198_p2 = pnand %p6196_p0, %p6193_p13 }
  0xae   : > { %6201 = shalt.err (!%p6198_p2)
}
  0xaf   : > { %s6202_s24 = scalar_lea.vmem %s371_s19, 16  ;;  %s6209_s23 = scalar_lea.vmem %s371_s19, 32 }
  0xb0   : > { %p6203_p5 = scmp.ne.s32.totalorder %s371_s19, %s6202_s24  ;;  %p6210_p4 = scmp.lt.s32.totalorder %s371_s19, %s371_s19 }
  0xb1   : > { %p6211_p10 = scmp.lt.s32.totalorder %s6209_s23, %s6202_s24 }
  0xb2   : > { %p6205_p7 = pnand %p6203_p5, %p6636_p8 }
  0xb3   : > { %p6212_p11 = por %p6211_p10, %p6210_p4 }
  0xb4   : > { %p6206_p9 = pneg %p6205_p7 }
  0xb6   : > { %p6213_p12 = pnand %p6212_p11, %p6206_p9 }
  0xb8   : > { %6216 = shalt.err (!%p6213_p12)
}
  0xb9   : > { %5743 = dma.hbm_to_vmem [thread:$0]  (!%p6620_p6), %s7844_s2, 16, %s371_s19, [#allocation7]  }
  0xba   : > { %s6488_s29 = smov [#allocation11]   ;;  %s6489_s21 = smov [#allocation14]  }
  0xbb   : > { %s394_s1 = sshll.u32 %s6488_s29, 4  ;;  %s416_s17 = sshll.u32 %s6489_s21, 4  ;;  %s395_s1 = int_to_ptr.vmem [resolvable:$true] %s394_s1  ;;  %s417_s17 = int_to_ptr.vmem [resolvable:$true] %s416_s17 }
  0xbc   : > { %s6217_s20 = scalar_lea.hbm %s7810_s4, 16 }
  0xbd   : > { %p6218_p1 = scmp.ne.s32.totalorder %s7810_s4, %s6217_s20  ;;  %p6224_p0 = scmp.lt.u32.totalorder %s6217_s20, %s7810_s4 }
  0xbf   : > { %p6220_p3 = pnand %p6218_p1, %p6636_p8 }
  0xc1   : > { %p6221_p13 = pneg %p6220_p3 }
  0xc3   : > { %p6226_p2 = pnand %p6224_p0, %p6221_p13 }
  0xc5   : > { %6229 = shalt.err (!%p6226_p2)
}
  0xc6   : > { %s6230_s19 = scalar_lea.vmem %s395_s1, 16  ;;  %s6237_s14 = scalar_lea.vmem %s395_s1, 32 }
  0xc7   : > { %p6231_p5 = scmp.ne.s32.totalorder %s395_s1, %s6230_s19  ;;  %p6238_p4 = scmp.lt.s32.totalorder %s395_s1, %s395_s1 }
  0xc8   : > { %p6239_p10 = scmp.lt.s32.totalorder %s6237_s14, %s6230_s19 }
  0xc9   : > { %p6233_p7 = pnand %p6231_p5, %p6636_p8 }
  0xca   : > { %p6240_p11 = por %p6239_p10, %p6238_p4 }
  0xcb   : > { %p6234_p9 = pneg %p6233_p7 }
  0xcd   : > { %p6241_p12 = pnand %p6240_p11, %p6234_p9 }
  0xcf   : > { %6244 = shalt.err (!%p6241_p12)
}
  0xd0   : > { %5749 = dma.hbm_to_vmem [thread:$0]  (!%p6620_p6), %s7810_s4, 16, %s395_s1, [#allocation10]  }
  0xd1   : > { %s6245_s20 = scalar_lea.hbm %s7812_s6, 16 }
  0xd2   : > { %p6246_p1 = scmp.ne.s32.totalorder %s7812_s6, %s6245_s20  ;;  %p6252_p0 = scmp.lt.u32.totalorder %s6245_s20, %s7812_s6 }
  0xd4   : > { %p6248_p3 = pnand %p6246_p1, %p6636_p8 }
  0xd6   : > { %p6249_p13 = pneg %p6248_p3 }
  0xd8   : > { %p6254_p2 = pnand %p6252_p0, %p6249_p13 }
  0xda   : > { %6257 = shalt.err (!%p6254_p2)
}
  0xdb   : > { %s6258_s19 = scalar_lea.vmem %s417_s17, 16  ;;  %s6265_s1 = scalar_lea.vmem %s417_s17, 32 }
  0xdc   : > { %p6259_p5 = scmp.ne.s32.totalorder %s417_s17, %s6258_s19  ;;  %p6266_p4 = scmp.lt.s32.totalorder %s417_s17, %s417_s17 }
  0xdd   : > { %p6267_p10 = scmp.lt.s32.totalorder %s6265_s1, %s6258_s19 }
  0xde   : > { %p6261_p7 = pnand %p6259_p5, %p6636_p8 }
  0xdf   : > { %p6268_p11 = por %p6267_p10, %p6266_p4 }
  0xe0   : > { %p6262_p9 = pneg %p6261_p7 }
  0xe2   : > { %p6269_p12 = pnand %p6268_p11, %p6262_p9 }
  0xe4   : > { %6272 = shalt.err (!%p6269_p12)
}
  0xe5   : > { %5755 = dma.hbm_to_vmem [thread:$0]  (!%p6620_p6), %s7812_s6, 16, %s417_s17, [#allocation13]  }
  0xe6   : > { %s6490_s21 = smov [#allocation17]   ;;  %s6491_s0 = smov [#allocation20]  }
  0xe7   : > { %s440_s30 = sshll.u32 %s6490_s21, 4  ;;  %s464_s20 = sshll.u32 %s6491_s0, 4  ;;  %s441_s30 = int_to_ptr.vmem [resolvable:$true] %s440_s30  ;;  %s465_s20 = int_to_ptr.vmem [resolvable:$true] %s464_s20 }
  0xe8   : > { %s6273_s23 = scalar_lea.hbm %s7814_s8, 16 }
  0xe9   : > { %p6274_p1 = scmp.ne.s32.totalorder %s7814_s8, %s6273_s23  ;;  %p6280_p0 = scmp.lt.u32.totalorder %s6273_s23, %s7814_s8 }
  0xeb   : > { %p6276_p3 = pnand %p6274_p1, %p6636_p8 }
  0xed   : > { %p6277_p13 = pneg %p6276_p3 }
  0xef   : > { %p6282_p2 = pnand %p6280_p0, %p6277_p13 }
  0xf1   : > { %6285 = shalt.err (!%p6282_p2)
}
  0xf2   : > { %s6286_s17 = scalar_lea.vmem %s441_s30, 16  ;;  %s6293_s29 = scalar_lea.vmem %s441_s30, 32 }
  0xf3   : > { %p6287_p5 = scmp.ne.s32.totalorder %s441_s30, %s6286_s17  ;;  %p6294_p4 = scmp.lt.s32.totalorder %s441_s30, %s441_s30 }
  0xf4   : > { %p6295_p10 = scmp.lt.s32.totalorder %s6293_s29, %s6286_s17 }
  0xf5   : > { %p6289_p7 = pnand %p6287_p5, %p6636_p8 }
  0xf6   : > { %p6296_p11 = por %p6295_p10, %p6294_p4 }
  0xf7   : > { %p6290_p9 = pneg %p6289_p7 }
  0xf9   : > { %p6297_p12 = pnand %p6296_p11, %p6290_p9 }
  0xfb   : > { %6300 = shalt.err (!%p6297_p12)
}
  0xfc   : > { %5761 = dma.hbm_to_vmem [thread:$0]  (!%p6620_p6), %s7814_s8, 16, %s441_s30, [#allocation16]  }
  0xfd   : > { %s6301_s23 = scalar_lea.hbm %s7816_s10, 16 }
  0xfe   : > { %p6302_p1 = scmp.ne.s32.totalorder %s7816_s10, %s6301_s23  ;;  %p6308_p0 = scmp.lt.u32.totalorder %s6301_s23, %s7816_s10 }
 0x100   : > { %p6304_p3 = pnand %p6302_p1, %p6636_p8 }
 0x102   : > { %p6305_p13 = pneg %p6304_p3 }
 0x104   : > { %p6310_p2 = pnand %p6308_p0, %p6305_p13 }
 0x106   : > { %6313 = shalt.err (!%p6310_p2)
}
 0x107   : > { %s6314_s17 = scalar_lea.vmem %s465_s20, 16  ;;  %s6321_s30 = scalar_lea.vmem %s465_s20, 32 }
 0x108   : > { %p6315_p5 = scmp.ne.s32.totalorder %s465_s20, %s6314_s17  ;;  %p6322_p4 = scmp.lt.s32.totalorder %s465_s20, %s465_s20 }
 0x109   : > { %p6323_p10 = scmp.lt.s32.totalorder %s6321_s30, %s6314_s17 }
 0x10a   : > { %p6317_p7 = pnand %p6315_p5, %p6636_p8 }
 0x10b   : > { %p6324_p11 = por %p6323_p10, %p6322_p4 }
 0x10c   : > { %p6318_p9 = pneg %p6317_p7 }
 0x10e   : > { %p6325_p12 = pnand %p6324_p11, %p6318_p9 }
 0x110   : > { %6328 = shalt.err (!%p6325_p12)
}
 0x111   : > { %5767 = dma.hbm_to_vmem [thread:$0]  (!%p6620_p6), %s7816_s10, 16, %s465_s20, [#allocation19]  }
 0x112   : > { %s6492_s0 = smov [#allocation23]   ;;  %s6329_s22 = scalar_lea.hbm %s7818_s12, 16 }
 0x113   : > { %s486_s15 = sshll.u32 %s6492_s0, 4  ;;  %p6330_p1 = scmp.ne.s32.totalorder %s7818_s12, %s6329_s22  ;;  %s487_s15 = int_to_ptr.vmem [resolvable:$true] %s486_s15 }
 0x114   : > { %p6336_p0 = scmp.lt.u32.totalorder %s6329_s22, %s7818_s12 }
 0x115   : > { %p6332_p3 = pnand %p6330_p1, %p6636_p8 }
 0x117   : > { %p6333_p13 = pneg %p6332_p3 }
 0x119   : > { %p6338_p2 = pnand %p6336_p0, %p6333_p13 }
 0x11b   : > { %6341 = shalt.err (!%p6338_p2)
}
 0x11c   : > { %s6342_s20 = scalar_lea.vmem %s487_s15, 16  ;;  %s6349_s30 = scalar_lea.vmem %s487_s15, 32 }
 0x11d   : > { %p6343_p5 = scmp.ne.s32.totalorder %s487_s15, %s6342_s20  ;;  %p6350_p4 = scmp.lt.s32.totalorder %s487_s15, %s487_s15 }
 0x11e   : > { %p6351_p10 = scmp.lt.s32.totalorder %s6349_s30, %s6342_s20 }
 0x11f   : > { %p6345_p7 = pnand %p6343_p5, %p6636_p8 }
 0x120   : > { %p6352_p11 = por %p6351_p10, %p6350_p4 }
 0x121   : > { %p6346_p9 = pneg %p6345_p7 }
 0x123   : > { %p6353_p12 = pnand %p6352_p11, %p6346_p9 }
 0x125   : > { %6356 = shalt.err (!%p6353_p12)
}
 0x126   : > { %s7845_s16 = sld [smem:[#allocation33_spill]]  ;;  %s7846_s0 = sld [smem:[#allocation34_spill]] }
 0x127   : > { %5773 = dma.hbm_to_vmem [thread:$0]  (!%p6620_p6), %s7818_s12, 16, %s487_s15, [#allocation22]  }
 0x128   : > { %s4992_s24 = sadd.s32 4294967294, %s6477_s28   ;;  %s6880_s18 = sadd.s32 1, %s6477_s28  }
 0x129   : > { %s39_s23 = ssub.s32 %s6477_s28, %s6880_s18  ;;  %s42_s22 = sadd.s32 1, %s6473_s27 }
 0x12a   : > { %p40_p8 = scmp.eq.s32.totalorder %s39_s23, 0  ;;  %p49_p1 = scmp.ne.s32.totalorder %s6473_s27, %s6469_s26 }
 0x12b   : > { %p50_p3 = scmp.eq.s32.totalorder %s6477_s28, 0  ;;  %p337_p7 = scmp.eq.s32.totalorder %s4992_s24, 1 }
 0x12c   : > { %p55_p13 = scmp.ne.s32.totalorder %s6469_s26, %s7845_s16  ;;  %p7848_p2 = scmp.eq.s32.totalorder %s7846_s0, 0 }
 0x12d   : > { %s6891_s19 = scalar_select %p40_p8, %s6473_s27, %s42_s22  }
 0x12e   : > { %p6893_p0 = por %p50_p3, %p49_p1  ;;  %p6899_p6 = por %p7848_p2, %p55_p13 }
 0x12f   : > { %p331_p5 = scmp.eq.s32.totalorder %s7846_s0, 1  ;;  %p5794_p9 = scmp.lt.s32.totalorder %s6477_s28, 2 }
 0x130   : > { %s497_s14 = sand.u32 1, %s6473_s27   ;;  %p6910_p10 = por %p337_p7, %p55_p13 }
 0x131   : > { %p6906_p4 = por %p331_p5, %p49_p1  ;;  %s5007_s30 = sshll.u32 %s497_s14, 3 }
 0x132   : > { %s7851_s20 = scalar_select %p6910_p10, 1, 0 }
 0x133   : > { %s7850_s17 = scalar_select %p6906_p4, 1, 0 }
 0x134   : > { %s5119_s29 = sshll.u32 %s6477_s28, 7  ;;  %s7852_s23 = sld [smem:[#allocation36_spill]] }
 0x135   : > { %s501_s0 = scalar_lea.vmem [#allocation3], %s5007_s30  ;;  %p6924_p11 = pnand %p5794_p9, %p6893_p0 }
 0x136   : > { %s508_s24 = sshll.u32 %s501_s0, 4  ;;  %s6928_s2 = scalar_lea.sflag [#allocation4], %s497_s14  ;;  %s6920_s24 = int_to_ptr.vmem [resolvable:$true] %s508_s24 }
 0x137   : > { %p6359_p8 = pneg %p6924_p11 }
 0x13a   : > { %s6918_s22 = scalar_lea.hbm %s7852_s23, %s5119_s29  ;;  %s6362_s1 = scalar_lea.hbm %s7852_s23, 256 }
 0x13b   : > { %s6357_s21 = scalar_lea.hbm %s6918_s22, 128  ;;  %p6363_p13 = scmp.lt.u32.totalorder %s6918_s22, %s7852_s23 }
 0x13c   : > { %p6358_p12 = scmp.ne.s32.totalorder %s6918_s22, %s6357_s21  ;;  %p6364_p0 = scmp.lt.u32.totalorder %s6362_s1, %s6357_s21 }
 0x13d   : > { %p6366_p5 = scmp.lt.u32.totalorder %s6357_s21, %s6918_s22 }
 0x13e   : > { %p6360_p1 = pnand %p6359_p8, %p6358_p12  ;;  %p6365_p2 = por %p6364_p0, %p6363_p13 }
 0x140   : > { %p6361_p3 = pneg %p6360_p1  ;;  %p6367_p7 = por %p6366_p5, %p6365_p2 }
 0x142   : > { %p6368_p9 = pnand %p6367_p7, %p6361_p3 }
 0x144   : > { %6371 = shalt.err (!%p6368_p9)
}
 0x145   : > { %s6372_s14 = scalar_lea.vmem %s6920_s24, 128  ;;  %s6493_s30 = smov [#allocation3]  }
 0x146   : > { %p6373_p12 = scmp.ne.s32.totalorder %s6920_s24, %s6372_s14  ;;  %s6377_s29 = sshll.u32 %s6493_s30, 4  ;;  %s6378_s29 = int_to_ptr.vmem [resolvable:$false] %s6377_s29 }
 0x147   : > { %s6379_s16 = scalar_lea.vmem %s6378_s29, 256  ;;  %p6380_p4 = scmp.lt.s32.totalorder %s6920_s24, %s6378_s29 }
 0x148   : > { %p6375_p1 = pnand %p6373_p12, %p6359_p8  ;;  %p6381_p13 = scmp.lt.s32.totalorder %s6379_s16, %s6372_s14 }
 0x14a   : > { %p6376_p10 = pneg %p6375_p1  ;;  %p6382_p0 = por %p6381_p13, %p6380_p4 }
 0x14c   : > { %p6383_p2 = pnand %p6382_p0, %p6376_p10 }
 0x14e   : > { %6386 = shalt.err (!%p6383_p2)
}
 0x14f   : > { %s7854_s21 = smov 4   ;;  %s7855_s1 = sld [smem:[#allocation35_spill]] }
 0x150   : > { %5777 = dma.hbm_to_vmem [thread:$0]  (!%p6924_p11), %s6918_s22, 128, %s6920_s24, %s6928_s2, %s7843_s25, %s7843_s25, %s7854_s21  }
 0x155   : > { %p7856_p8 = scmp.ne.s32.totalorder %s7855_s1, 0 }
 0x156   : > { %s6962_s0 = sand.u32 (!%p7856_p8), 1, %s6469_s26  }
 0x157   : > { %520 = sbr.rel (%p7856_p8) target bundleno = 4788 (0x12b4), region = 72  ;;  %s5011_s14 = sshll.u32 (!%p7856_p8), %s6962_s0, 3 }
 0x158   : > { %s523_s30 = scalar_lea.sflag (!%p7856_p8), [#allocation4], %s6962_s0  ;;  %s6968_s13 = scalar_lea.vmem (!%p7856_p8), [#allocation3], %s5011_s14 }
 0x15e   : > { %6432 = dma.done.wait (%p6899_p6), %s523_s30, 128  }
 0x15f   : > { %6434 = vsyncadd (%p6899_p6), %s523_s30, 4294967168  ;;  %s7857_s2 = sld [smem:[#allocation34_spill]] }
 0x165   : > { %p7858_p4 = scmp.eq.s32.totalorder %s7857_s2, 0 }
 0x167   : > { %6436 = dma.done.wait (%p7858_p4), [#allocation7], 272   ;;  %p7859_p10 = pmov %p7858_p4 }
 0x168   : > { %p7860_p11 = pmov %p7858_p4 }
 0x169   : > { %6438 = vsyncadd (%p7859_p10), [#allocation7], 4294967024 }
 0x16a   : > { %6440 = dma.done.wait (%p7860_p11), [#allocation10], 272   ;;  %p7861_p3 = pmov %p7858_p4 }
 0x16c   : > { %6442 = vsyncadd (%p7861_p3), [#allocation10], 4294967024  ;;  %p7862_p5 = pmov %p7861_p3 }
 0x16d   : > { %p7863_p7 = pmov %p7861_p3 }
 0x16e   : > { %6444 = dma.done.wait (%p7862_p5), [#allocation13], 32  }
 0x16f   : > { %6446 = vsyncadd (%p7863_p7), [#allocation13], 4294967264  ;;  %p7864_p6 = pmov %p7861_p3 }
 0x170   : > { %p7865_p9 = pmov %p7861_p3 }
 0x171   : > { %6448 = dma.done.wait (%p7864_p6), [#allocation16], 272  }
 0x172   : > { %6450 = vsyncadd (%p7865_p9), [#allocation16], 4294967024  ;;  %p7866_p12 = pmov %p7861_p3 }
 0x173   : > { %p7867_p1 = pmov %p7861_p3 }
 0x174   : > { %6452 = dma.done.wait (%p7866_p12), [#allocation19], 528  }
 0x175   : > { %6454 = vsyncadd (%p7867_p1), [#allocation19], 4294966768  ;;  %p7868_p13 = pmov %p7867_p1 }
 0x176   : > { %p7869_p0 = pmov %p7867_p1 }
 0x177   : > { %6456 = dma.done.wait (%p7868_p13), [#allocation22], 32  }
 0x178   : > { %6458 = vsyncadd (%p7869_p0), [#allocation22], 4294967264  ;;  %v6494_v0 = vmov 0.0   ;;  %vm6495_vm0 = vmmov 0   ;;  %v5872_v1 = vld [vmem:[#allocation6] sm:$0xff]   ;;  %v5873_v2 = vld [vmem:[#allocation6 + $0x8] sm:$0xff]   ;;  %v701_v6 = vlaneseq }
 0x179   : > { %5265 = vmatprep.subr.bf16.mxu0 %v6494_v0  ;;  %5269 = vmatprep.mubr.msk.bf16.mxu0 %vm6495_vm0, %v6494_v0  ;;  %v620_v3 = vld [vmem:[%s6968_s13] sm:$0xff]   ;;  %vm650_vm1 = vcmask 261120   ;;  %v6496_v4 = vmov 1983009808   ;;  %s6497_s25 = smov 96   ;;  %s6498_s15 = smov 64  }
 0x17a   : > { %5273 = vmatprep.subr.bf16.mxu1 %v6494_v0  ;;  %5275 = vmatprep.mubr.msk.bf16.mxu1 %vm6495_vm0, %v6494_v0  ;;  %v699_v5 = vunpack.c.l.s4 %v6496_v4  ;;  %v702_v8 = vshrl.u32 %v701_v6, 7  ;;  %v5025_v9 = vld [vmem:[#allocation8] ss:$0 sm:$0xff]  ;;  %vm750_vm2 = vcmask 64512   ;;  %vm1243_vm3 = vcmask 1040384   ;;  %s6499_s22 = smov 88  }
 0x17b   : > { %5266 = vmatpush3.bf16.msra.mxu0 %v5872_v1  ;;  %vm1140_vm4 = vcmask 9216   ;;  %s6500_s24 = smov 120   ;;  %s6501_s29 = smov 56   ;;  %vm1239_vm5 = vcmask 15360   ;;  %vm2598_vm6 = vcmask 130112   ;;  %vm3529_vm7 = vcmask 195712  }
 0x17c   : > { %5267 = vmatprep.subr.bf16.mxu0 %v6494_v0  ;;  %v700_v7 = vunpack.c.0.s8 %v699_v5  ;;  %s6502_s16 = smov 80   ;;  %s6503_s21 = smov 112   ;;  %vm4460_vm8 = vcmask 261312   ;;  %vm4689_vm9 = vcmask 523264   ;;  %vm4788_vm10 = vcmask 257024  }
 0x17d   : > { %s6504_s1 = smov 48   ;;  %s6505_s30 = smov 72  }
 0x17e   : > { %v7010_v10 = vsub.s32 %v700_v7, %v702_v8  ;;  %p7871_p8 = scmp.ne.s32.totalorder %s7850_s17, 0 }
 0x17f   : > { %5268 = vmatpush3.bf16.msra.mxu0 %v5873_v2 }
 0x180   : > { %5279 = vmatprep.subr.bf16.mxu0 %v6494_v0 }
 0x182   : > { %5270 = vmatmul.mubr.msk.bf16.vlgmr.msra.gmra.mrb[0].mxu0 %vm650_vm1, %v620_v3 }
 0x183   : > { %5281 = vmatprep.mubr.msk.bf16.mxu0 %vm6495_vm0, %v6494_v0 }
 0x255   : > { %v688_v11 = vpop.f32.mrb[0].mxu0 }
 0x256   : > { %v689_v12 = vadd.f32 %v5025_v9, %v688_v11  ;;  %v5271_v13 = vpop.f32.mrb[1].mxu0 }
 0x257   : > { %v691_v14 = vpop.f32.mrb[2].mxu0 }
 0x258   : > { %v697_v15 = vcombine.high %v689_v12, %v689_v12  ;;  %v704_v16 = vrot.slane %v689_v12, %v7010_v10  ;;  %v692_v17 = vadd.f32 %v5025_v9, %v691_v14  ;;  %v5272_v18 = vpop.f32.mrb[3].mxu0 }
 0x25a   : > { %v711_v19 = vrot.slane %v697_v15, %v7010_v10  ;;  %v712_v20 = vcombine.high %v704_v16, %v704_v16  ;;  %v7014_v21 = vpack.c.bf16 %v704_v16, %v704_v16  ;;  %v714_v24 = vcombine.high %v692_v17, %v692_v17 }
 0x25b   : > { %v721_v25 = vrot.slane %v692_v17, %v7010_v10 }
 0x25c   : > { %v713_v22 = vcombine.high %v711_v19, %v711_v19  ;;  %v7016_v23 = vpack.c.bf16 %v711_v19, %v711_v19  ;;  %748 = vrot.lane.b32.xlu0 %v7014_v21, %s6497_s25  ;;  %v7020_v26 = vpack.c.bf16 %v712_v20, %v712_v20  ;;  %v728_v28 = vrot.slane %v714_v24, %v7010_v10 }
 0x25d   : > { %v729_v29 = vcombine.high %v721_v25, %v721_v25  ;;  %v7027_v30 = vpack.c.bf16 %v721_v25, %v721_v25 }
 0x25e   : > { %847 = vrot.lane.b32.xlu1 %v7016_v23, %s6497_s25  ;;  %v7023_v27 = vpack.c.bf16 %v713_v22, %v713_v22  ;;  %v730_v31 = vcombine.high %v728_v28, %v728_v28  ;;  %v7033_v33 = vpack.c.bf16 %v728_v28, %v728_v28 }
 0x25f   : > { %v7030_v32 = vpack.c.bf16 %v729_v29, %v729_v29 }
 0x260   : > { %798 = vrot.lane.b32.xlu0 %v7020_v26, %s6497_s25  ;;  %v7036_v34 = vpack.c.bf16 %v730_v31, %v730_v31 }
 0x262   : > { %896 = vrot.lane.b32.xlu1 %v7023_v27, %s6497_s25 }
 0x264   : > { %945 = vrot.lane.b32.xlu0 %v7027_v30, %s6497_s25 }
 0x266   : > { %994 = vrot.lane.b32.xlu1 %v7030_v32, %s6497_s25 }
 0x268   : > { %1043 = vrot.lane.b32.xlu0 %v7033_v33, %s6497_s25 }
 0x26a   : > { %1092 = vrot.lane.b32.xlu1 %v7036_v34, %s6497_s25  ;;  %s6506_s25 = smov 104  }
 0x26c   : > { %1287 = vrot.lane.b32.xlu0 %v7020_v26, %s6498_s15 }
 0x26e   : > { %1237 = vrot.lane.b32.xlu1 %v7014_v21, %s6498_s15 }
 0x272   : > { %1335 = vrot.lane.b32.xlu1 %v7016_v23, %s6498_s15 }
 0x276   : > { %1383 = vrot.lane.b32.xlu1 %v7023_v27, %s6498_s15 }
 0x2ce   : > { %v749_v35 = vpop.permute.xlu0 %748 }
 0x2cf   : > { %v755_v36 = vsel %vm750_vm2, %v749_v35, 0 }
 0x2d0   : > { %5274 = vmatpush3.bf16.xpose.msra.mxu1 %v755_v36  ;;  %v848_v37 = vpop.permute.xlu1 %847 }
 0x2d1   : > { %5285 = vmatprep.subr.bf16.mxu1 %v6494_v0  ;;  %v853_v40 = vsel %vm750_vm2, %v848_v37, 0 }
 0x2d2   : > { %v799_v38 = vpop.permute.xlu0 %798 }
 0x2d3   : > { %v804_v39 = vsel %vm750_vm2, %v799_v38, 0 }
 0x2d4   : > { %5280 = vmatpush3.bf16.xpose.msra.mxu0 %v804_v39  ;;  %v897_v41 = vpop.permute.xlu1 %896 }
 0x2d5   : > { %5291 = vmatprep.subr.bf16.mxu0 %v6494_v0  ;;  %v902_v42 = vsel %vm750_vm2, %v897_v41, 0 }
 0x2d6   : > { %v946_v43 = vpop.permute.xlu0 %945 }
 0x2d7   : > { %5276 = vmatmul.mubr.msk.bf16.vlgmr.msra.gmra.mrb[0].mxu1 %vm750_vm2, %v7014_v21  ;;  %v951_v44 = vsel %vm750_vm2, %v946_v43, 0 }
 0x2d8   : > { %5286 = vmatpush3.bf16.xpose.msra.mxu1 %v853_v40  ;;  %5287 = vmatprep.mubr.msk.bf16.mxu1 %vm6495_vm0, %v6494_v0  ;;  %v995_v45 = vpop.permute.xlu1 %994 }
 0x2d9   : > { %5297 = vmatprep.subr.bf16.mxu1 %v6494_v0  ;;  %v1000_v46 = vsel %vm750_vm2, %v995_v45, 0 }
 0x2da   : > { %v1044_v47 = vpop.permute.xlu0 %1043 }
 0x2db   : > { %5282 = vmatmul.mubr.msk.bf16.vlgmr.msra.gmra.mrb[4].mxu0 %vm750_vm2, %v7020_v26  ;;  %v1049_v49 = vsel %vm750_vm2, %v1044_v47, 0 }
 0x2dc   : > { %5292 = vmatpush3.bf16.xpose.msra.mxu0 %v902_v42  ;;  %5293 = vmatprep.mubr.msk.bf16.mxu0 %vm6495_vm0, %v6494_v0  ;;  %v1093_v48 = vpop.permute.xlu1 %1092 }
 0x2dd   : > { %5303 = vmatprep.subr.bf16.mxu0 %v6494_v0  ;;  %v1098_v50 = vsel %vm750_vm2, %v1093_v48, 0 }
 0x2de   : > { %v1288_v53 = vpop.permute.xlu0 %1287 }
 0x2df   : > { %5288 = vmatmul.mubr.msk.bf16.vlgmr.msra.gmra.mrb[4].mxu1 %vm750_vm2, %v7016_v23  ;;  %v1293_v54 = vsel %vm1243_vm3, %v1288_v53, 0 }
 0x2e0   : > { %5298 = vmatpush3.bf16.xpose.msra.mxu1 %v951_v44  ;;  %5299 = vmatprep.mubr.msk.bf16.mxu1 %vm6495_vm0, %v6494_v0  ;;  %v1238_v51 = vpop.permute.xlu1 %1237 }
 0x2e1   : > { %5309 = vmatprep.subr.bf16.mxu1 %v6494_v0  ;;  %v1245_v52 = vsel %vm1243_vm3, %v1238_v51, 0 }
 0x2e3   : > { %5294 = vmatmul.mubr.msk.bf16.vlgmr.msra.gmra.mrb[8].mxu0 %vm750_vm2, %v7023_v27 }
 0x2e4   : > { %5304 = vmatpush3.bf16.xpose.msra.mxu0 %v1000_v46  ;;  %5305 = vmatprep.mubr.msk.bf16.mxu0 %vm6495_vm0, %v6494_v0  ;;  %v7115_v41 = vpop.permute.xlu1 %1335 }
 0x2e5   : > { %5315 = vmatprep.subr.bf16.mxu0 %v6494_v0 }
 0x2e7   : > { %5300 = vmatmul.mubr.msk.bf16.vlgmr.msra.gmra.mrb[8].mxu1 %vm750_vm2, %v7027_v30 }
 0x2e8   : > { %5310 = vmatpush3.bf16.xpose.msra.mxu1 %v1049_v49  ;;  %5311 = vmatprep.mubr.msk.bf16.mxu1 %vm6495_vm0, %v6494_v0  ;;  %v7117_v42 = vpop.permute.xlu1 %1383 }
 0x2e9   : > { %5321 = vmatprep.subr.bf16.mxu1 %v6494_v0 }
 0x2eb   : > { %5306 = vmatmul.mubr.msk.bf16.vlgmr.msra.gmra.mrb[12].mxu0 %vm750_vm2, %v7030_v32 }
 0x2ec   : > { %5316 = vmatpush3.bf16.xpose.msra.mxu0 %v1098_v50  ;;  %5317 = vmatprep.mubr.msk.bf16.mxu0 %vm6495_vm0, %v6494_v0 }
 0x2ed   : > { %5327 = vmatprep.subr.bf16.mxu0 %v6494_v0 }
 0x2ef   : > { %5312 = vmatmul.mubr.msk.bf16.vlgmr.msra.gmra.mrb[12].mxu1 %vm750_vm2, %v7033_v33 }
 0x2f0   : > { %5322 = vmatpush3.bf16.msra.mxu1 %v1245_v52  ;;  %5323 = vmatprep.mubr.msk.bf16.mxu1 %vm6495_vm0, %v6494_v0 }
 0x2f1   : > { %5333 = vmatprep.subr.bf16.mxu1 %v6494_v0 }
 0x2f3   : > { %5318 = vmatmul.mubr.msk.bf16.vlgmr.msra.gmra.mrb[16].mxu0 %vm750_vm2, %v7036_v34 }
 0x2f4   : > { %5328 = vmatpush3.bf16.msra.mxu0 %v1293_v54  ;;  %5329 = vmatprep.mubr.msk.bf16.mxu0 %vm6495_vm0, %v6494_v0 }
 0x2f5   : > { %5339 = vmatprep.subr.bf16.mxu0 %v6494_v0 }
 0x3aa   : > { %v791_v55 = vpop.f32.mrb[0].mxu1 }
 0x3ab   : > { %v5277_v56 = vpop.f32.mrb[1].mxu1  ;;  %v1141_v57 = vsel %vm1140_vm4, %v791_v55, -inf }
 0x3ac   : > { %v794_v58 = vpop.f32.mrb[2].mxu1  ;;  %1142 = vmax.xlane.f32.xlu0 %v1141_v57 }
 0x3ad   : > { %v5278_v59 = vpop.f32.mrb[3].mxu1 }
 0x3ae   : > { %v840_v60 = vpop.f32.mrb[4].mxu0 }
 0x3af   : > { %v5283_v61 = vpop.f32.mrb[5].mxu0  ;;  %v1144_v62 = vsel %vm1140_vm4, %v840_v60, -inf }
 0x3b0   : > { %1145 = vmax.xlane.f32.xlu1 %v1144_v62  ;;  %v843_v63 = vpop.f32.mrb[6].mxu0 }
 0x3b1   : > { %v5284_v1 = vpop.f32.mrb[7].mxu0 }
 0x3b2   : > { %v889_v2 = vpop.f32.mrb[4].mxu1 }
 0x3b3   : > { %v5289_v3 = vpop.f32.mrb[5].mxu1  ;;  %v1147_v4 = vsel %vm1140_vm4, %v889_v2, -inf }
 0x3b4   : > { %v892_v5 = vpop.f32.mrb[6].mxu1  ;;  %1148 = vmax.xlane.f32.xlu0 %v1147_v4 }
 0x3b5   : > { %v5290_v6 = vpop.f32.mrb[7].mxu1 }
 0x3b6   : > { %v938_v7 = vpop.f32.mrb[8].mxu0 }
 0x3b7   : > { %v5295_v8 = vpop.f32.mrb[9].mxu0  ;;  %v1150_v9 = vsel %vm1140_vm4, %v938_v7, -inf }
 0x3b8   : > { %1151 = vmax.xlane.f32.xlu0 %v1150_v9  ;;  %v941_v11 = vpop.f32.mrb[10].mxu0 }
 0x3b9   : > { %v5296_v12 = vpop.f32.mrb[11].mxu0 }
 0x3ba   : > { %v987_v13 = vpop.f32.mrb[8].mxu1 }
 0x3bb   : > { %v5301_v14 = vpop.f32.mrb[9].mxu1  ;;  %v1153_v15 = vsel %vm1140_vm4, %v987_v13, -inf }
 0x3bc   : > { %v990_v16 = vpop.f32.mrb[10].mxu1  ;;  %1154 = vmax.xlane.f32.xlu1 %v1153_v15 }
 0x3bd   : > { %v5302_v17 = vpop.f32.mrb[11].mxu1 }
 0x3be   : > { %v1036_v18 = vpop.f32.mrb[12].mxu0 }
 0x3bf   : > { %v5307_v19 = vpop.f32.mrb[13].mxu0  ;;  %v1156_v20 = vsel %vm1140_vm4, %v1036_v18, -inf }
 0x3c0   : > { %1157 = vmax.xlane.f32.xlu0 %v1156_v20  ;;  %v1039_v22 = vpop.f32.mrb[14].mxu0 }
 0x3c1   : > { %v5308_v24 = vpop.f32.mrb[15].mxu0 }
 0x3c2   : > { %v7106_v25 = vpop.f32.mrb[12].mxu1 }
 0x3c3   : > { %v5313_v28 = vpop.f32.mrb[13].mxu1  ;;  %v1159_v29 = vsel %vm1140_vm4, %v7106_v25, -inf }
 0x3c4   : > { %v1088_v31 = vpop.f32.mrb[14].mxu1  ;;  %1160 = vmax.xlane.f32.xlu1 %v1159_v29 }
 0x3c5   : > { %v5314_v35 = vpop.f32.mrb[15].mxu1 }
 0x3c6   : > { %v1134_v36 = vpop.f32.mrb[16].mxu0 }
 0x3c7   : > { %v5319_v37 = vpop.f32.mrb[17].mxu0  ;;  %v1162_v38 = vsel %vm1140_vm4, %v1134_v36, -inf }
 0x3c8   : > { %1163 = vmax.xlane.f32.xlu0 %v1162_v38  ;;  %v1137_v39 = vpop.f32.mrb[18].mxu0 }
 0x3c9   : > { %v5320_v40 = vpop.f32.mrb[19].mxu0  ;;  %v1341_v39 = vsel %vm1243_vm3, %v7115_v41, 0 }
 0x3d5   : > { %1479 = vrot.lane.b32.xlu1 %v7030_v32, %s6498_s15 }
 0x3de   : > { %1431 = vrot.lane.b32.xlu0 %v7027_v30, %s6498_s15 }
 0x439   : > { %v1143_v43 = vpop.xlane.xlu0 %1142 }
 0x43a   : > { %v1165_v44 = vsub.f32 %v791_v55, %v1143_v43 }
 0x43c   : > { %v1173_v45 = vmul.f32 1.442695, %v1165_v44 }
 0x43d   : > { %v1146_v46 = vpop.xlane.xlu1 %1145 }
 0x43e   : > { %5884 = vpow2.f32 %v1173_v45  ;;  %v1166_v47 = vsub.f32 %v840_v60, %v1146_v46  ;;  %v1389_v46 = vsel %vm1243_vm3, %v7117_v42, 0 }
 0x440   : > { %v1175_v48 = vmul.f32 1.442695, %v1166_v47 }
 0x441   : > { %v1149_v49 = vpop.xlane.xlu0 %1148 }
 0x442   : > { %5886 = vpow2.f32 %v1175_v48  ;;  %v1167_v50 = vsub.f32 %v889_v2, %v1149_v49 }
 0x444   : > { %v1177_v51 = vmul.f32 1.442695, %v1167_v50 }
 0x445   : > { %v1152_v52 = vpop.xlane.xlu0 %1151 }
 0x446   : > { %5888 = vpow2.f32 %v1177_v51  ;;  %v1168_v53 = vsub.f32 %v938_v7, %v1152_v52 }
 0x448   : > { %v7119_v54 = vpop.eup %5884  ;;  %v1179_v56 = vmul.f32 1.442695, %v1168_v53 }
 0x449   : > { %v1155_v57 = vpop.xlane.xlu1 %1154  ;;  %v1189_v58 = vsel %vm1140_vm4, %v7119_v54, 0.0 }
 0x44a   : > { %5890 = vpow2.f32 %v1179_v56  ;;  %v1169_v55 = vsub.f32 %v987_v13, %v1155_v57  ;;  %1190 = vadd.xlane.f32.xlu1 %v1189_v58 }
 0x44c   : > { %v7123_v59 = vpop.eup %5886  ;;  %v1181_v60 = vmul.f32 1.442695, %v1169_v55 }
 0x44d   : > { %v1158_v61 = vpop.xlane.xlu0 %1157  ;;  %v1192_v62 = vsel %vm1140_vm4, %v7123_v59, 0.0 }
 0x44e   : > { %5892 = vpow2.f32 %v1181_v60  ;;  %v1170_v63 = vsub.f32 %v1036_v18, %v1158_v61  ;;  %1193 = vadd.xlane.f32.xlu0 %v1192_v62 }
 0x450   : > { %v7127_v1 = vpop.eup %5888  ;;  %v1183_v2 = vmul.f32 1.442695, %v1170_v63 }
 0x451   : > { %v1195_v3 = vsel %vm1140_vm4, %v7127_v1, 0.0  ;;  %v1161_v11 = vpop.xlane.xlu1 %1160 }
 0x452   : > { %5894 = vpow2.f32 %v1183_v2  ;;  %1196 = vadd.xlane.f32.xlu1 %v1195_v3  ;;  %v1171_v12 = vsub.f32 %v7106_v25, %v1161_v11 }
 0x454   : > { %v7131_v4 = vpop.eup %5890  ;;  %v1185_v14 = vmul.f32 1.442695, %v1171_v12 }
 0x455   : > { %v1198_v5 = vsel %vm1140_vm4, %v7131_v4, 0.0  ;;  %v1164_v13 = vpop.xlane.xlu0 %1163  ;;  %v1480_v22 = vpop.permute.xlu1 %1479 }
 0x456   : > { %1199 = vadd.xlane.f32.xlu0 %v1198_v5  ;;  %v1172_v15 = vsub.f32 %v1134_v36, %v1164_v13  ;;  %5896 = vpow2.f32 %v1185_v14  ;;  %v1485_v53 = vsel %vm1243_vm3, %v1480_v22, 0 }
 0x458   : > { %v7135_v6 = vpop.eup %5892  ;;  %v1187_v16 = vmul.f32 1.442695, %v1172_v15 }
 0x459   : > { %v1201_v7 = vsel %vm1140_vm4, %v7135_v6, 0.0  ;;  %v1432_v24 = vpop.permute.xlu0 %1431 }
 0x45a   : > { %1202 = vadd.xlane.f32.xlu1 %v1201_v7  ;;  %5898 = vpow2.f32 %v1187_v16  ;;  %v1437_v50 = vsel %vm1243_vm3, %v1432_v24, 0 }
 0x45c   : > { %v7139_v8 = vpop.eup %5894 }
 0x45d   : > { %v1204_v9 = vsel %vm1140_vm4, %v7139_v8, 0.0 }
 0x45e   : > { %1205 = vadd.xlane.f32.xlu0 %v1204_v9 }
 0x460   : > { %v7148_v17 = vpop.eup %5896 }
 0x461   : > { %v1207_v18 = vsel %vm1140_vm4, %v7148_v17, 0.0 }
 0x464   : > { %v7152_v19 = vpop.eup %5898 }
 0x465   : > { %v1210_v20 = vsel %vm1140_vm4, %v7152_v19, 0.0 }
 0x46b   : > { %1575 = vrot.lane.b32.xlu1 %v7036_v34, %s6498_s15 }
 0x474   : > { %1527 = vrot.lane.b32.xlu0 %v7033_v33, %s6498_s15 }
 0x48f   : > { %1208 = vadd.xlane.f32.xlu1 %v1207_v18 }
 0x493   : > { %1211 = vadd.xlane.f32.xlu0 %v1210_v20 }
 0x4a0   : > { %1721 = vrot.lane.b32.xlu1 %v7020_v26, %s6499_s22 }
 0x4a4   : > { %1719 = vrot.lane.b32.xlu1 %v7020_v26, %s6500_s24 }
 0x4a8   : > { %1821 = vrot.lane.b32.xlu1 %v7023_v27, %s6499_s22 }
 0x4a9   : > { %1671 = vrot.lane.b32.xlu0 %v7014_v21, %s6499_s22 }
 0x4ac   : > { %1819 = vrot.lane.b32.xlu1 %v7023_v27, %s6500_s24 }
 0x4ad   : > { %1669 = vrot.lane.b32.xlu0 %v7014_v21, %s6500_s24 }
 0x4b0   : > { %1921 = vrot.lane.b32.xlu1 %v7030_v32, %s6499_s22 }
 0x4b1   : > { %1771 = vrot.lane.b32.xlu0 %v7016_v23, %s6499_s22 }
 0x4b4   : > { %1919 = vrot.lane.b32.xlu1 %v7030_v32, %s6500_s24 }
 0x4b5   : > { %1769 = vrot.lane.b32.xlu0 %v7016_v23, %s6500_s24 }
 0x4b8   : > { %2021 = vrot.lane.b32.xlu1 %v7036_v34, %s6499_s22 }
 0x4b9   : > { %1871 = vrot.lane.b32.xlu0 %v7027_v30, %s6499_s22 }
 0x4bc   : > { %2019 = vrot.lane.b32.xlu1 %v7036_v34, %s6500_s24 }
 0x4bd   : > { %1869 = vrot.lane.b32.xlu0 %v7027_v30, %s6500_s24 }
 0x4c0   : > { %2165 = vrot.lane.b32.xlu1 %v7014_v21, %s6501_s29 }
 0x4c1   : > { %1971 = vrot.lane.b32.xlu0 %v7033_v33, %s6499_s22  ;;  %s6507_s22 = smov 40  }
 0x4c4   : > { %2261 = vrot.lane.b32.xlu1 %v7016_v23, %s6501_s29 }
 0x4c5   : > { %1969 = vrot.lane.b32.xlu0 %v7033_v33, %s6500_s24  ;;  %s6508_s24 = smov 16  }
 0x4c8   : > { %2309 = vrot.lane.b32.xlu1 %v7023_v27, %s6501_s29 }
 0x4c9   : > { %2213 = vrot.lane.b32.xlu0 %v7020_v26, %s6501_s29 }
 0x4d7   : > { %v1191_v25 = vpop.xlane.xlu1 %1190 }
 0x4d8   : > { %5900 = vrcp.f32 %v1191_v25 }
 0x4db   : > { %v1194_v28 = vpop.xlane.xlu0 %1193 }
 0x4dc   : > { %5902 = vrcp.f32 %v1194_v28 }
 0x4df   : > { %v1197_v29 = vpop.xlane.xlu1 %1196 }
 0x4e0   : > { %5904 = vrcp.f32 %v1197_v29 }
 0x4e2   : > { %v5901_v31 = vpop.eup %5900 }
 0x4e3   : > { %v1200_v35 = vpop.xlane.xlu0 %1199  ;;  %v1221_v36 = vmul.f32 %v5901_v31, %v7119_v54 }
 0x4e4   : > { %5906 = vrcp.f32 %v1200_v35 }
 0x4e5   : > { %v1229_v37 = vpack.c.bf16 %v1221_v36, %v1221_v36 }
 0x4e6   : > { %v5903_v38 = vpop.eup %5902 }
 0x4e7   : > { %5324 = vmatmul.mubr.msk.bf16.vlgmr.msra.gmra.mrb[16].mxu1 %vm1239_vm5, %v1229_v37  ;;  %v1203_v40 = vpop.xlane.xlu1 %1202  ;;  %v1222_v43 = vmul.f32 %v5903_v38, %v7123_v59 }
 0x4e8   : > { %5334 = vmatpush3.bf16.msra.mxu1 %v1341_v39  ;;  %5908 = vrcp.f32 %v1203_v40  ;;  %5335 = vmatprep.mubr.msk.bf16.mxu1 %vm6495_vm0, %v6494_v0 }
 0x4e9   : > { %v1230_v44 = vpack.c.bf16 %v1222_v43, %v1222_v43  ;;  %5345 = vmatprep.subr.bf16.mxu1 %v6494_v0 }
 0x4ea   : > { %v5905_v45 = vpop.eup %5904 }
 0x4eb   : > { %5330 = vmatmul.mubr.msk.bf16.vlgmr.msra.gmra.mrb[20].mxu0 %vm1239_vm5, %v1230_v44  ;;  %v1206_v41 = vpop.xlane.xlu0 %1205  ;;  %v1223_v47 = vmul.f32 %v5905_v45, %v7127_v1  ;;  %v1576_v60 = vpop.permute.xlu1 %1575 }
 0x4ec   : > { %5340 = vmatpush3.bf16.msra.mxu0 %v1389_v46  ;;  %5910 = vrcp.f32 %v1206_v41  ;;  %5341 = vmatprep.mubr.msk.bf16.mxu0 %vm6495_vm0, %v6494_v0  ;;  %v1581_v62 = vsel %vm1243_vm3, %v1576_v60, 0 }
 0x4ed   : > { %v1231_v48 = vpack.c.bf16 %v1223_v47, %v1223_v47  ;;  %5351 = vmatprep.subr.bf16.mxu0 %v6494_v0 }
 0x4ee   : > { %v5907_v49 = vpop.eup %5906 }
 0x4ef   : > { %5336 = vmatmul.mubr.msk.bf16.vlgmr.msra.gmra.mrb[20].mxu1 %vm1239_vm5, %v1231_v48  ;;  %v1224_v42 = vmul.f32 %v5907_v49, %v7131_v4  ;;  %v1528_v56 = vpop.permute.xlu0 %1527 }
 0x4f0   : > { %5346 = vmatpush3.bf16.msra.mxu1 %v1437_v50  ;;  %5347 = vmatprep.mubr.msk.bf16.mxu1 %vm6495_vm0, %v6494_v0  ;;  %v1533_v55 = vsel %vm1243_vm3, %v1528_v56, 0 }
 0x4f1   : > { %v1232_v51 = vpack.c.bf16 %v1224_v42, %v1224_v42  ;;  %5357 = vmatprep.subr.bf16.mxu1 %v6494_v0 }
 0x4f2   : > { %v5909_v52 = vpop.eup %5908 }
 0x4f3   : > { %5342 = vmatmul.mubr.msk.bf16.vlgmr.msra.gmra.mrb[24].mxu0 %vm1239_vm5, %v1232_v51  ;;  %v1225_v54 = vmul.f32 %v5909_v52, %v7135_v6 }
 0x4f4   : > { %5352 = vmatpush3.bf16.msra.mxu0 %v1485_v53  ;;  %5353 = vmatprep.mubr.msk.bf16.mxu0 %vm6495_vm0, %v6494_v0 }
 0x4f5   : > { %v1233_v57 = vpack.c.bf16 %v1225_v54, %v1225_v54  ;;  %5363 = vmatprep.subr.bf16.mxu0 %v6494_v0 }
 0x4f6   : > { %v5911_v58 = vpop.eup %5910 }
 0x4f7   : > { %5348 = vmatmul.mubr.msk.bf16.vlgmr.msra.gmra.mrb[24].mxu1 %vm1239_vm5, %v1233_v57  ;;  %v1226_v59 = vmul.f32 %v5911_v58, %v7139_v8 }
 0x4f8   : > { %5358 = vmatpush3.bf16.msra.mxu1 %v1533_v55  ;;  %5359 = vmatprep.mubr.msk.bf16.mxu1 %vm6495_vm0, %v6494_v0 }
 0x4f9   : > { %v1234_v61 = vpack.c.bf16 %v1226_v59, %v1226_v59  ;;  %5369 = vmatprep.subr.bf16.mxu1 %v6494_v0 }
 0x4fb   : > { %5354 = vmatmul.mubr.msk.bf16.vlgmr.msra.gmra.mrb[28].mxu0 %vm1239_vm5, %v1234_v61 }
 0x4fc   : > { %5364 = vmatpush3.bf16.msra.mxu0 %v1581_v62  ;;  %5365 = vmatprep.mubr.msk.bf16.mxu0 %vm6495_vm0, %v6494_v0 }
 0x4fd   : > { %5375 = vmatprep.subr.bf16.mxu0 %v6494_v0 }
 0x51c   : > { %v1209_v63 = vpop.xlane.xlu1 %1208 }
 0x51d   : > { %5912 = vrcp.f32 %v1209_v63 }
 0x520   : > { %v1722_v1 = vpop.permute.xlu1 %1721  ;;  %v1212_v2 = vpop.xlane.xlu0 %1211 }
 0x521   : > { %5914 = vrcp.f32 %v1212_v2  ;;  %v1727_v18 = vsel %vm750_vm2, %v1722_v1, 0 }
 0x524   : > { %v1720_v3 = vpop.permute.xlu1 %1719  ;;  %v1672_v4 = vpop.permute.xlu0 %1671 }
 0x525   : > { %v1677_v12 = vsel %vm750_vm2, %v1672_v4, 0 }
 0x527   : > { %v5913_v5 = vpop.eup %5912 }
 0x528   : > { %v1822_v6 = vpop.permute.xlu1 %1821  ;;  %v1670_v7 = vpop.permute.xlu0 %1669  ;;  %v1227_v8 = vmul.f32 %v5913_v5, %v7148_v17 }
 0x529   : > { %v1827_v25 = vsel %vm750_vm2, %v1822_v6, 0 }
 0x52a   : > { %v1235_v9 = vpack.c.bf16 %v1227_v8, %v1227_v8 }
 0x52b   : > { %v5915_v11 = vpop.eup %5914 }
 0x52c   : > { %v1820_v13 = vpop.permute.xlu1 %1819  ;;  %5360 = vmatmul.mubr.msk.bf16.vlgmr.msra.gmra.mrb[28].mxu1 %vm1239_vm5, %v1235_v9  ;;  %v1772_v14 = vpop.permute.xlu0 %1771  ;;  %v1228_v15 = vmul.f32 %v5915_v11, %v7152_v19 }
 0x52d   : > { %5370 = vmatpush3.bf16.xpose.msra.mxu1 %v1677_v12  ;;  %5371 = vmatprep.mubr.msk.bf16.mxu1 %vm6495_vm0, %v6494_v0  ;;  %v1777_v19 = vsel %vm750_vm2, %v1772_v14, 0 }
 0x52e   : > { %v1236_v16 = vpack.c.bf16 %v1228_v15, %v1228_v15  ;;  %5381 = vmatprep.subr.bf16.mxu1 %v6494_v0 }
 0x530   : > { %5366 = vmatmul.mubr.msk.bf16.vlgmr.msra.gmra.mrb[32].mxu0 %vm1239_vm5, %v1236_v16  ;;  %v1770_v17 = vpop.permute.xlu0 %1769  ;;  %v1922_v20 = vpop.permute.xlu1 %1921 }
 0x531   : > { %5376 = vmatpush3.bf16.xpose.msra.mxu0 %v1727_v18  ;;  %5377 = vmatprep.mubr.msk.bf16.mxu0 %vm6495_vm0, %v6494_v0  ;;  %v1927_v35 = vsel %vm750_vm2, %v1922_v20, 0 }
 0x532   : > { %5387 = vmatprep.subr.bf16.mxu0 %v6494_v0 }
 0x534   : > { %5372 = vmatmul.mubr.msk.bf16.vlgmr.msra.gmra.mrb[32].mxu1 %vm750_vm2, %v1670_v7  ;;  %v1872_v22 = vpop.permute.xlu0 %1871  ;;  %v1920_v24 = vpop.permute.xlu1 %1919 }
 0x535   : > { %5382 = vmatpush3.bf16.xpose.msra.mxu1 %v1777_v19  ;;  %5383 = vmatprep.mubr.msk.bf16.mxu1 %vm6495_vm0, %v6494_v0  ;;  %v1877_v29 = vsel %vm750_vm2, %v1872_v22, 0 }
 0x536   : > { %5393 = vmatprep.subr.bf16.mxu1 %v6494_v0 }
 0x538   : > { %5378 = vmatmul.mubr.msk.bf16.vlgmr.msra.gmra.mrb[36].mxu0 %vm750_vm2, %v1720_v3  ;;  %v1870_v28 = vpop.permute.xlu0 %1869  ;;  %v2022_v31 = vpop.permute.xlu1 %2021 }
 0x539   : > { %5388 = vmatpush3.bf16.xpose.msra.mxu0 %v1827_v25  ;;  %5389 = vmatprep.mubr.msk.bf16.mxu0 %vm6495_vm0, %v6494_v0  ;;  %v2027_v40 = vsel %vm750_vm2, %v2022_v31, 0 }
 0x53a   : > { %5399 = vmatprep.subr.bf16.mxu0 %v6494_v0 }
 0x53c   : > { %5384 = vmatmul.mubr.msk.bf16.vlgmr.msra.gmra.mrb[36].mxu1 %vm750_vm2, %v1770_v17  ;;  %v1972_v36 = vpop.permute.xlu0 %1971  ;;  %v2020_v37 = vpop.permute.xlu1 %2019 }
 0x53d   : > { %5394 = vmatpush3.bf16.xpose.msra.mxu1 %v1877_v29  ;;  %5395 = vmatprep.mubr.msk.bf16.mxu1 %vm6495_vm0, %v6494_v0  ;;  %v1977_v38 = vsel %vm750_vm2, %v1972_v36, 0 }
 0x53e   : > { %5405 = vmatprep.subr.bf16.mxu1 %v6494_v0 }
 0x540   : > { %5390 = vmatmul.mubr.msk.bf16.vlgmr.msra.gmra.mrb[40].mxu0 %vm750_vm2, %v1820_v13  ;;  %v1970_v39 = vpop.permute.xlu0 %1969  ;;  %v2166_v43 = vpop.permute.xlu1 %2165 }
 0x541   : > { %5400 = vmatpush3.bf16.xpose.msra.mxu0 %v1927_v35  ;;  %5401 = vmatprep.mubr.msk.bf16.mxu0 %vm6495_vm0, %v6494_v0  ;;  %v2171_v44 = vsel %vm1243_vm3, %v2166_v43, 0 }
 0x542   : > { %5411 = vmatprep.subr.bf16.mxu0 %v6494_v0 }
 0x544   : > { %5396 = vmatmul.mubr.msk.bf16.vlgmr.msra.gmra.mrb[40].mxu1 %vm750_vm2, %v1870_v28  ;;  %v2214_v45 = vpop.permute.xlu0 %2213 }
 0x545   : > { %5406 = vmatpush3.bf16.xpose.msra.mxu1 %v1977_v38  ;;  %5407 = vmatprep.mubr.msk.bf16.mxu1 %vm6495_vm0, %v6494_v0  ;;  %v2219_v46 = vsel %vm1243_vm3, %v2214_v45, 0 }
 0x546   : > { %5417 = vmatprep.subr.bf16.mxu1 %v6494_v0 }
 0x548   : > { %5402 = vmatmul.mubr.msk.bf16.vlgmr.msra.gmra.mrb[44].mxu0 %vm750_vm2, %v1920_v24 }
 0x549   : > { %5412 = vmatpush3.bf16.xpose.msra.mxu0 %v2027_v40  ;;  %5413 = vmatprep.mubr.msk.bf16.mxu0 %vm6495_vm0, %v6494_v0 }
 0x54a   : > { %5423 = vmatprep.subr.bf16.mxu0 %v6494_v0 }
 0x54c   : > { %5408 = vmatmul.mubr.msk.bf16.vlgmr.msra.gmra.mrb[44].mxu1 %vm750_vm2, %v1970_v39 }
 0x54d   : > { %5418 = vmatpush3.bf16.msra.mxu1 %v2171_v44  ;;  %5419 = vmatprep.mubr.msk.bf16.mxu1 %vm6495_vm0, %v6494_v0 }
 0x54e   : > { %5429 = vmatprep.subr.bf16.mxu1 %v6494_v0 }
 0x550   : > { %5414 = vmatmul.mubr.msk.bf16.vlgmr.msra.gmra.mrb[48].mxu0 %vm750_vm2, %v2020_v37 }
 0x551   : > { %5424 = vmatpush3.bf16.msra.mxu0 %v2219_v46  ;;  %5425 = vmatprep.mubr.msk.bf16.mxu0 %vm6495_vm0, %v6494_v0 }
 0x552   : > { %5435 = vmatprep.subr.bf16.mxu0 %v6494_v0 }
 0x5ba   : > { %v1281_v41 = vpop.f32.mrb[16].mxu1 }
 0x5bb   : > { %v5325_v47 = vpop.f32.mrb[17].mxu1 }
 0x5bc   : > { %v1284_v48 = vpop.f32.mrb[18].mxu1 }
 0x5bd   : > { %v5326_v49 = vpop.f32.mrb[19].mxu1 }
 0x5be   : > { %v1329_v50 = vpop.f32.mrb[20].mxu0 }
 0x5bf   : > { %v1631_v42 = vcombine.low %v1281_v41, %v1329_v50  ;;  %v5331_v51 = vpop.f32.mrb[21].mxu0 }
 0x5c0   : > { %v1332_v52 = vpop.f32.mrb[22].mxu0 }
 0x5c1   : > { %v5332_v53 = vpop.f32.mrb[23].mxu0  ;;  %v1639_v62 = vrot.slane %v1631_v42, %v7010_v10 }
 0x5c2   : > { %v1377_v54 = vpop.f32.mrb[20].mxu1 }
 0x5c3   : > { %v5337_v56 = vpop.f32.mrb[21].mxu1 }
 0x5c4   : > { %v1380_v57 = vpop.f32.mrb[22].mxu1 }
 0x5c5   : > { %v5338_v58 = vpop.f32.mrb[23].mxu1 }
 0x5c6   : > { %v1425_v55 = vpop.f32.mrb[24].mxu0 }
 0x5c7   : > { %v1632_v59 = vcombine.low %v1377_v54, %v1425_v55  ;;  %v5343_v60 = vpop.f32.mrb[25].mxu0 }
 0x5c8   : > { %v1428_v61 = vpop.f32.mrb[26].mxu0 }
 0x5c9   : > { %v1646_v63 = vrot.slane %v1632_v59, %v7010_v10  ;;  %v5344_v1 = vpop.f32.mrb[27].mxu0 }
 0x5ca   : > { %v1473_v2 = vpop.f32.mrb[24].mxu1 }
 0x5cb   : > { %v1647_v3 = vcombine.low %v1639_v62, %v1646_v63  ;;  %v5349_v4 = vpop.f32.mrb[25].mxu1 }
 0x5cc   : > { %v1476_v5 = vpop.f32.mrb[26].mxu1 }
 0x5cd   : > { %v5350_v6 = vpop.f32.mrb[27].mxu1 }
 0x5ce   : > { %v1521_v7 = vpop.f32.mrb[28].mxu0 }
 0x5cf   : > { %v1648_v8 = vcombine.low %v1473_v2, %v1521_v7  ;;  %v5355_v9 = vpop.f32.mrb[29].mxu0 }
 0x5d0   : > { %v1524_v11 = vpop.f32.mrb[30].mxu0 }
 0x5d1   : > { %v5356_v12 = vpop.f32.mrb[31].mxu0  ;;  %v1656_v22 = vrot.slane %v1648_v8, %v7010_v10 }
 0x5d2   : > { %v7290_v12 = vpop.permute.xlu1 %2261 }
 0x5ff   : > { %v1569_v13 = vpop.f32.mrb[28].mxu1 }
 0x600   : > { %v5361_v14 = vpop.f32.mrb[29].mxu1 }
 0x601   : > { %v1572_v15 = vpop.f32.mrb[30].mxu1 }
 0x602   : > { %v5362_v16 = vpop.f32.mrb[31].mxu1 }
 0x603   : > { %v1617_v18 = vpop.f32.mrb[32].mxu0 }
 0x604   : > { %v1649_v17 = vcombine.low %v1569_v13, %v1617_v18  ;;  %v5367_v20 = vpop.f32.mrb[33].mxu0  ;;  %v7292_v13 = vpop.permute.xlu1 %2309 }
 0x605   : > { %v1620_v19 = vpop.f32.mrb[34].mxu0 }
 0x606   : > { %v1663_v24 = vrot.slane %v1649_v17, %v7010_v10  ;;  %v5368_v25 = vpop.f32.mrb[35].mxu0 }
 0x607   : > { %v1713_v28 = vpop.f32.mrb[32].mxu1 }
 0x608   : > { %v1664_v29 = vcombine.low %v1656_v22, %v1663_v24  ;;  %v5373_v31 = vpop.f32.mrb[33].mxu1  ;;  %v2069_v35 = vsel %vm1140_vm4, %v1713_v28, -inf }
 0x609   : > { %2070 = vmax.xlane.f32.xlu0 %v2069_v35  ;;  %v1716_v36 = vpop.f32.mrb[34].mxu1 }
 0x60a   : > { %v1667_v37 = vpack.c.bf16 %v1664_v29, %v1647_v3  ;;  %v5374_v38 = vpop.f32.mrb[35].mxu1 }
 0x60b   : > { %v1763_v39 = vpop.f32.mrb[36].mxu0 }
 0x60c   : > { %1668 = vst.msk [vmem:[#allocation2] sm:$0xff] %vm750_vm2, %v1667_v37  ;;  %v5379_v40 = vpop.f32.mrb[37].mxu0  ;;  %v2072_v43 = vsel %vm1140_vm4, %v1763_v39, -inf }
 0x60d   : > { %2073 = vmax.xlane.f32.xlu1 %v2072_v43  ;;  %v1766_v44 = vpop.f32.mrb[38].mxu0 }
 0x60e   : > { %v5380_v45 = vpop.f32.mrb[39].mxu0 }
 0x60f   : > { %v1813_v46 = vpop.f32.mrb[36].mxu1 }
 0x610   : > { %v5385_v41 = vpop.f32.mrb[37].mxu1  ;;  %v2075_v47 = vsel %vm1140_vm4, %v1813_v46, -inf }
 0x611   : > { %2076 = vmax.xlane.f32.xlu0 %v2075_v47  ;;  %v1816_v48 = vpop.f32.mrb[38].mxu1 }
 0x612   : > { %v5386_v49 = vpop.f32.mrb[39].mxu1 }
 0x613   : > { %v1863_v50 = vpop.f32.mrb[40].mxu0 }
 0x614   : > { %v5391_v42 = vpop.f32.mrb[41].mxu0  ;;  %v2078_v51 = vsel %vm1140_vm4, %v1863_v50, -inf }
 0x615   : > { %2079 = vmax.xlane.f32.xlu0 %v2078_v51  ;;  %v1866_v52 = vpop.f32.mrb[42].mxu0 }
 0x616   : > { %v5392_v53 = vpop.f32.mrb[43].mxu0 }
 0x617   : > { %v1913_v54 = vpop.f32.mrb[40].mxu1 }
 0x618   : > { %v5397_v56 = vpop.f32.mrb[41].mxu1  ;;  %v2081_v57 = vsel %vm1140_vm4, %v1913_v54, -inf }
 0x619   : > { %v1916_v58 = vpop.f32.mrb[42].mxu1  ;;  %2082 = vmax.xlane.f32.xlu1 %v2081_v57 }
 0x61a   : > { %v5398_v55 = vpop.f32.mrb[43].mxu1 }
 0x61b   : > { %v1963_v59 = vpop.f32.mrb[44].mxu0 }
 0x61c   : > { %v5403_v60 = vpop.f32.mrb[45].mxu0  ;;  %v2084_v61 = vsel %vm1140_vm4, %v1963_v59, -inf }
 0x61d   : > { %2085 = vmax.xlane.f32.xlu0 %v2084_v61  ;;  %v1966_v62 = vpop.f32.mrb[46].mxu0 }
 0x61e   : > { %v5404_v63 = vpop.f32.mrb[47].mxu0 }
 0x61f   : > { %v7281_v1 = vpop.f32.mrb[44].mxu1 }
 0x620   : > { %v5409_v2 = vpop.f32.mrb[45].mxu1  ;;  %v2087_v3 = vsel %vm1140_vm4, %v7281_v1, -inf }
 0x621   : > { %v2016_v4 = vpop.f32.mrb[46].mxu1  ;;  %2088 = vmax.xlane.f32.xlu1 %v2087_v3 }
 0x622   : > { %v5410_v5 = vpop.f32.mrb[47].mxu1 }
 0x623   : > { %v2063_v6 = vpop.f32.mrb[48].mxu0 }
 0x624   : > { %v5415_v7 = vpop.f32.mrb[49].mxu0  ;;  %v2090_v8 = vsel %vm1140_vm4, %v2063_v6, -inf }
 0x625   : > { %2091 = vmax.xlane.f32.xlu0 %v2090_v8  ;;  %v2066_v9 = vpop.f32.mrb[50].mxu0 }
 0x626   : > { %v5416_v11 = vpop.f32.mrb[51].mxu0  ;;  %v2267_v9 = vsel %vm1243_vm3, %v7290_v12, 0 }
 0x632   : > { %2405 = vrot.lane.b32.xlu1 %v7030_v32, %s6501_s29 }
 0x63b   : > { %2357 = vrot.lane.b32.xlu0 %v7027_v30, %s6501_s29 }
 0x696   : > { %v2071_v14 = vpop.xlane.xlu0 %2070 }
 0x697   : > { %v2093_v15 = vsub.f32 %v1713_v28, %v2071_v14 }
 0x699   : > { %v2101_v16 = vmul.f32 1.442695, %v2093_v15 }
 0x69a   : > { %v2074_v18 = vpop.xlane.xlu1 %2073 }
 0x69b   : > { %5916 = vpow2.f32 %v2101_v16  ;;  %v2094_v17 = vsub.f32 %v1763_v39, %v2074_v18  ;;  %v2315_v18 = vsel %vm1243_vm3, %v7292_v13, 0 }
 0x69d   : > { %v2103_v20 = vmul.f32 1.442695, %v2094_v17 }
 0x69e   : > { %v2077_v19 = vpop.xlane.xlu0 %2076 }
 0x69f   : > { %5918 = vpow2.f32 %v2103_v20  ;;  %v2095_v22 = vsub.f32 %v1813_v46, %v2077_v19 }
 0x6a1   : > { %v2105_v24 = vmul.f32 1.442695, %v2095_v22 }
 0x6a2   : > { %v2080_v25 = vpop.xlane.xlu0 %2079 }
 0x6a3   : > { %5920 = vpow2.f32 %v2105_v24  ;;  %v2096_v29 = vsub.f32 %v1863_v50, %v2080_v25 }
 0x6a5   : > { %v7294_v31 = vpop.eup %5916  ;;  %v2107_v35 = vmul.f32 1.442695, %v2096_v29 }
 0x6a6   : > { %v2083_v36 = vpop.xlane.xlu1 %2082  ;;  %v2117_v37 = vsel %vm1140_vm4, %v7294_v31, 0.0 }
 0x6a7   : > { %5922 = vpow2.f32 %v2107_v35  ;;  %v2097_v28 = vsub.f32 %v1913_v54, %v2083_v36  ;;  %2118 = vadd.xlane.f32.xlu1 %v2117_v37 }
 0x6a9   : > { %v7298_v38 = vpop.eup %5918  ;;  %v2109_v39 = vmul.f32 1.442695, %v2097_v28 }
 0x6aa   : > { %v2086_v40 = vpop.xlane.xlu0 %2085  ;;  %v2120_v43 = vsel %vm1140_vm4, %v7298_v38, 0.0 }
 0x6ab   : > { %5924 = vpow2.f32 %v2109_v39  ;;  %v2098_v44 = vsub.f32 %v1963_v59, %v2086_v40  ;;  %2121 = vadd.xlane.f32.xlu0 %v2120_v43 }
 0x6ad   : > { %v7302_v45 = vpop.eup %5920  ;;  %v2111_v46 = vmul.f32 1.442695, %v2098_v44 }
 0x6ae   : > { %v2123_v41 = vsel %vm1140_vm4, %v7302_v45, 0.0  ;;  %v2089_v52 = vpop.xlane.xlu1 %2088 }
 0x6af   : > { %5926 = vpow2.f32 %v2111_v46  ;;  %2124 = vadd.xlane.f32.xlu1 %v2123_v41  ;;  %v2099_v53 = vsub.f32 %v7281_v1, %v2089_v52 }
 0x6b1   : > { %v7306_v47 = vpop.eup %5922  ;;  %v2113_v56 = vmul.f32 1.442695, %v2099_v53 }
 0x6b2   : > { %v2126_v48 = vsel %vm1140_vm4, %v7306_v47, 0.0  ;;  %v2092_v54 = vpop.xlane.xlu0 %2091  ;;  %v2406_v62 = vpop.permute.xlu1 %2405 }
 0x6b3   : > { %2127 = vadd.xlane.f32.xlu0 %v2126_v48  ;;  %v2100_v57 = vsub.f32 %v2063_v6, %v2092_v54  ;;  %5928 = vpow2.f32 %v2113_v56  ;;  %v2411_v29 = vsel %vm1243_vm3, %v2406_v62, 0 }
 0x6b5   : > { %v7310_v49 = vpop.eup %5924  ;;  %v2115_v58 = vmul.f32 1.442695, %v2100_v57 }
 0x6b6   : > { %v2129_v50 = vsel %vm1140_vm4, %v7310_v49, 0.0  ;;  %v2358_v63 = vpop.permute.xlu0 %2357 }
 0x6b7   : > { %2130 = vadd.xlane.f32.xlu1 %v2129_v50  ;;  %5930 = vpow2.f32 %v2115_v58  ;;  %v2363_v22 = vsel %vm1243_vm3, %v2358_v63, 0 }
 0x6b9   : > { %v7314_v42 = vpop.eup %5926 }
 0x6ba   : > { %v2132_v51 = vsel %vm1140_vm4, %v7314_v42, 0.0 }
 0x6bb   : > { %2133 = vadd.xlane.f32.xlu0 %v2132_v51 }
 0x6bd   : > { %v7323_v55 = vpop.eup %5928 }
 0x6be   : > { %v2135_v59 = vsel %vm1140_vm4, %v7323_v55, 0.0 }
 0x6c1   : > { %v7327_v60 = vpop.eup %5930 }
 0x6c2   : > { %v2138_v61 = vsel %vm1140_vm4, %v7327_v60, 0.0 }
 0x6c8   : > { %2501 = vrot.lane.b32.xlu1 %v7036_v34, %s6501_s29 }
 0x6d1   : > { %2453 = vrot.lane.b32.xlu0 %v7033_v33, %s6501_s29  ;;  %s6509_s29 = smov 8  }
 0x6ec   : > { %2136 = vadd.xlane.f32.xlu1 %v2135_v59 }
 0x6f0   : > { %2139 = vadd.xlane.f32.xlu0 %v2138_v61 }
 0x6fd   : > { %2652 = vrot.lane.b32.xlu1 %v7020_v26, %s6502_s16 }
 0x701   : > { %2650 = vrot.lane.b32.xlu1 %v7020_v26, %s6503_s21 }
 0x705   : > { %2752 = vrot.lane.b32.xlu1 %v7023_v27, %s6502_s16 }
 0x706   : > { %2602 = vrot.lane.b32.xlu0 %v7014_v21, %s6502_s16 }
 0x709   : > { %2750 = vrot.lane.b32.xlu1 %v7023_v27, %s6503_s21 }
 0x70a   : > { %2600 = vrot.lane.b32.xlu0 %v7014_v21, %s6503_s21 }
 0x70d   : > { %2852 = vrot.lane.b32.xlu1 %v7030_v32, %s6502_s16 }
 0x70e   : > { %2702 = vrot.lane.b32.xlu0 %v7016_v23, %s6502_s16 }
 0x711   : > { %2850 = vrot.lane.b32.xlu1 %v7030_v32, %s6503_s21 }
 0x712   : > { %2700 = vrot.lane.b32.xlu0 %v7016_v23, %s6503_s21 }
 0x715   : > { %2952 = vrot.lane.b32.xlu1 %v7036_v34, %s6502_s16 }
 0x716   : > { %2802 = vrot.lane.b32.xlu0 %v7027_v30, %s6502_s16 }
 0x719   : > { %2950 = vrot.lane.b32.xlu1 %v7036_v34, %s6503_s21 }
 0x71a   : > { %2800 = vrot.lane.b32.xlu0 %v7027_v30, %s6503_s21 }
 0x71d   : > { %3096 = vrot.lane.b32.xlu1 %v7014_v21, %s6504_s1 }
 0x71e   : > { %2902 = vrot.lane.b32.xlu0 %v7033_v33, %s6502_s16  ;;  %s6510_s16 = smov 24  }
 0x721   : > { %3192 = vrot.lane.b32.xlu1 %v7016_v23, %s6504_s1 }
 0x722   : > { %2900 = vrot.lane.b32.xlu0 %v7033_v33, %s6503_s21  ;;  %s616_s21 = scalar_lea.vmem [#allocation24], %s5011_s14  ;;  %s6511_s14 = smov [#allocation24]  }
 0x725   : > { %3240 = vrot.lane.b32.xlu1 %v7023_v27, %s6504_s1 }
 0x726   : > { %3144 = vrot.lane.b32.xlu0 %v7020_v26, %s6504_s1 }
 0x734   : > { %v2119_v1 = vpop.xlane.xlu1 %2118 }
 0x735   : > { %5932 = vrcp.f32 %v2119_v1 }
 0x738   : > { %v2122_v2 = vpop.xlane.xlu0 %2121 }
 0x739   : > { %5934 = vrcp.f32 %v2122_v2 }
 0x73c   : > { %v2125_v3 = vpop.xlane.xlu1 %2124 }
 0x73d   : > { %5936 = vrcp.f32 %v2125_v3 }
 0x73f   : > { %v5933_v4 = vpop.eup %5932 }
 0x740   : > { %v2128_v5 = vpop.xlane.xlu0 %2127  ;;  %v2149_v6 = vmul.f32 %v5933_v4, %v7294_v31 }
 0x741   : > { %5938 = vrcp.f32 %v2128_v5 }
 0x742   : > { %v2157_v7 = vpack.c.bf16 %v2149_v6, %v2149_v6 }
 0x743   : > { %v5935_v8 = vpop.eup %5934 }
 0x744   : > { %5420 = vmatmul.mubr.msk.bf16.vlgmr.msra.gmra.mrb[48].mxu1 %vm1239_vm5, %v2157_v7  ;;  %v2131_v11 = vpop.xlane.xlu1 %2130  ;;  %v2150_v14 = vmul.f32 %v5935_v8, %v7298_v38 }
 0x745   : > { %5430 = vmatpush3.bf16.msra.mxu1 %v2267_v9  ;;  %5940 = vrcp.f32 %v2131_v11  ;;  %5431 = vmatprep.mubr.msk.bf16.mxu1 %vm6495_vm0, %v6494_v0 }
 0x746   : > { %v2158_v15 = vpack.c.bf16 %v2150_v14, %v2150_v14  ;;  %5441 = vmatprep.subr.bf16.mxu1 %v6494_v0 }
 0x747   : > { %v5937_v16 = vpop.eup %5936 }
 0x748   : > { %v2151_v17 = vmul.f32 %v5937_v16, %v7302_v45  ;;  %5426 = vmatmul.mubr.msk.bf16.vlgmr.msra.gmra.mrb[52].mxu0 %vm1239_vm5, %v2158_v15  ;;  %v2134_v12 = vpop.xlane.xlu0 %2133  ;;  %v2502_v39 = vpop.permute.xlu1 %2501 }
 0x749   : > { %5436 = vmatpush3.bf16.msra.mxu0 %v2315_v18  ;;  %5942 = vrcp.f32 %v2134_v12  ;;  %5437 = vmatprep.mubr.msk.bf16.mxu0 %vm6495_vm0, %v6494_v0  ;;  %v2507_v43 = vsel %vm1243_vm3, %v2502_v39, 0 }
 0x74a   : > { %v2159_v20 = vpack.c.bf16 %v2151_v17, %v2151_v17  ;;  %5447 = vmatprep.subr.bf16.mxu0 %v6494_v0 }
 0x74b   : > { %v5939_v19 = vpop.eup %5938 }
 0x74c   : > { %5432 = vmatmul.mubr.msk.bf16.vlgmr.msra.gmra.mrb[52].mxu1 %vm1239_vm5, %v2159_v20  ;;  %v2152_v13 = vmul.f32 %v5939_v19, %v7306_v47  ;;  %v2454_v35 = vpop.permute.xlu0 %2453 }
 0x74d   : > { %5442 = vmatpush3.bf16.msra.mxu1 %v2363_v22  ;;  %5443 = vmatprep.mubr.msk.bf16.mxu1 %vm6495_vm0, %v6494_v0  ;;  %v2459_v38 = vsel %vm1243_vm3, %v2454_v35, 0 }
 0x74e   : > { %v2160_v24 = vpack.c.bf16 %v2152_v13, %v2152_v13  ;;  %5453 = vmatprep.subr.bf16.mxu1 %v6494_v0 }
 0x74f   : > { %v5941_v25 = vpop.eup %5940 }
 0x750   : > { %v2153_v31 = vmul.f32 %v5941_v25, %v7310_v49  ;;  %5438 = vmatmul.mubr.msk.bf16.vlgmr.msra.gmra.mrb[56].mxu0 %vm1239_vm5, %v2160_v24 }
 0x751   : > { %5448 = vmatpush3.bf16.msra.mxu0 %v2411_v29  ;;  %5449 = vmatprep.mubr.msk.bf16.mxu0 %vm6495_vm0, %v6494_v0 }
 0x752   : > { %v2161_v36 = vpack.c.bf16 %v2153_v31, %v2153_v31  ;;  %5459 = vmatprep.subr.bf16.mxu0 %v6494_v0 }
 0x753   : > { %v5943_v37 = vpop.eup %5942 }
 0x754   : > { %v2154_v28 = vmul.f32 %v5943_v37, %v7314_v42  ;;  %5444 = vmatmul.mubr.msk.bf16.vlgmr.msra.gmra.mrb[56].mxu1 %vm1239_vm5, %v2161_v36 }
 0x755   : > { %5454 = vmatpush3.bf16.msra.mxu1 %v2459_v38  ;;  %5455 = vmatprep.mubr.msk.bf16.mxu1 %vm6495_vm0, %v6494_v0 }
 0x756   : > { %v2162_v40 = vpack.c.bf16 %v2154_v28, %v2154_v28  ;;  %5465 = vmatprep.subr.bf16.mxu1 %v6494_v0 }
 0x758   : > { %5450 = vmatmul.mubr.msk.bf16.vlgmr.msra.gmra.mrb[60].mxu0 %vm1239_vm5, %v2162_v40 }
 0x759   : > { %5460 = vmatpush3.bf16.msra.mxu0 %v2507_v43  ;;  %5461 = vmatprep.mubr.msk.bf16.mxu0 %vm6495_vm0, %v6494_v0 }
 0x75a   : > { %5471 = vmatprep.subr.bf16.mxu0 %v6494_v0 }
 0x779   : > { %v2137_v44 = vpop.xlane.xlu1 %2136 }
 0x77a   : > { %5944 = vrcp.f32 %v2137_v44 }
 0x77d   : > { %v2653_v45 = vpop.permute.xlu1 %2652  ;;  %v2140_v46 = vpop.xlane.xlu0 %2139 }
 0x77e   : > { %5946 = vrcp.f32 %v2140_v46 }
 0x781   : > { %v2651_v41 = vpop.permute.xlu1 %2650  ;;  %v2603_v47 = vpop.permute.xlu0 %2602 }
 0x782   : > { %v2608_v54 = vsel %vm750_vm2, %v2603_v47, 0 }
 0x784   : > { %v5945_v48 = vpop.eup %5944 }
 0x785   : > { %v2155_v49 = vmul.f32 %v5945_v48, %v7323_v55  ;;  %v2753_v50 = vpop.permute.xlu1 %2752  ;;  %v2601_v42 = vpop.permute.xlu0 %2600  ;;  %v2658_v55 = vsel %vm750_vm2, %v2653_v45, 0 }
 0x786   : > { %v2758_v1 = vsel %vm750_vm2, %v2753_v50, 0 }
 0x787   : > { %v2163_v51 = vpack.c.bf16 %v2155_v49, %v2155_v49 }
 0x788   : > { %v5947_v52 = vpop.eup %5946 }
 0x789   : > { %v2156_v53 = vmul.f32 %v5947_v52, %v7327_v60  ;;  %v2751_v56 = vpop.permute.xlu1 %2750  ;;  %5456 = vmatmul.mubr.msk.bf16.vlgmr.msra.gmra.mrb[60].mxu1 %vm1239_vm5, %v2163_v51  ;;  %v2703_v57 = vpop.permute.xlu0 %2702 }
 0x78a   : > { %5466 = vmatpush3.bf16.xpose.msra.mxu1 %v2608_v54  ;;  %5467 = vmatprep.mubr.msk.bf16.mxu1 %vm6495_vm0, %v6494_v0  ;;  %v2708_v60 = vsel %vm750_vm2, %v2703_v57, 0 }
 0x78b   : > { %v2164_v58 = vpack.c.bf16 %v2156_v53, %v2156_v53  ;;  %5477 = vmatprep.subr.bf16.mxu1 %v6494_v0 }
 0x78d   : > { %5462 = vmatmul.mubr.msk.bf16.vlgmr.msra.gmra.mrb[64].mxu0 %vm1239_vm5, %v2164_v58  ;;  %v2701_v59 = vpop.permute.xlu0 %2700  ;;  %v2853_v61 = vpop.permute.xlu1 %2852 }
 0x78e   : > { %5472 = vmatpush3.bf16.xpose.msra.mxu0 %v2658_v55  ;;  %5473 = vmatprep.mubr.msk.bf16.mxu0 %vm6495_vm0, %v6494_v0  ;;  %v2858_v5 = vsel %vm750_vm2, %v2853_v61, 0 }
 0x78f   : > { %5483 = vmatprep.subr.bf16.mxu0 %v6494_v0 }
 0x791   : > { %5468 = vmatmul.mubr.msk.bf16.vlgmr.msra.gmra.mrb[64].mxu1 %vm750_vm2, %v2601_v42  ;;  %v2803_v62 = vpop.permute.xlu0 %2802  ;;  %v2851_v63 = vpop.permute.xlu1 %2850 }
 0x792   : > { %5478 = vmatpush3.bf16.xpose.msra.mxu1 %v2708_v60  ;;  %5479 = vmatprep.mubr.msk.bf16.mxu1 %vm6495_vm0, %v6494_v0  ;;  %v2808_v3 = vsel %vm750_vm2, %v2803_v62, 0 }
 0x793   : > { %5489 = vmatprep.subr.bf16.mxu1 %v6494_v0 }
 0x795   : > { %5474 = vmatmul.mubr.msk.bf16.vlgmr.msra.gmra.mrb[68].mxu0 %vm750_vm2, %v2651_v41  ;;  %v2801_v2 = vpop.permute.xlu0 %2800  ;;  %v2953_v4 = vpop.permute.xlu1 %2952 }
 0x796   : > { %5484 = vmatpush3.bf16.xpose.msra.mxu0 %v2758_v1  ;;  %5485 = vmatprep.mubr.msk.bf16.mxu0 %vm6495_vm0, %v6494_v0  ;;  %v2958_v11 = vsel %vm750_vm2, %v2953_v4, 0 }
 0x797   : > { %5495 = vmatprep.subr.bf16.mxu0 %v6494_v0 }
 0x799   : > { %5480 = vmatmul.mubr.msk.bf16.vlgmr.msra.gmra.mrb[68].mxu1 %vm750_vm2, %v2701_v59  ;;  %v2903_v6 = vpop.permute.xlu0 %2902  ;;  %v2951_v7 = vpop.permute.xlu1 %2950 }
 0x79a   : > { %5490 = vmatpush3.bf16.xpose.msra.mxu1 %v2808_v3  ;;  %5491 = vmatprep.mubr.msk.bf16.mxu1 %vm6495_vm0, %v6494_v0  ;;  %v2908_v8 = vsel %vm750_vm2, %v2903_v6, 0 }
 0x79b   : > { %5501 = vmatprep.subr.bf16.mxu1 %v6494_v0 }
 0x79d   : > { %5486 = vmatmul.mubr.msk.bf16.vlgmr.msra.gmra.mrb[72].mxu0 %vm750_vm2, %v2751_v56  ;;  %v2901_v9 = vpop.permute.xlu0 %2900  ;;  %v3097_v14 = vpop.permute.xlu1 %3096 }
 0x79e   : > { %5496 = vmatpush3.bf16.xpose.msra.mxu0 %v2858_v5  ;;  %5497 = vmatprep.mubr.msk.bf16.mxu0 %vm6495_vm0, %v6494_v0  ;;  %v3102_v15 = vsel %vm1243_vm3, %v3097_v14, 0 }
 0x79f   : > { %5507 = vmatprep.subr.bf16.mxu0 %v6494_v0 }
 0x7a1   : > { %5492 = vmatmul.mubr.msk.bf16.vlgmr.msra.gmra.mrb[72].mxu1 %vm750_vm2, %v2801_v2  ;;  %v3145_v16 = vpop.permute.xlu0 %3144 }
 0x7a2   : > { %5502 = vmatpush3.bf16.xpose.msra.mxu1 %v2908_v8  ;;  %5503 = vmatprep.mubr.msk.bf16.mxu1 %vm6495_vm0, %v6494_v0  ;;  %v3150_v18 = vsel %vm1243_vm3, %v3145_v16, 0 }
 0x7a3   : > { %5513 = vmatprep.subr.bf16.mxu1 %v6494_v0 }
 0x7a5   : > { %5498 = vmatmul.mubr.msk.bf16.vlgmr.msra.gmra.mrb[76].mxu0 %vm750_vm2, %v2851_v63 }
 0x7a6   : > { %5508 = vmatpush3.bf16.xpose.msra.mxu0 %v2958_v11  ;;  %5509 = vmatprep.mubr.msk.bf16.mxu0 %vm6495_vm0, %v6494_v0 }
 0x7a7   : > { %5519 = vmatprep.subr.bf16.mxu0 %v6494_v0 }
 0x7a9   : > { %5504 = vmatmul.mubr.msk.bf16.vlgmr.msra.gmra.mrb[76].mxu1 %vm750_vm2, %v2901_v9 }
 0x7aa   : > { %5514 = vmatpush3.bf16.msra.mxu1 %v3102_v15  ;;  %5515 = vmatprep.mubr.msk.bf16.mxu1 %vm6495_vm0, %v6494_v0 }
 0x7ab   : > { %5525 = vmatprep.subr.bf16.mxu1 %v6494_v0 }
 0x7ad   : > { %5510 = vmatmul.mubr.msk.bf16.vlgmr.msra.gmra.mrb[80].mxu0 %vm750_vm2, %v2951_v7 }
 0x7ae   : > { %5520 = vmatpush3.bf16.msra.mxu0 %v3150_v18  ;;  %5521 = vmatprep.mubr.msk.bf16.mxu0 %vm6495_vm0, %v6494_v0 }
 0x7af   : > { %5531 = vmatprep.subr.bf16.mxu0 %v6494_v0 }
 0x817   : > { %v2207_v17 = vpop.f32.mrb[48].mxu1 }
 0x818   : > { %v5421_v12 = vpop.f32.mrb[49].mxu1 }
 0x819   : > { %v2210_v20 = vpop.f32.mrb[50].mxu1 }
 0x81a   : > { %v5422_v19 = vpop.f32.mrb[51].mxu1 }
 0x81b   : > { %v2255_v22 = vpop.f32.mrb[52].mxu0 }
 0x81c   : > { %v2557_v13 = vcombine.low %v2207_v17, %v2255_v22  ;;  %v5427_v24 = vpop.f32.mrb[53].mxu0 }
 0x81d   : > { %v2258_v25 = vpop.f32.mrb[54].mxu0 }
 0x81e   : > { %v5428_v29 = vpop.f32.mrb[55].mxu0  ;;  %v2565_v43 = vrot.slane %v2557_v13, %v7010_v10 }
 0x81f   : > { %v2303_v31 = vpop.f32.mrb[52].mxu1 }
 0x820   : > { %v5433_v35 = vpop.f32.mrb[53].mxu1 }
 0x821   : > { %v2306_v36 = vpop.f32.mrb[54].mxu1 }
 0x822   : > { %v5434_v37 = vpop.f32.mrb[55].mxu1 }
 0x823   : > { %v2351_v28 = vpop.f32.mrb[56].mxu0 }
 0x824   : > { %v2558_v38 = vcombine.low %v2303_v31, %v2351_v28  ;;  %v5439_v39 = vpop.f32.mrb[57].mxu0 }
 0x825   : > { %v2354_v40 = vpop.f32.mrb[58].mxu0 }
 0x826   : > { %v2572_v44 = vrot.slane %v2558_v38, %v7010_v10  ;;  %v5440_v45 = vpop.f32.mrb[59].mxu0 }
 0x827   : > { %v2399_v46 = vpop.f32.mrb[56].mxu1 }
 0x828   : > { %v2573_v41 = vcombine.low %v2565_v43, %v2572_v44  ;;  %v5445_v47 = vpop.f32.mrb[57].mxu1 }
 0x829   : > { %v2402_v48 = vpop.f32.mrb[58].mxu1 }
 0x82a   : > { %v5446_v49 = vpop.f32.mrb[59].mxu1 }
 0x82b   : > { %v2447_v50 = vpop.f32.mrb[60].mxu0 }
 0x82c   : > { %v2574_v42 = vcombine.low %v2399_v46, %v2447_v50  ;;  %v5451_v51 = vpop.f32.mrb[61].mxu0 }
 0x82d   : > { %v2450_v52 = vpop.f32.mrb[62].mxu0 }
 0x82e   : > { %v5452_v53 = vpop.f32.mrb[63].mxu0  ;;  %v2582_v62 = vrot.slane %v2574_v42, %v7010_v10 }
 0x82f   : > { %v7466_v53 = vpop.permute.xlu1 %3192 }
 0x85c   : > { %v2495_v54 = vpop.f32.mrb[60].mxu1 }
 0x85d   : > { %v5457_v56 = vpop.f32.mrb[61].mxu1 }
 0x85e   : > { %v2498_v57 = vpop.f32.mrb[62].mxu1 }
 0x85f   : > { %v5458_v58 = vpop.f32.mrb[63].mxu1 }
 0x860   : > { %v2543_v55 = vpop.f32.mrb[64].mxu0 }
 0x861   : > { %v2575_v59 = vcombine.low %v2495_v54, %v2543_v55  ;;  %v5463_v61 = vpop.f32.mrb[65].mxu0  ;;  %v7468_v54 = vpop.permute.xlu1 %3240 }
 0x862   : > { %v2546_v60 = vpop.f32.mrb[66].mxu0 }
 0x863   : > { %v2589_v63 = vrot.slane %v2575_v59, %v7010_v10  ;;  %v5464_v1 = vpop.f32.mrb[67].mxu0 }
 0x864   : > { %v2644_v2 = vpop.f32.mrb[64].mxu1 }
 0x865   : > { %v2590_v3 = vcombine.low %v2582_v62, %v2589_v63  ;;  %v5469_v4 = vpop.f32.mrb[65].mxu1  ;;  %v3000_v5 = vsel %vm1140_vm4, %v2644_v2, -inf }
 0x866   : > { %3001 = vmax.xlane.f32.xlu0 %v3000_v5  ;;  %v2647_v6 = vpop.f32.mrb[66].mxu1 }
 0x867   : > { %v7450_v7 = vpack.c.bf16 %v2590_v3, %v2573_v41  ;;  %v5470_v8 = vpop.f32.mrb[67].mxu1 }
 0x868   : > { %v2694_v9 = vpop.f32.mrb[68].mxu0 }
 0x869   : > { %v5475_v11 = vpop.f32.mrb[69].mxu0  ;;  %v3003_v14 = vsel %vm1140_vm4, %v2694_v9, -inf }
 0x86a   : > { %3004 = vmax.xlane.f32.xlu1 %v3003_v14  ;;  %v2697_v15 = vpop.f32.mrb[70].mxu0 }
 0x86b   : > { %v5476_v16 = vpop.f32.mrb[71].mxu0 }
 0x86c   : > { %v2744_v18 = vpop.f32.mrb[68].mxu1 }
 0x86d   : > { %v5481_v17 = vpop.f32.mrb[69].mxu1  ;;  %v3006_v12 = vsel %vm1140_vm4, %v2744_v18, -inf }
 0x86e   : > { %3007 = vmax.xlane.f32.xlu0 %v3006_v12  ;;  %v2747_v20 = vpop.f32.mrb[70].mxu1 }
 0x86f   : > { %v5482_v19 = vpop.f32.mrb[71].mxu1 }
 0x870   : > { %v2794_v22 = vpop.f32.mrb[72].mxu0 }
 0x871   : > { %v5487_v13 = vpop.f32.mrb[73].mxu0  ;;  %v3009_v24 = vsel %vm1140_vm4, %v2794_v22, -inf }
 0x872   : > { %3010 = vmax.xlane.f32.xlu0 %v3009_v24  ;;  %v2797_v25 = vpop.f32.mrb[74].mxu0 }
 0x873   : > { %v5488_v29 = vpop.f32.mrb[75].mxu0 }
 0x874   : > { %v2844_v31 = vpop.f32.mrb[72].mxu1 }
 0x875   : > { %v5493_v35 = vpop.f32.mrb[73].mxu1  ;;  %v3012_v36 = vsel %vm1140_vm4, %v2844_v31, -inf }
 0x876   : > { %v2847_v37 = vpop.f32.mrb[74].mxu1  ;;  %3013 = vmax.xlane.f32.xlu1 %v3012_v36 }
 0x877   : > { %v5494_v28 = vpop.f32.mrb[75].mxu1 }
 0x878   : > { %v2894_v38 = vpop.f32.mrb[76].mxu0 }
 0x879   : > { %v5499_v39 = vpop.f32.mrb[77].mxu0  ;;  %v3015_v40 = vsel %vm1140_vm4, %v2894_v38, -inf }
 0x87a   : > { %3016 = vmax.xlane.f32.xlu0 %v3015_v40  ;;  %v2897_v43 = vpop.f32.mrb[78].mxu0 }
 0x87b   : > { %v5500_v44 = vpop.f32.mrb[79].mxu0 }
 0x87c   : > { %v7457_v45 = vpop.f32.mrb[76].mxu1 }
 0x87d   : > { %v5505_v46 = vpop.f32.mrb[77].mxu1  ;;  %v3018_v41 = vsel %vm1140_vm4, %v7457_v45, -inf }
 0x87e   : > { %v2947_v47 = vpop.f32.mrb[78].mxu1  ;;  %3019 = vmax.xlane.f32.xlu1 %v3018_v41 }
 0x87f   : > { %v5506_v48 = vpop.f32.mrb[79].mxu1 }
 0x880   : > { %v2994_v49 = vpop.f32.mrb[80].mxu0 }
 0x881   : > { %v5511_v50 = vpop.f32.mrb[81].mxu0  ;;  %v3021_v42 = vsel %vm1140_vm4, %v2994_v49, -inf }
 0x882   : > { %3022 = vmax.xlane.f32.xlu0 %v3021_v42  ;;  %v2997_v51 = vpop.f32.mrb[82].mxu0 }
 0x883   : > { %v5512_v52 = vpop.f32.mrb[83].mxu0 }
 0x88f   : > { %3336 = vrot.lane.b32.xlu1 %v7030_v32, %s6504_s1 }
 0x898   : > { %3288 = vrot.lane.b32.xlu0 %v7027_v30, %s6504_s1 }
 0x8f3   : > { %v3002_v56 = vpop.xlane.xlu0 %3001 }
 0x8f4   : > { %v3024_v57 = vsub.f32 %v2644_v2, %v3002_v56 }
 0x8f6   : > { %v3032_v58 = vmul.f32 1.442695, %v3024_v57 }
 0x8f7   : > { %v3005_v55 = vpop.xlane.xlu1 %3004 }
 0x8f8   : > { %5948 = vpow2.f32 %v3032_v58  ;;  %v3025_v59 = vsub.f32 %v2694_v9, %v3005_v55  ;;  %v3246_v55 = vsel %vm1243_vm3, %v7468_v54, 0 }
 0x8fa   : > { %v3034_v61 = vmul.f32 1.442695, %v3025_v59 }
 0x8fb   : > { %v3008_v60 = vpop.xlane.xlu0 %3007 }
 0x8fc   : > { %5950 = vpow2.f32 %v3034_v61  ;;  %v3026_v62 = vsub.f32 %v2744_v18, %v3008_v60 }
 0x8fe   : > { %v3036_v63 = vmul.f32 1.442695, %v3026_v62 }
 0x8ff   : > { %v3011_v1 = vpop.xlane.xlu0 %3010 }
 0x900   : > { %5952 = vpow2.f32 %v3036_v63  ;;  %v3027_v3 = vsub.f32 %v2794_v22, %v3011_v1 }
 0x902   : > { %v7470_v4 = vpop.eup %5948  ;;  %v3038_v5 = vmul.f32 1.442695, %v3027_v3 }
 0x903   : > { %v3014_v6 = vpop.xlane.xlu1 %3013  ;;  %v3048_v8 = vsel %vm1140_vm4, %v7470_v4, 0.0 }
 0x904   : > { %5954 = vpow2.f32 %v3038_v5  ;;  %v3028_v2 = vsub.f32 %v2844_v31, %v3014_v6  ;;  %3049 = vadd.xlane.f32.xlu1 %v3048_v8 }
 0x906   : > { %v7474_v11 = vpop.eup %5950  ;;  %v3040_v9 = vmul.f32 1.442695, %v3028_v2 }
 0x907   : > { %v3017_v14 = vpop.xlane.xlu0 %3016  ;;  %v3051_v15 = vsel %vm1140_vm4, %v7474_v11, 0.0 }
 0x908   : > { %5956 = vpow2.f32 %v3040_v9  ;;  %v3029_v16 = vsub.f32 %v2894_v38, %v3017_v14  ;;  %3052 = vadd.xlane.f32.xlu0 %v3051_v15 }
 0x90a   : > { %v7478_v18 = vpop.eup %5952  ;;  %v3042_v17 = vmul.f32 1.442695, %v3029_v16 }
 0x90b   : > { %v3054_v12 = vsel %vm1140_vm4, %v7478_v18, 0.0  ;;  %v3020_v29 = vpop.xlane.xlu1 %3019 }
 0x90c   : > { %5958 = vpow2.f32 %v3042_v17  ;;  %3055 = vadd.xlane.f32.xlu1 %v3054_v12  ;;  %v3030_v31 = vsub.f32 %v7457_v45, %v3020_v29 }
 0x90e   : > { %v7482_v20 = vpop.eup %5954  ;;  %v3044_v36 = vmul.f32 1.442695, %v3030_v31 }
 0x90f   : > { %v3057_v19 = vsel %vm1140_vm4, %v7482_v20, 0.0  ;;  %v3023_v35 = vpop.xlane.xlu0 %3022  ;;  %v3337_v44 = vpop.permute.xlu1 %3336 }
 0x910   : > { %3058 = vadd.xlane.f32.xlu0 %v3057_v19  ;;  %v3031_v37 = vsub.f32 %v2994_v49, %v3023_v35  ;;  %5960 = vpow2.f32 %v3044_v36  ;;  %v3342_v3 = vsel %vm1243_vm3, %v3337_v44, 0 }
 0x912   : > { %v7486_v22 = vpop.eup %5956  ;;  %v3046_v28 = vmul.f32 1.442695, %v3031_v37 }
 0x913   : > { %v3060_v13 = vsel %vm1140_vm4, %v7486_v22, 0.0  ;;  %v3289_v45 = vpop.permute.xlu0 %3288 }
 0x914   : > { %3061 = vadd.xlane.f32.xlu1 %v3060_v13  ;;  %5962 = vpow2.f32 %v3046_v28  ;;  %v3294_v62 = vsel %vm1243_vm3, %v3289_v45, 0 }
 0x916   : > { %v7490_v24 = vpop.eup %5958 }
 0x917   : > { %v3063_v25 = vsel %vm1140_vm4, %v7490_v24, 0.0 }
 0x918   : > { %3064 = vadd.xlane.f32.xlu0 %v3063_v25 }
 0x91a   : > { %v7499_v38 = vpop.eup %5960 }
 0x91b   : > { %v3066_v39 = vsel %vm1140_vm4, %v7499_v38, 0.0 }
 0x91e   : > { %v7503_v40 = vpop.eup %5962 }
 0x91f   : > { %v3069_v43 = vsel %vm1140_vm4, %v7503_v40, 0.0 }
 0x925   : > { %3432 = vrot.lane.b32.xlu1 %v7036_v34, %s6504_s1 }
 0x92e   : > { %3384 = vrot.lane.b32.xlu0 %v7033_v33, %s6504_s1  ;;  %s4805_s1 = sshll.u32 %s616_s21, 4  ;;  %s7760_s1 = int_to_ptr.vmem [resolvable:$true] %s4805_s1 }
 0x949   : > { %3067 = vadd.xlane.f32.xlu1 %v3066_v39 }
 0x94d   : > { %3070 = vadd.xlane.f32.xlu0 %v3069_v43 }
 0x95a   : > { %3583 = vrot.lane.b32.xlu1 %v7020_v26, %s6505_s30 }
 0x95e   : > { %3581 = vrot.lane.b32.xlu1 %v7020_v26, %s6506_s25 }
 0x962   : > { %3683 = vrot.lane.b32.xlu1 %v7023_v27, %s6505_s30 }
 0x963   : > { %3533 = vrot.lane.b32.xlu0 %v7014_v21, %s6505_s30 }
 0x966   : > { %3681 = vrot.lane.b32.xlu1 %v7023_v27, %s6506_s25 }
 0x967   : > { %3531 = vrot.lane.b32.xlu0 %v7014_v21, %s6506_s25 }
 0x96a   : > { %3783 = vrot.lane.b32.xlu1 %v7030_v32, %s6505_s30 }
 0x96b   : > { %3633 = vrot.lane.b32.xlu0 %v7016_v23, %s6505_s30 }
 0x96e   : > { %3781 = vrot.lane.b32.xlu1 %v7030_v32, %s6506_s25 }
 0x96f   : > { %3631 = vrot.lane.b32.xlu0 %v7016_v23, %s6506_s25 }
 0x972   : > { %3883 = vrot.lane.b32.xlu1 %v7036_v34, %s6505_s30 }
 0x973   : > { %3733 = vrot.lane.b32.xlu0 %v7027_v30, %s6505_s30 }
 0x976   : > { %3881 = vrot.lane.b32.xlu1 %v7036_v34, %s6506_s25 }
 0x977   : > { %3731 = vrot.lane.b32.xlu0 %v7027_v30, %s6506_s25 }
 0x97a   : > { %4027 = vrot.lane.b32.xlu1 %v7014_v21, %s6507_s22  ;;  %v3198_v21 = vsel %vm1243_vm3, %v7466_v53, 0 }
 0x97b   : > { %3833 = vrot.lane.b32.xlu0 %v7033_v33, %s6505_s30 }
 0x97f   : > { %3831 = vrot.lane.b32.xlu0 %v7033_v33, %s6506_s25 }
 0x991   : > { %v3050_v46 = vpop.xlane.xlu1 %3049 }
 0x992   : > { %5964 = vrcp.f32 %v3050_v46 }
 0x995   : > { %v3053_v41 = vpop.xlane.xlu0 %3052 }
 0x996   : > { %5966 = vrcp.f32 %v3053_v41 }
 0x999   : > { %v3056_v47 = vpop.xlane.xlu1 %3055 }
 0x99a   : > { %5968 = vrcp.f32 %v3056_v47 }
 0x99c   : > { %v5965_v48 = vpop.eup %5964 }
 0x99d   : > { %v3080_v49 = vmul.f32 %v5965_v48, %v7470_v4  ;;  %v3059_v50 = vpop.xlane.xlu0 %3058 }
 0x99e   : > { %5970 = vrcp.f32 %v3059_v50 }
 0x99f   : > { %v3088_v42 = vpack.c.bf16 %v3080_v49, %v3080_v49 }
 0x9a0   : > { %v5967_v51 = vpop.eup %5966 }
 0x9a1   : > { %v3081_v52 = vmul.f32 %v5967_v51, %v7474_v11  ;;  %5516 = vmatmul.mubr.msk.bf16.vlgmr.msra.gmra.mrb[80].mxu1 %vm1239_vm5, %v3088_v42  ;;  %v3062_v56 = vpop.xlane.xlu1 %3061 }
 0x9a2   : > { %5526 = vmatpush3.bf16.msra.mxu1 %v3198_v21  ;;  %5972 = vrcp.f32 %v3062_v56  ;;  %5527 = vmatprep.mubr.msk.bf16.mxu1 %vm6495_vm0, %v6494_v0 }
 0x9a3   : > { %v3089_v57 = vpack.c.bf16 %v3081_v52, %v3081_v52  ;;  %5537 = vmatprep.subr.bf16.mxu1 %v6494_v0 }
 0x9a4   : > { %v5969_v58 = vpop.eup %5968 }
 0x9a5   : > { %v3082_v59 = vmul.f32 %v5969_v58, %v7478_v18  ;;  %5522 = vmatmul.mubr.msk.bf16.vlgmr.msra.gmra.mrb[84].mxu0 %vm1239_vm5, %v3089_v57  ;;  %v3065_v53 = vpop.xlane.xlu0 %3064  ;;  %v3433_v9 = vpop.permute.xlu1 %3432 }
 0x9a6   : > { %5532 = vmatpush3.bf16.msra.mxu0 %v3246_v55  ;;  %5974 = vrcp.f32 %v3065_v53  ;;  %5533 = vmatprep.mubr.msk.bf16.mxu0 %vm6495_vm0, %v6494_v0  ;;  %v3438_v15 = vsel %vm1243_vm3, %v3433_v9, 0 }
 0x9a7   : > { %v3090_v61 = vpack.c.bf16 %v3082_v59, %v3082_v59  ;;  %5543 = vmatprep.subr.bf16.mxu0 %v6494_v0 }
 0x9a8   : > { %v5971_v60 = vpop.eup %5970 }
 0x9a9   : > { %v3083_v63 = vmul.f32 %v5971_v60, %v7482_v20  ;;  %5528 = vmatmul.mubr.msk.bf16.vlgmr.msra.gmra.mrb[84].mxu1 %vm1239_vm5, %v3090_v61  ;;  %v3385_v5 = vpop.permute.xlu0 %3384 }
 0x9aa   : > { %5538 = vmatpush3.bf16.msra.mxu1 %v3294_v62  ;;  %5539 = vmatprep.mubr.msk.bf16.mxu1 %vm6495_vm0, %v6494_v0  ;;  %v3390_v11 = vsel %vm1243_vm3, %v3385_v5, 0 }
 0x9ab   : > { %v3091_v54 = vpack.c.bf16 %v3083_v63, %v3083_v63  ;;  %5549 = vmatprep.subr.bf16.mxu1 %v6494_v0 }
 0x9ac   : > { %v5973_v1 = vpop.eup %5972 }
 0x9ad   : > { %v3084_v4 = vmul.f32 %v5973_v1, %v7486_v22  ;;  %5534 = vmatmul.mubr.msk.bf16.vlgmr.msra.gmra.mrb[88].mxu0 %vm1239_vm5, %v3091_v54 }
 0x9ae   : > { %5544 = vmatpush3.bf16.msra.mxu0 %v3342_v3  ;;  %5545 = vmatprep.mubr.msk.bf16.mxu0 %vm6495_vm0, %v6494_v0 }
 0x9af   : > { %v3092_v6 = vpack.c.bf16 %v3084_v4, %v3084_v4  ;;  %5555 = vmatprep.subr.bf16.mxu0 %v6494_v0 }
 0x9b0   : > { %v5975_v8 = vpop.eup %5974 }
 0x9b1   : > { %v3085_v2 = vmul.f32 %v5975_v8, %v7490_v24  ;;  %5540 = vmatmul.mubr.msk.bf16.vlgmr.msra.gmra.mrb[88].mxu1 %vm1239_vm5, %v3092_v6 }
 0x9b2   : > { %5550 = vmatpush3.bf16.msra.mxu1 %v3390_v11  ;;  %5551 = vmatprep.mubr.msk.bf16.mxu1 %vm6495_vm0, %v6494_v0 }
 0x9b3   : > { %v3093_v14 = vpack.c.bf16 %v3085_v2, %v3085_v2  ;;  %5561 = vmatprep.subr.bf16.mxu1 %v6494_v0 }
 0x9b5   : > { %5546 = vmatmul.mubr.msk.bf16.vlgmr.msra.gmra.mrb[92].mxu0 %vm1239_vm5, %v3093_v14 }
 0x9b6   : > { %5556 = vmatpush3.bf16.msra.mxu0 %v3438_v15  ;;  %5557 = vmatprep.mubr.msk.bf16.mxu0 %vm6495_vm0, %v6494_v0 }
 0x9b7   : > { %5567 = vmatprep.subr.bf16.mxu0 %v6494_v0 }
 0x9d6   : > { %v3068_v16 = vpop.xlane.xlu1 %3067 }
 0x9d7   : > { %5976 = vrcp.f32 %v3068_v16 }
 0x9da   : > { %v3584_v18 = vpop.permute.xlu1 %3583  ;;  %v3071_v17 = vpop.xlane.xlu0 %3070 }
 0x9db   : > { %5978 = vrcp.f32 %v3071_v17 }
 0x9de   : > { %v3582_v12 = vpop.permute.xlu1 %3581  ;;  %v3534_v20 = vpop.permute.xlu0 %3533 }
 0x9df   : > { %v3539_v35 = vsel %vm750_vm2, %v3534_v20, 0 }
 0x9e1   : > { %v5977_v19 = vpop.eup %5976 }
 0x9e2   : > { %v3086_v22 = vmul.f32 %v5977_v19, %v7499_v38  ;;  %v3684_v13 = vpop.permute.xlu1 %3683  ;;  %v3532_v24 = vpop.permute.xlu0 %3531  ;;  %v3589_v38 = vsel %vm750_vm2, %v3584_v18, 0 }
 0x9e3   : > { %v3689_v46 = vsel %vm750_vm2, %v3684_v13, 0 }
 0x9e4   : > { %v3094_v25 = vpack.c.bf16 %v3086_v22, %v3086_v22 }
 0x9e5   : > { %v5979_v29 = vpop.eup %5978 }
 0x9e6   : > { %v3087_v31 = vmul.f32 %v5979_v29, %v7503_v40  ;;  %v3682_v36 = vpop.permute.xlu1 %3681  ;;  %5552 = vmatmul.mubr.msk.bf16.vlgmr.msra.gmra.mrb[92].mxu1 %vm1239_vm5, %v3094_v25  ;;  %v3634_v37 = vpop.permute.xlu0 %3633 }
 0x9e7   : > { %5562 = vmatpush3.bf16.xpose.msra.mxu1 %v3539_v35  ;;  %5563 = vmatprep.mubr.msk.bf16.mxu1 %vm6495_vm0, %v6494_v0  ;;  %v3639_v40 = vsel %vm750_vm2, %v3634_v37, 0 }
 0x9e8   : > { %v3095_v28 = vpack.c.bf16 %v3087_v31, %v3087_v31  ;;  %5573 = vmatprep.subr.bf16.mxu1 %v6494_v0 }
 0x9ea   : > { %5558 = vmatmul.mubr.msk.bf16.vlgmr.msra.gmra.mrb[96].mxu0 %vm1239_vm5, %v3095_v28  ;;  %v3632_v39 = vpop.permute.xlu0 %3631  ;;  %v3784_v43 = vpop.permute.xlu1 %3783 }
 0x9eb   : > { %5568 = vmatpush3.bf16.xpose.msra.mxu0 %v3589_v38  ;;  %5569 = vmatprep.mubr.msk.bf16.mxu0 %vm6495_vm0, %v6494_v0  ;;  %v3789_v49 = vsel %vm750_vm2, %v3784_v43, 0 }
 0x9ec   : > { %5579 = vmatprep.subr.bf16.mxu0 %v6494_v0 }
 0x9ee   : > { %5564 = vmatmul.mubr.msk.bf16.vlgmr.msra.gmra.mrb[96].mxu1 %vm750_vm2, %v3532_v24  ;;  %v3734_v44 = vpop.permute.xlu0 %3733  ;;  %v3782_v45 = vpop.permute.xlu1 %3781 }
 0x9ef   : > { %5574 = vmatpush3.bf16.xpose.msra.mxu1 %v3639_v40  ;;  %5575 = vmatprep.mubr.msk.bf16.mxu1 %vm6495_vm0, %v6494_v0  ;;  %v3739_v47 = vsel %vm750_vm2, %v3734_v44, 0 }
 0x9f0   : > { %5585 = vmatprep.subr.bf16.mxu1 %v6494_v0 }
 0x9f2   : > { %5570 = vmatmul.mubr.msk.bf16.vlgmr.msra.gmra.mrb[100].mxu0 %vm750_vm2, %v3582_v12  ;;  %v3732_v41 = vpop.permute.xlu0 %3731  ;;  %v3884_v48 = vpop.permute.xlu1 %3883 }
 0x9f3   : > { %5580 = vmatpush3.bf16.xpose.msra.mxu0 %v3689_v46  ;;  %5581 = vmatprep.mubr.msk.bf16.mxu0 %vm6495_vm0, %v6494_v0  ;;  %v3889_v21 = vsel %vm750_vm2, %v3884_v48, 0 }
 0x9f4   : > { %5591 = vmatprep.subr.bf16.mxu0 %v6494_v0 }
 0x9f6   : > { %5576 = vmatmul.mubr.msk.bf16.vlgmr.msra.gmra.mrb[100].mxu1 %vm750_vm2, %v3632_v39  ;;  %v3834_v50 = vpop.permute.xlu0 %3833  ;;  %v3882_v42 = vpop.permute.xlu1 %3881 }
 0x9f7   : > { %5586 = vmatpush3.bf16.xpose.msra.mxu1 %v3739_v47  ;;  %5587 = vmatprep.mubr.msk.bf16.mxu1 %vm6495_vm0, %v6494_v0  ;;  %v3839_v51 = vsel %vm750_vm2, %v3834_v50, 0 }
 0x9f8   : > { %5597 = vmatprep.subr.bf16.mxu1 %v6494_v0 }
 0x9fa   : > { %5582 = vmatmul.mubr.msk.bf16.vlgmr.msra.gmra.mrb[104].mxu0 %vm750_vm2, %v3682_v36  ;;  %v4028_v52 = vpop.permute.xlu1 %4027  ;;  %v3832_v56 = vpop.permute.xlu0 %3831 }
 0x9fb   : > { %5592 = vmatpush3.bf16.xpose.msra.mxu0 %v3789_v49  ;;  %5593 = vmatprep.mubr.msk.bf16.mxu0 %vm6495_vm0, %v6494_v0  ;;  %v4033_v57 = vsel %vm1243_vm3, %v4028_v52, 0 }
 0x9fc   : > { %5603 = vmatprep.subr.bf16.mxu0 %v6494_v0 }
 0x9fe   : > { %5588 = vmatmul.mubr.msk.bf16.vlgmr.msra.gmra.mrb[104].mxu1 %vm750_vm2, %v3732_v41 }
 0x9ff   : > { %5598 = vmatpush3.bf16.xpose.msra.mxu1 %v3839_v51  ;;  %5599 = vmatprep.mubr.msk.bf16.mxu1 %vm6495_vm0, %v6494_v0 }
 0xa00   : > { %5609 = vmatprep.subr.bf16.mxu1 %v6494_v0 }
 0xa02   : > { %5594 = vmatmul.mubr.msk.bf16.vlgmr.msra.gmra.mrb[108].mxu0 %vm750_vm2, %v3782_v45 }
 0xa03   : > { %5604 = vmatpush3.bf16.xpose.msra.mxu0 %v3889_v21  ;;  %5605 = vmatprep.mubr.msk.bf16.mxu0 %vm6495_vm0, %v6494_v0 }
 0xa04   : > { %5615 = vmatprep.subr.bf16.mxu0 %v6494_v0 }
 0xa06   : > { %5600 = vmatmul.mubr.msk.bf16.vlgmr.msra.gmra.mrb[108].mxu1 %vm750_vm2, %v3832_v56 }
 0xa07   : > { %5610 = vmatpush3.bf16.msra.mxu1 %v4033_v57  ;;  %5611 = vmatprep.mubr.msk.bf16.mxu1 %vm6495_vm0, %v6494_v0 }
 0xa08   : > { %5621 = vmatprep.subr.bf16.mxu1 %v6494_v0 }
 0xa0a   : > { %5606 = vmatmul.mubr.msk.bf16.vlgmr.msra.gmra.mrb[112].mxu0 %vm750_vm2, %v3882_v42 }
 0xa0b   : > { %5617 = vmatprep.mubr.msk.bf16.mxu0 %vm6495_vm0, %v6494_v0 }
 0xa74   : > { %v3138_v58 = vpop.f32.mrb[80].mxu1 }
 0xa75   : > { %v5517_v55 = vpop.f32.mrb[81].mxu1 }
 0xa76   : > { %v3141_v59 = vpop.f32.mrb[82].mxu1 }
 0xa77   : > { %v5518_v53 = vpop.f32.mrb[83].mxu1 }
 0xa78   : > { %v3186_v61 = vpop.f32.mrb[84].mxu0 }
 0xa79   : > { %v3488_v60 = vcombine.low %v3138_v58, %v3186_v61  ;;  %v5523_v62 = vpop.f32.mrb[85].mxu0 }
 0xa7a   : > { %v3189_v63 = vpop.f32.mrb[86].mxu0 }
 0xa7b   : > { %v5524_v54 = vpop.f32.mrb[87].mxu0  ;;  %v3496_v9 = vrot.slane %v3488_v60, %v7010_v10 }
 0xa7c   : > { %v3234_v1 = vpop.f32.mrb[84].mxu1 }
 0xa7d   : > { %v5529_v3 = vpop.f32.mrb[85].mxu1 }
 0xa7e   : > { %v3237_v4 = vpop.f32.mrb[86].mxu1 }
 0xa7f   : > { %v5530_v5 = vpop.f32.mrb[87].mxu1 }
 0xa80   : > { %v3282_v6 = vpop.f32.mrb[88].mxu0 }
 0xa81   : > { %v3489_v8 = vcombine.low %v3234_v1, %v3282_v6  ;;  %v5535_v2 = vpop.f32.mrb[89].mxu0 }
 0xa82   : > { %v3285_v11 = vpop.f32.mrb[90].mxu0 }
 0xa83   : > { %v3503_v14 = vrot.slane %v3489_v8, %v7010_v10  ;;  %v5536_v15 = vpop.f32.mrb[91].mxu0 }
 0xa84   : > { %v3330_v16 = vpop.f32.mrb[88].mxu1 }
 0xa85   : > { %v3504_v18 = vcombine.low %v3496_v9, %v3503_v14  ;;  %v5541_v17 = vpop.f32.mrb[89].mxu1 }
 0xa86   : > { %v3333_v12 = vpop.f32.mrb[90].mxu1 }
 0xa87   : > { %v5542_v20 = vpop.f32.mrb[91].mxu1 }
 0xa88   : > { %v3378_v19 = vpop.f32.mrb[92].mxu0 }
 0xa89   : > { %v3505_v22 = vcombine.low %v3330_v16, %v3378_v19  ;;  %v5547_v13 = vpop.f32.mrb[93].mxu0 }
 0xa8a   : > { %v3381_v24 = vpop.f32.mrb[94].mxu0 }
 0xa8b   : > { %v5548_v25 = vpop.f32.mrb[95].mxu0  ;;  %v3513_v43 = vrot.slane %v3505_v22, %v7010_v10 }
 0xab9   : > { %v3426_v29 = vpop.f32.mrb[92].mxu1 }
 0xaba   : > { %v5553_v31 = vpop.f32.mrb[93].mxu1 }
 0xabb   : > { %v3429_v35 = vpop.f32.mrb[94].mxu1 }
 0xabc   : > { %v5554_v36 = vpop.f32.mrb[95].mxu1 }
 0xabd   : > { %v3474_v37 = vpop.f32.mrb[96].mxu0 }
 0xabe   : > { %v3506_v28 = vcombine.low %v3426_v29, %v3474_v37  ;;  %v5559_v38 = vpop.f32.mrb[97].mxu0 }
 0xabf   : > { %v3477_v39 = vpop.f32.mrb[98].mxu0 }
 0xac0   : > { %v3520_v40 = vrot.slane %v3506_v28, %v7010_v10  ;;  %v5560_v44 = vpop.f32.mrb[99].mxu0 }
 0xac1   : > { %v3575_v45 = vpop.f32.mrb[96].mxu1 }
 0xac2   : > { %v3521_v46 = vcombine.low %v3513_v43, %v3520_v40  ;;  %v5565_v41 = vpop.f32.mrb[97].mxu1  ;;  %v3931_v47 = vsel %vm1140_vm4, %v3575_v45, -inf }
 0xac3   : > { %3932 = vmax.xlane.f32.xlu0 %v3931_v47  ;;  %v3578_v48 = vpop.f32.mrb[98].mxu1 }
 0xac4   : > { %v7618_v49 = vpack.c.bf16 %v3521_v46, %v3504_v18  ;;  %v5566_v50 = vpop.f32.mrb[99].mxu1 }
 0xac5   : > { %v3625_v42 = vpop.f32.mrb[100].mxu0 }
 0xac6   : > { %v5571_v51 = vpop.f32.mrb[101].mxu0  ;;  %v3934_v21 = vsel %vm1140_vm4, %v3625_v42, -inf }
 0xac7   : > { %3935 = vmax.xlane.f32.xlu1 %v3934_v21  ;;  %v3628_v52 = vpop.f32.mrb[102].mxu0 }
 0xac8   : > { %v5572_v56 = vpop.f32.mrb[103].mxu0 }
 0xac9   : > { %v3675_v57 = vpop.f32.mrb[100].mxu1 }
 0xaca   : > { %v5577_v58 = vpop.f32.mrb[101].mxu1  ;;  %v3937_v55 = vsel %vm1140_vm4, %v3675_v57, -inf }
 0xacb   : > { %3938 = vmax.xlane.f32.xlu0 %v3937_v55  ;;  %v3678_v59 = vpop.f32.mrb[102].mxu1 }
 0xacc   : > { %v5578_v53 = vpop.f32.mrb[103].mxu1 }
 0xacd   : > { %v3725_v61 = vpop.f32.mrb[104].mxu0 }
 0xace   : > { %v5583_v60 = vpop.f32.mrb[105].mxu0  ;;  %v3940_v62 = vsel %vm1140_vm4, %v3725_v61, -inf }
 0xacf   : > { %3941 = vmax.xlane.f32.xlu0 %v3940_v62  ;;  %v3728_v63 = vpop.f32.mrb[106].mxu0 }
 0xad0   : > { %v5584_v54 = vpop.f32.mrb[107].mxu0 }
 0xad1   : > { %v7623_v1 = vpop.f32.mrb[104].mxu1 }
 0xad2   : > { %v5589_v3 = vpop.f32.mrb[105].mxu1  ;;  %v3943_v4 = vsel %vm1140_vm4, %v7623_v1, -inf }
 0xad3   : > { %v3778_v5 = vpop.f32.mrb[106].mxu1  ;;  %3944 = vmax.xlane.f32.xlu1 %v3943_v4 }
 0xad4   : > { %v5590_v6 = vpop.f32.mrb[107].mxu1 }
 0xad5   : > { %v7627_v8 = vpop.f32.mrb[108].mxu0 }
 0xad6   : > { %v5595_v2 = vpop.f32.mrb[109].mxu0  ;;  %v3946_v11 = vsel %vm1140_vm4, %v7627_v8, -inf }
 0xad7   : > { %3947 = vmax.xlane.f32.xlu0 %v3946_v11  ;;  %v3828_v9 = vpop.f32.mrb[110].mxu0 }
 0xad8   : > { %v5596_v14 = vpop.f32.mrb[111].mxu0 }
 0xad9   : > { %v3875_v15 = vpop.f32.mrb[108].mxu1 }
 0xada   : > { %v5601_v16 = vpop.f32.mrb[109].mxu1  ;;  %v3949_v18 = vsel %vm1140_vm4, %v3875_v15, -inf }
 0xadb   : > { %v3878_v17 = vpop.f32.mrb[110].mxu1  ;;  %3950 = vmax.xlane.f32.xlu1 %v3949_v18 }
 0xadc   : > { %v5602_v12 = vpop.f32.mrb[111].mxu1 }
 0xadd   : > { %v3925_v20 = vpop.f32.mrb[112].mxu0 }
 0xade   : > { %v5607_v19 = vpop.f32.mrb[113].mxu0  ;;  %v3952_v22 = vsel %vm1140_vm4, %v3925_v20, -inf }
 0xadf   : > { %3953 = vmax.xlane.f32.xlu0 %v3952_v22  ;;  %v3928_v13 = vpop.f32.mrb[114].mxu0 }
 0xae0   : > { %v5608_v24 = vpop.f32.mrb[115].mxu0 }
 0xaec   : > { %4123 = vrot.lane.b32.xlu1 %v7016_v23, %s6507_s22 }
 0xaf0   : > { %4171 = vrot.lane.b32.xlu1 %v7023_v27, %s6507_s22 }
 0xaf5   : > { %4075 = vrot.lane.b32.xlu0 %v7020_v26, %s6507_s22 }
 0xb50   : > { %v3933_v25 = vpop.xlane.xlu0 %3932 }
 0xb51   : > { %v3955_v29 = vsub.f32 %v3575_v45, %v3933_v25 }
 0xb53   : > { %v3963_v31 = vmul.f32 1.442695, %v3955_v29 }
 0xb54   : > { %v3936_v35 = vpop.xlane.xlu1 %3935 }
 0xb55   : > { %5980 = vpow2.f32 %v3963_v31  ;;  %v3956_v36 = vsub.f32 %v3625_v42, %v3936_v35 }
 0xb57   : > { %v3965_v37 = vmul.f32 1.442695, %v3956_v36 }
 0xb58   : > { %v3939_v28 = vpop.xlane.xlu0 %3938 }
 0xb59   : > { %5982 = vpow2.f32 %v3965_v37  ;;  %v3957_v38 = vsub.f32 %v3675_v57, %v3939_v28 }
 0xb5b   : > { %v3967_v39 = vmul.f32 1.442695, %v3957_v38 }
 0xb5c   : > { %v3942_v43 = vpop.xlane.xlu0 %3941 }
 0xb5d   : > { %5984 = vpow2.f32 %v3967_v39  ;;  %v3958_v23 = vsub.f32 %v3725_v61, %v3942_v43 }
 0xb5f   : > { %v7639_v40 = vpop.eup %5980  ;;  %v3969_v27 = vmul.f32 1.442695, %v3958_v23 }
 0xb60   : > { %v3979_v26 = vsel %vm1140_vm4, %v7639_v40, 0.0  ;;  %v3945_v52 = vpop.xlane.xlu1 %3944 }
 0xb61   : > { %5986 = vpow2.f32 %v3969_v27  ;;  %3980 = vadd.xlane.f32.xlu1 %v3979_v26  ;;  %v3959_v56 = vsub.f32 %v7623_v1, %v3945_v52 }
 0xb63   : > { %v7643_v44 = vpop.eup %5982  ;;  %v3971_v55 = vmul.f32 1.442695, %v3959_v56 }
 0xb64   : > { %v3982_v45 = vsel %vm1140_vm4, %v7643_v44, 0.0  ;;  %v3948_v41 = vpop.xlane.xlu0 %3947 }
 0xb65   : > { %3983 = vadd.xlane.f32.xlu0 %v3982_v45  ;;  %v3960_v58 = vsub.f32 %v7627_v8, %v3948_v41  ;;  %5988 = vpow2.f32 %v3971_v55 }
 0xb67   : > { %v7647_v46 = vpop.eup %5984  ;;  %v3973_v53 = vmul.f32 1.442695, %v3960_v58 }
 0xb68   : > { %v3985_v47 = vsel %vm1140_vm4, %v7647_v46, 0.0  ;;  %v3951_v57 = vpop.xlane.xlu1 %3950 }
 0xb69   : > { %3986 = vadd.xlane.f32.xlu1 %v3985_v47  ;;  %v3961_v59 = vsub.f32 %v3875_v15, %v3951_v57  ;;  %5990 = vpow2.f32 %v3973_v53 }
 0xb6b   : > { %v7651_v48 = vpop.eup %5986  ;;  %v3975_v61 = vmul.f32 1.442695, %v3961_v59 }
 0xb6c   : > { %v3954_v50 = vpop.xlane.xlu0 %3953  ;;  %v3988_v42 = vsel %vm1140_vm4, %v7651_v48, 0.0  ;;  %v4124_v6 = vpop.permute.xlu1 %4123 }
 0xb6d   : > { %3989 = vadd.xlane.f32.xlu0 %v3988_v42  ;;  %v3962_v60 = vsub.f32 %v3925_v20, %v3954_v50  ;;  %5992 = vpow2.f32 %v3975_v61 }
 0xb6f   : > { %v3977_v62 = vmul.f32 1.442695, %v3962_v60 }
 0xb70   : > { %v4076_v51 = vpop.permute.xlu0 %4075  ;;  %v4172_v8 = vpop.permute.xlu1 %4171 }
 0xb71   : > { %v4081_v21 = vsel %vm1243_vm3, %v4076_v51, 0  ;;  %5994 = vpow2.f32 %v3977_v62  ;;  %v4177_v12 = vsel %vm1243_vm3, %v4172_v8, 0 }
 0xb72   : > { %5616 = vmatpush3.bf16.msra.mxu0 %v4081_v21 }
 0xb73   : > { %5627 = vmatprep.subr.bf16.mxu0 %v6494_v0 }
 0xb7a   : > { %4267 = vrot.lane.b32.xlu1 %v7030_v32, %s6507_s22  ;;  %v7663_v32 = vpop.eup %5988 }
 0xb7b   : > { %v7665_v63 = vpop.eup %5990 }
 0xb7c   : > { %v7669_v54 = vpop.eup %5992  ;;  %v3994_v3 = vsel %vm1140_vm4, %v7665_v63, 0.0 }
 0xb7d   : > { %v3997_v1 = vsel %vm1140_vm4, %v7669_v54, 0.0  ;;  %v7675_v4 = vpop.eup %5994 }
 0xb7e   : > { %v4000_v5 = vsel %vm1140_vm4, %v7675_v4, 0.0 }
 0xb83   : > { %4219 = vrot.lane.b32.xlu0 %v7027_v30, %s6507_s22  ;;  %v3991_v30 = vsel %vm1140_vm4, %v7663_v32, 0.0 }
 0xb9e   : > { %3992 = vadd.xlane.f32.xlu1 %v3991_v30 }
 0xba2   : > { %3998 = vadd.xlane.f32.xlu1 %v3997_v1  ;;  %3995 = vadd.xlane.f32.xlu0 %v3994_v3 }
 0xba6   : > { %4001 = vadd.xlane.f32.xlu0 %v4000_v5 }
 0xbb3   : > { %4363 = vrot.lane.b32.xlu1 %v7036_v34, %s6507_s22 }
 0xbb7   : > { %3526 = vrot.lane.b32.xlu1 %v7618_v49, %s6508_s24 }
 0xbbc   : > { %4315 = vrot.lane.b32.xlu0 %v7033_v33, %s6507_s22  ;;  %v4129_v33 = vsel %vm1243_vm3, %v4124_v6, 0  ;;  %s7870_s22 = sld [smem:[#allocation39_spill]] }
 0xbc0   : > { %2595 = vrot.lane.b32.xlu0 %v7450_v7, %s6509_s29  ;;  %s6387_s29 = scalar_lea.vmem %s7760_s1, 128 }
 0xbc1   : > { %p6388_p2 = scmp.ne.s32.totalorder %s7760_s1, %s6387_s29 }
 0xbc3   : > { %p6389_p4 = pnand %p6388_p2, %p7871_p8 }
 0xbc5   : > { %p6390_p10 = pneg %p6389_p4 }
 0xbee   : > { %v3981_v2 = vpop.xlane.xlu1 %3980 }
 0xbef   : > { %5996 = vrcp.f32 %v3981_v2 }
 0xbf2   : > { %v3984_v11 = vpop.xlane.xlu0 %3983 }
 0xbf3   : > { %5998 = vrcp.f32 %v3984_v11 }
 0xbf6   : > { %v3987_v9 = vpop.xlane.xlu1 %3986 }
 0xbf7   : > { %6000 = vrcp.f32 %v3987_v9 }
 0xbf9   : > { %v5997_v14 = vpop.eup %5996 }
 0xbfa   : > { %v4011_v34 = vmul.f32 %v5997_v14, %v7639_v40  ;;  %v3990_v15 = vpop.xlane.xlu0 %3989  ;;  %v4268_v29 = vpop.permute.xlu1 %4267 }
 0xbfb   : > { %6002 = vrcp.f32 %v3990_v15  ;;  %v4273_v35 = vsel %vm1243_vm3, %v4268_v29, 0 }
 0xbfc   : > { %v4019_v49 = vpack.c.bf16 %v4011_v34, %v4011_v34 }
 0xbfd   : > { %v5999_v16 = vpop.eup %5998 }
 0xbfe   : > { %v4012_v18 = vmul.f32 %v5999_v16, %v7643_v44  ;;  %5612 = vmatmul.mubr.msk.bf16.vlgmr.msra.gmra.mrb[112].mxu1 %vm1239_vm5, %v4019_v49  ;;  %v4220_v19 = vpop.permute.xlu0 %4219 }
 0xbff   : > { %5622 = vmatpush3.bf16.msra.mxu1 %v4129_v33  ;;  %5623 = vmatprep.mubr.msk.bf16.mxu1 %vm6495_vm0, %v6494_v0  ;;  %v4225_v25 = vsel %vm1243_vm3, %v4220_v19, 0  ;;  %v5875_v19 = vld [vmem:[#allocation9] sm:$0xff]  }
 0xc00   : > { %v4020_v7 = vpack.c.bf16 %v4012_v18, %v4012_v18  ;;  %5633 = vmatprep.subr.bf16.mxu1 %v6494_v0 }
 0xc01   : > { %v6001_v17 = vpop.eup %6000 }
 0xc02   : > { %v4013_v20 = vmul.f32 %v6001_v17, %v7647_v46  ;;  %5618 = vmatmul.mubr.msk.bf16.vlgmr.msra.gmra.mrb[116].mxu0 %vm1239_vm5, %v4020_v7 }
 0xc03   : > { %5628 = vmatpush3.bf16.msra.mxu0 %v4177_v12  ;;  %5629 = vmatprep.mubr.msk.bf16.mxu0 %vm6495_vm0, %v6494_v0 }
 0xc04   : > { %v4021_v22 = vpack.c.bf16 %v4013_v20, %v4013_v20  ;;  %5639 = vmatprep.subr.bf16.mxu0 %v6494_v0 }
 0xc05   : > { %v6003_v13 = vpop.eup %6002 }
 0xc06   : > { %v4014_v24 = vmul.f32 %v6003_v13, %v7651_v48  ;;  %5624 = vmatmul.mubr.msk.bf16.vlgmr.msra.gmra.mrb[116].mxu1 %vm1239_vm5, %v4021_v22 }
 0xc07   : > { %5634 = vmatpush3.bf16.msra.mxu1 %v4225_v25  ;;  %5635 = vmatprep.mubr.msk.bf16.mxu1 %vm6495_vm0, %v6494_v0 }
 0xc08   : > { %v4022_v31 = vpack.c.bf16 %v4014_v24, %v4014_v24  ;;  %5645 = vmatprep.subr.bf16.mxu1 %v6494_v0  ;;  %v5876_v24 = vld [vmem:[#allocation9 + $0x8] sm:$0xff]  }
 0xc0a   : > { %5630 = vmatmul.mubr.msk.bf16.vlgmr.msra.gmra.mrb[120].mxu0 %vm1239_vm5, %v4022_v31 }
 0xc0b   : > { %5640 = vmatpush3.bf16.msra.mxu0 %v4273_v35  ;;  %5641 = vmatprep.mubr.msk.bf16.mxu0 %vm6495_vm0, %v6494_v0 }
 0xc0c   : > { %5651 = vmatprep.subr.bf16.mxu0 %v6494_v0 }
 0xc2b   : > { %v3993_v36 = vpop.xlane.xlu1 %3992 }
 0xc2c   : > { %6004 = vrcp.f32 %v3993_v36 }
 0xc2f   : > { %v3999_v37 = vpop.xlane.xlu1 %3998  ;;  %v3996_v28 = vpop.xlane.xlu0 %3995 }
 0xc30   : > { %6006 = vrcp.f32 %v3999_v37 }
 0xc31   : > { %6008 = vrcp.f32 %v3996_v28 }
 0xc33   : > { %v4002_v38 = vpop.xlane.xlu0 %4001  ;;  %v4364_v43 = vpop.permute.xlu1 %4363 }
 0xc34   : > { %6010 = vrcp.f32 %v4002_v38  ;;  %v4369_v51 = vsel %vm1243_vm3, %v4364_v43, 0 }
 0xc36   : > { %v6005_v39 = vpop.eup %6004 }
 0xc37   : > { %v4015_v23 = vmul.f32 %v6005_v39, %v7663_v32  ;;  %v4316_v40 = vpop.permute.xlu0 %4315  ;;  %v3527_v47 = vpop.permute.xlu1 %3526 }
 0xc38   : > { %v4321_v45 = vsel %vm1243_vm3, %v4316_v40, 0  ;;  %v5094_v40 = vld [vmem:[#allocation11] ss:$0 sm:$0xff] }
 0xc39   : > { %v4023_v27 = vpack.c.bf16 %v4015_v23, %v4015_v23 }
 0xc3a   : > { %v6007_v26 = vpop.eup %6006 }
 0xc3b   : > { %v6009_v44 = vpop.eup %6008  ;;  %5636 = vmatmul.mubr.msk.bf16.vlgmr.msra.gmra.mrb[120].mxu1 %vm1239_vm5, %v4023_v27  ;;  %v2596_v46 = vpop.permute.xlu0 %2595  ;;  %v4017_v48 = vmul.f32 %v6007_v26, %v7669_v54  ;;  %v6020_v27 = vld [vmem:[%s6968_s13] sm:$0xff]   ;;  %s5122_s13 = sshll.u32 %s7857_s2, 7 }
 0xc3c   : > { %v4016_v41 = vmul.f32 %v6009_v44, %v7665_v63  ;;  %5646 = vmatpush3.bf16.msra.mxu1 %v4321_v45  ;;  %2599 = vst.msk [vmem:[#allocation2] sm:$0xff] %vm2598_vm6, %v2596_v46  ;;  %5647 = vmatprep.mubr.msk.bf16.mxu1 %vm6495_vm0, %v6494_v0  ;;  %v4530_v26 = vunpack.c.l.bf16 %v6020_v27  ;;  %v4531_v46 = vunpack.c.h.bf16 %v6020_v27  ;;  %s7758_s24 = scalar_lea.hbm %s7870_s22, %s5122_s13 }
 0xc3d   : > { %3530 = vst.msk [vmem:[#allocation2] sm:$0xff] %vm3529_vm7, %v3527_v47  ;;  %5657 = vmatprep.subr.bf16.mxu1 %v6494_v0  ;;  %v4025_v21 = vpack.c.bf16 %v4017_v48, %v4017_v48 }
 0xc3e   : > { %v4024_v50 = vpack.c.bf16 %v4016_v41, %v4016_v41  ;;  %v6011_v42 = vpop.eup %6010 }
 0xc3f   : > { %v4018_v52 = vmul.f32 %v6011_v42, %v7675_v4 }
 0xc40   : > { %5642 = vmatmul.mubr.msk.bf16.vlgmr.msra.gmra.mrb[124].mxu0 %vm1239_vm5, %v4024_v50 }
 0xc41   : > { %5652 = vmatpush3.bf16.msra.mxu0 %v4369_v51  ;;  %5653 = vmatprep.mubr.msk.bf16.mxu0 %vm6495_vm0, %v6494_v0  ;;  %v4026_v56 = vpack.c.bf16 %v4018_v52, %v4018_v52 }
 0xc42   : > { %5665 = vmatprep.subr.bf16.mxu0 %v6494_v0 }
 0xc43   : > { %5648 = vmatmul.mubr.msk.bf16.vlgmr.msra.gmra.mrb[124].mxu1 %vm1239_vm5, %v4025_v21 }
 0xc44   : > { %5661 = vmatprep.mubr.msk.bf16.mxu1 %vm6495_vm0, %v6494_v0  ;;  %5658 = vmatpush3.bf16.msra.mxu1 %v5875_v19 }
 0xc45   : > { %5659 = vmatprep.subr.bf16.mxu1 %v6494_v0 }
 0xc48   : > { %5654 = vmatmul.mubr.msk.bf16.vlgmr.msra.gmra.mrb[128].mxu0 %vm1239_vm5, %v4026_v56  ;;  %5660 = vmatpush3.bf16.msra.mxu1 %v5876_v24 }
 0xc49   : > { %5669 = vmatprep.mubr.msk.bf16.mxu0 %vm6495_vm0, %v6494_v0  ;;  %5673 = vmatprep.subr.bf16.mxu1 %v6494_v0 }
 0xcd1   : > { %v4069_v57 = vpop.f32.mrb[112].mxu1 }
 0xcd2   : > { %v5613_v58 = vpop.f32.mrb[113].mxu1 }
 0xcd3   : > { %v4072_v55 = vpop.f32.mrb[114].mxu1 }
 0xcd4   : > { %v5614_v59 = vpop.f32.mrb[115].mxu1 }
 0xcd5   : > { %v4117_v53 = vpop.f32.mrb[116].mxu0 }
 0xcd6   : > { %v4419_v61 = vcombine.low %v4069_v57, %v4117_v53  ;;  %v5619_v60 = vpop.f32.mrb[117].mxu0 }
 0xcd7   : > { %v4120_v62 = vpop.f32.mrb[118].mxu0 }
 0xcd8   : > { %v5620_v32 = vpop.f32.mrb[119].mxu0  ;;  %v4427_v8 = vrot.slane %v4419_v61, %v7010_v10 }
 0xcd9   : > { %v4165_v63 = vpop.f32.mrb[116].mxu1  ;;  %v5877_v32 = vld [vmem:[#allocation15] sm:$0xff]  }
 0xcda   : > { %v5625_v30 = vpop.f32.mrb[117].mxu1  ;;  %5666 = vmatpush3.bf16.msra.mxu0 %v5877_v32  ;;  %v5111_v32 = vld [vmem:[#allocation23] ss:$0 sm:$0xff] }
 0xcdb   : > { %v4168_v54 = vpop.f32.mrb[118].mxu1  ;;  %5667 = vmatprep.subr.bf16.mxu0 %v6494_v0  ;;  %v5879_v30 = vld [vmem:[#allocation18] sm:$0xff]  }
 0xcdc   : > { %v5626_v1 = vpop.f32.mrb[119].mxu1  ;;  %v5880_v54 = vld [vmem:[#allocation18 + $0x8] sm:$0xff]  }
 0xcdd   : > { %v4213_v3 = vpop.f32.mrb[120].mxu0 }
 0xcde   : > { %v4420_v4 = vcombine.low %v4165_v63, %v4213_v3  ;;  %v5631_v5 = vpop.f32.mrb[121].mxu0  ;;  %v5878_v63 = vld [vmem:[#allocation15 + $0x8] sm:$0xff]  }
 0xcdf   : > { %v4216_v6 = vpop.f32.mrb[122].mxu0  ;;  %5668 = vmatpush3.bf16.msra.mxu0 %v5878_v63 }
 0xce0   : > { %v4434_v2 = vrot.slane %v4420_v4, %v7010_v10  ;;  %v5632_v11 = vpop.f32.mrb[123].mxu0 }
 0xce1   : > { %v5098_v11 = vld [vmem:[#allocation12] ss:$0 sm:$0xff] }
 0xce2   : > { %v4435_v9 = vcombine.low %v4427_v8, %v4434_v2 }
 0xd0e   : > { %v4261_v14 = vpop.f32.mrb[120].mxu1 }
 0xd0f   : > { %v5637_v34 = vpop.f32.mrb[121].mxu1 }
 0xd10   : > { %v4264_v15 = vpop.f32.mrb[122].mxu1 }
 0xd11   : > { %v5638_v49 = vpop.f32.mrb[123].mxu1 }
 0xd12   : > { %v5099_v49 = vld [vmem:[#allocation14] ss:$0 sm:$0xff] }
 0xd13   : > { %v4309_v16 = vpop.f32.mrb[124].mxu0 }
 0xd14   : > { %v4436_v33 = vcombine.low %v4261_v14, %v4309_v16  ;;  %v5643_v18 = vpop.f32.mrb[125].mxu0 }
 0xd15   : > { %v4312_v7 = vpop.f32.mrb[126].mxu0 }
 0xd16   : > { %v5644_v17 = vpop.f32.mrb[127].mxu0  ;;  %v4357_v12 = vpop.f32.mrb[124].mxu1  ;;  %v4444_v36 = vrot.slane %v4436_v33, %v7010_v10 }
 0xd17   : > { %v5649_v20 = vpop.f32.mrb[125].mxu1  ;;  %v5881_v17 = vld [vmem:[#allocation18 + $0x10] sm:$0xff]  }
 0xd18   : > { %v4360_v22 = vpop.f32.mrb[126].mxu1  ;;  %v5100_v20 = vld [vmem:[#allocation17] ss:$0 sm:$0xff] }
 0xd19   : > { %v5650_v13 = vpop.f32.mrb[127].mxu1 }
 0xd1b   : > { %v4405_v25 = vpop.f32.mrb[128].mxu0 }
 0xd1c   : > { %v4437_v29 = vcombine.low %v4357_v12, %v4405_v25  ;;  %v5655_v31 = vpop.f32.mrb[129].mxu0  ;;  %v5882_v12 = vld [vmem:[#allocation18 + $0x18] sm:$0xff]  }
 0xd1d   : > { %v4408_v35 = vpop.f32.mrb[130].mxu0 }
 0xd1e   : > { %v4451_v37 = vrot.slane %v4437_v29, %v7010_v10  ;;  %v5656_v28 = vpop.f32.mrb[131].mxu0 }
 0xd20   : > { %v4452_v38 = vcombine.low %v4444_v36, %v4451_v37  ;;  %v5104_v37 = vld [vmem:[#allocation20] ss:$0 sm:$0xff] }
 0xd22   : > { %v4455_v39 = vpack.c.bf16 %v4452_v38, %v4435_v9 }
 0xd24   : > { %4457 = vrot.lane.b32.xlu0 %v4455_v39, %s6510_s16  ;;  %s6391_s16 = sshll.u32 %s6511_s14, 4  ;;  %s6392_s16 = int_to_ptr.vmem [resolvable:$false] %s6391_s16 }
 0xd25   : > { %s6393_s30 = scalar_lea.vmem %s6392_s16, 256  ;;  %p6394_p11 = scmp.lt.s32.totalorder %s7760_s1, %s6392_s16 }
 0xd26   : > { %p6395_p3 = scmp.lt.s32.totalorder %s6393_s30, %s6387_s29 }
 0xd28   : > { %p6396_p5 = por %p6395_p3, %p6394_p11 }
 0xd2a   : > { %p6397_p7 = pnand %p6396_p5, %p6390_p10 }
 0xd96   : > { %v4458_v43 = vpop.permute.xlu0 %4457 }
 0xd97   : > { %4461 = vst.msk [vmem:[#allocation2] sm:$0xff] %vm4460_vm8, %v4458_v43 }
 0xd9e   : > { %v4462_v23 = vld [vmem:[#allocation2] sm:$0xff] }
 0xd9f   : > { %5662 = vmatmul.mubr.msk.bf16.vlgmr.msra.gmra.mrb[128].mxu1 %vm650_vm1, %v4462_v23 }
 0xda0   : > { %5681 = vmatprep.mubr.msk.bf16.mxu1 %vm6495_vm0, %v6494_v0  ;;  %5674 = vmatpush3.bf16.msra.mxu1 %v5879_v30 }
 0xda1   : > { %5675 = vmatprep.subr.bf16.mxu1 %v6494_v0 }
 0xda4   : > { %5676 = vmatpush3.bf16.msra.mxu1 %v5880_v54 }
 0xda5   : > { %5677 = vmatprep.subr.bf16.mxu1 %v6494_v0 }
 0xda8   : > { %5678 = vmatpush3.bf16.msra.mxu1 %v5881_v17 }
 0xda9   : > { %5679 = vmatprep.subr.bf16.mxu1 %v6494_v0 }
 0xdac   : > { %5680 = vmatpush3.bf16.msra.mxu1 %v5882_v12 }
 0xe72   : > { %v4523_v10 = vpop.f32.mrb[128].mxu1 }
 0xe73   : > { %v4524_v44 = vadd.f32 %v5094_v40, %v4523_v10  ;;  %v5663_v45 = vpop.f32.mrb[129].mxu1 }
 0xe74   : > { %v4526_v41 = vpop.f32.mrb[130].mxu1 }
 0xe75   : > { %v4532_v47 = vadd.f32 %v4530_v26, %v4524_v44  ;;  %v4527_v48 = vadd.f32 %v5094_v40, %v4526_v41  ;;  %v5664_v50 = vpop.f32.mrb[131].mxu1 }
 0xe77   : > { %v4533_v42 = vadd.f32 %v4531_v46, %v4527_v48  ;;  %v4536_v51 = vsel %vm650_vm1, %v4532_v47, 0.0 }
 0xe78   : > { %4537 = vadd.xlane.f32.xlu1 %v4536_v51 }
 0xe79   : > { %v4539_v21 = vsel %vm650_vm1, %v4533_v42, 0.0 }
 0xe7a   : > { %4540 = vadd.xlane.f32.xlu0 %v4539_v21 }
 0xf05   : > { %v4538_v52 = vpop.xlane.xlu1 %4537 }
 0xf06   : > { %v4543_v56 = vmul.f32 0.03125, %v4538_v52 }
 0xf07   : > { %v4541_v57 = vpop.xlane.xlu0 %4540 }
 0xf08   : > { %v4545_v58 = vsub.f32 %v4532_v47, %v4543_v56  ;;  %v4544_v55 = vmul.f32 0.03125, %v4541_v57 }
 0xf0a   : > { %v4546_v59 = vsub.f32 %v4533_v42, %v4544_v55  ;;  %v4547_v53 = vmul.f32 %v4545_v58, %v4545_v58 }
 0xf0c   : > { %v4549_v61 = vsel %vm650_vm1, %v4547_v53, 0.0  ;;  %v4548_v60 = vmul.f32 %v4546_v59, %v4546_v59 }
 0xf0d   : > { %4550 = vadd.xlane.f32.xlu0 %v4549_v61  ;;  %v5110_v61 = vld [vmem:[#allocation21] ss:$0 sm:$0xff] }
 0xf0e   : > { %v4552_v62 = vsel %vm650_vm1, %v4548_v60, 0.0 }
 0xf0f   : > { %4553 = vadd.xlane.f32.xlu1 %v4552_v62 }
 0xf9a   : > { %v4551_v1 = vpop.xlane.xlu0 %4550 }
 0xf9b   : > { %v4555_v3 = vmul.f32 0.03125, %v4551_v1 }
 0xf9c   : > { %v4554_v4 = vpop.xlane.xlu1 %4553 }
 0xf9d   : > { %v4557_v5 = vadd.f32 1e-05, %v4555_v3  ;;  %v4556_v6 = vmul.f32 0.03125, %v4554_v4 }
 0xf9f   : > { %6012 = vrsqrt.f32 %v4557_v5  ;;  %v4558_v8 = vadd.f32 1e-05, %v4556_v6 }
 0xfa1   : > { %6014 = vrsqrt.f32 %v4558_v8 }
 0xfa9   : > { %v6013_v2 = vpop.eup %6012 }
 0xfaa   : > { %v4561_v9 = vmul.f32 %v6013_v2, %v4545_v58 }
 0xfab   : > { %v6015_v14 = vpop.eup %6014 }
 0xfac   : > { %v4569_v34 = vmul.f32 %v5098_v11, %v4561_v9  ;;  %v4562_v15 = vmul.f32 %v6015_v14, %v4546_v59 }
 0xfae   : > { %v4570_v16 = vmul.f32 %v5098_v11, %v4562_v15  ;;  %v4577_v33 = vadd.f32 %v5099_v49, %v4569_v34 }
 0xfb0   : > { %v4578_v18 = vadd.f32 %v5099_v49, %v4570_v16 }
 0xfb2   : > { %v4583_v7 = vpack.c.bf16 %v4578_v18, %v4577_v33 }
 0xfb4   : > { %5670 = vmatmul.mubr.msk.bf16.vlgmr.msra.gmra.mrb[132].mxu0 %vm650_vm1, %v4583_v7 }
0x1087   : > { %v4640_v19 = vpop.f32.mrb[132].mxu0 }
0x1088   : > { %v4641_v22 = vadd.f32 %v5100_v20, %v4640_v19  ;;  %v5671_v13 = vpop.f32.mrb[133].mxu0 }
0x1089   : > { %v4643_v24 = vpop.f32.mrb[134].mxu0 }
0x108a   : > { %v4644_v25 = vadd.f32 %v5100_v20, %v4643_v24  ;;  %v5672_v29 = vpop.f32.mrb[135].mxu0  ;;  %v4647_v31 = vmax.f32 %v4641_v22, 0.0 }
0x108c   : > { %v4648_v35 = vmax.f32 %v4644_v25, 0.0 }
0x108e   : > { %v4657_v36 = vpack.c.bf16 %v4648_v35, %v4647_v31 }
0x1090   : > { %5682 = vmatmul.mubr.msk.bf16.vlgmr.msra.gmra.mrb[132].mxu1 %vm4689_vm9, %v4657_v36 }
0x1163   : > { %v4727_v28 = vpop.f32.mrb[132].mxu1 }
0x1164   : > { %v4728_v38 = vadd.f32 %v5104_v37, %v4727_v28  ;;  %v5683_v39 = vpop.f32.mrb[133].mxu1 }
0x1165   : > { %v4730_v43 = vpop.f32.mrb[134].mxu1 }
0x1166   : > { %v4734_v0 = vadd.f32 %v4728_v38, %v4577_v33  ;;  %v4731_v23 = vadd.f32 %v5104_v37, %v4730_v43  ;;  %v5684_v40 = vpop.f32.mrb[135].mxu1 }
0x1168   : > { %v4735_v27 = vadd.f32 %v4731_v23, %v4578_v18  ;;  %v4738_v26 = vsel %vm650_vm1, %v4734_v0, 0.0 }
0x1169   : > { %4739 = vadd.xlane.f32.xlu0 %v4738_v26 }
0x116a   : > { %v4741_v10 = vsel %vm650_vm1, %v4735_v27, 0.0 }
0x116b   : > { %4742 = vadd.xlane.f32.xlu1 %v4741_v10 }
0x11f6   : > { %v4740_v44 = vpop.xlane.xlu0 %4739 }
0x11f7   : > { %v4744_v45 = vmul.f32 0.03125, %v4740_v44 }
0x11f8   : > { %v4743_v46 = vpop.xlane.xlu1 %4742 }
0x11f9   : > { %v4746_v41 = vsub.f32 %v4734_v0, %v4744_v45  ;;  %v4745_v47 = vmul.f32 0.03125, %v4743_v46 }
0x11fb   : > { %v4747_v48 = vsub.f32 %v4735_v27, %v4745_v47  ;;  %v4748_v50 = vmul.f32 %v4746_v41, %v4746_v41 }
0x11fd   : > { %v4750_v42 = vsel %vm650_vm1, %v4748_v50, 0.0  ;;  %v4749_v51 = vmul.f32 %v4747_v48, %v4747_v48 }
0x11fe   : > { %4751 = vadd.xlane.f32.xlu0 %v4750_v42 }
0x11ff   : > { %v4753_v21 = vsel %vm650_vm1, %v4749_v51, 0.0 }
0x1200   : > { %4754 = vadd.xlane.f32.xlu1 %v4753_v21 }
0x128b   : > { %v4752_v52 = vpop.xlane.xlu0 %4751 }
0x128c   : > { %v4756_v56 = vmul.f32 0.03125, %v4752_v52 }
0x128d   : > { %v4755_v57 = vpop.xlane.xlu1 %4754 }
0x128e   : > { %v4758_v58 = vadd.f32 1e-05, %v4756_v56  ;;  %v4757_v55 = vmul.f32 0.03125, %v4755_v57 }
0x1290   : > { %6016 = vrsqrt.f32 %v4758_v58  ;;  %v4759_v59 = vadd.f32 1e-05, %v4757_v55 }
0x1292   : > { %6018 = vrsqrt.f32 %v4759_v59 }
0x129a   : > { %v6017_v53 = vpop.eup %6016 }
0x129b   : > { %v4762_v60 = vmul.f32 %v6017_v53, %v4746_v41 }
0x129c   : > { %v6019_v62 = vpop.eup %6018 }
0x129d   : > { %v4770_v63 = vmul.f32 %v5110_v61, %v4762_v60  ;;  %v4763_v30 = vmul.f32 %v6019_v62, %v4747_v48 }
0x129f   : > { %v4778_v54 = vadd.f32 %v5111_v32, %v4770_v63  ;;  %v4771_v1 = vmul.f32 %v5110_v61, %v4763_v30 }
0x12a1   : > { %v5120_v3 = vpack.c.bf16 %v4778_v54, %v4778_v54  ;;  %v4779_v4 = vadd.f32 %v5111_v32, %v4771_v1 }
0x12a3   : > { %v5121_v5 = vpack.c.bf16 %v4779_v4, %v4779_v4  ;;  %4789 = vst.msk [vmem:[%s616_s21] sm:$0xf] %vm4788_vm10, %v5120_v3 }
0x12a5   : > { %4790 = vst.msk [vmem:[%s616_s21 + $0x4] sm:$0xf] %vm4788_vm10, %v5121_v5 }
0x12a6   : > { %6400 = shalt.err (!%p6397_p7)
}
0x12a7   : > { %s6401_s13 = scalar_lea.hbm %s7758_s24, 128  ;;  %s6405_s14 = scalar_lea.hbm %s7870_s22, 256 }
0x12a8   : > { %p6402_p6 = scmp.ne.s32.totalorder %s7758_s24, %s6401_s13  ;;  %p6406_p1 = scmp.lt.u32.totalorder %s7758_s24, %s7870_s22 }
0x12a9   : > { %p6407_p13 = scmp.lt.u32.totalorder %s6405_s14, %s6401_s13  ;;  %p6409_p2 = scmp.lt.u32.totalorder %s6401_s13, %s7758_s24 }
0x12aa   : > { %p6403_p9 = pnand %p6402_p6, %p7871_p8 }
0x12ab   : > { %p6408_p0 = por %p6407_p13, %p6406_p1 }
0x12ac   : > { %p6404_p12 = pneg %p6403_p9 }
0x12ad   : > { %p6410_p4 = por %p6409_p2, %p6408_p0 }
0x12af   : > { %p6411_p10 = pnand %p6410_p4, %p6404_p12 }
0x12b1   : > { %6414 = shalt.err (!%p6411_p10)
}
0x12b2   : > { %s6512_s29 = smov 4   ;;  %s7872_s30 = scalar_lea.sflag [#allocation5], %s6962_s0 }
0x12b3   : > { %5735 = dma.vmem_to_hbm [thread:$0]  (%p7871_p8), %s7760_s1, 128, %s7758_s24, %s7872_s30, %s6498_s15, %s6498_s15, %s6512_s29  }
0x12b4 PF: > { %s7873_s21 = sld [smem:[#allocation33_spill]]  ;;  %p7874_p11 = scmp.ne.s32.totalorder %s7851_s20, 0 }
0x12b5   : > { %p7875_p3 = scmp.ge.s32.totalorder %s6477_s28, 2 }
0x12b7   : > { %p5779_p5 = pnand %p7875_p3, %p7874_p11 }
0x12ba   : > { %s4820_s2 = sand.u32 1, %s7873_s21  }
0x12bb   : > { %s4821_s13 = scalar_lea.sflag [#allocation5], %s4820_s2 }
0x12bc   : > { %6460 = dma.done.wait (!%p5779_p5), %s4821_s13, 128  }
0x12bd   : > { %6462 = vsyncadd (!%p5779_p5), %s4821_s13, 4294967168  ;;  %p32_p7 = scmp.ge.s32.totalorder %s6880_s18, 4   ;;  %s7876_s25 = smov %s6469_s26 }
0x12be   : > { %s7877_s26 = smov %s6473_s27  ;;  %s7878_s27 = smov %s6891_s19 }
0x12bf   : > { %s7879_s28 = smov %s6880_s18  ;;  %34 = sbr.rel (!%p32_p7) target bundleno = 16 (0x10), region = 165 }
0x12c6   :  { %4826 = vsyncpa [#allocation4], 1 }
0x12c7   :  { %4828 = vsyncpa [#allocation4 + $0x1], 1 }
0x12c8   :  { %4829 = vsyncpa [#allocation7], 1 }
0x12c9   :  { %4830 = vsyncpa [#allocation10], 1 }
0x12ca   :  { %4831 = vsyncpa [#allocation13], 1 }
0x12cb   :  { %4832 = vsyncpa [#allocation16], 1 }
0x12cc   :  { %4833 = vsyncpa [#allocation19], 1 }
0x12cd   :  { %4834 = vsyncpa [#allocation22], 1 }
0x12ce   :  { %4835 = vsyncpa [#allocation5], 1 }
0x12cf   :  { %4837 = vsyncpa [#allocation5 + $0x1], 1 }

</bundles_post_ra>
